<compile_context>
chip_gen: v7x
topology: tpu7x:2x2x1
jax: 0.10.0
libtpu: 0.0.40
codegen_flags: <defaults>
</compile_context>

<pallas_src>
import functools

import jax
import jax.numpy as jnp
from jax.experimental import pallas as pl
from jax.experimental.pallas import tpu as pltpu

# ---------------- small BERT config (synthetic) ----------------
VOCAB = 100
HIDDEN = 32
N_LAYERS = 2
N_HEADS = 4
HEAD_DIM = HIDDEN // N_HEADS
INTERMEDIATE = 64
MAX_POS = 16
NUM_LABELS = 5
LN_EPS = 1e-12


# ---------------- fused Pallas kernel ----------------
def _bert_kernel(x_ref, addmask_ref, onehot_ref,
                 emb_g_ref, emb_b_ref,
                 wqkv_ref, bqkv_ref, wo_ref, bo_ref,
                 ln1g_ref, ln1b_ref,
                 w1_ref, b1_ref, w2_ref, b2_ref,
                 ln2g_ref, ln2b_ref,
                 clsw_ref, clsb_ref,
                 logits_ref, loss_ref,
                 ctx_ref, *, B, S):
    H, NH, DH = HIDDEN, N_HEADS, HEAD_DIM
    M = B * S
    scale = 1.0 / float(DH) ** 0.5

    def layernorm(t, g, b):
        mu = jnp.mean(t, axis=-1, keepdims=True)
        var = jnp.mean((t - mu) * (t - mu), axis=-1, keepdims=True)
        return (t - mu) * jax.lax.rsqrt(var + LN_EPS) * g + b

    def gelu(t):
        # TODO(synk): HF BERT default is the exact erf GELU; tanh approximation
        # is used here (numerically very close, not bit-identical).
        c = jnp.float32(0.7978845608028654)  # sqrt(2/pi)
        return 0.5 * t * (1.0 + jnp.tanh(c * (t + 0.044715 * t * t * t)))

    # ---- embeddings LayerNorm ----
    x = x_ref[...].astype(jnp.float32)                      # (M, H)
    x = layernorm(x, emb_g_ref[...], emb_b_ref[...])

    am = addmask_ref[...]                                   # (B, S) additive mask

    # ---- encoder layers (statically unrolled; params stay in VMEM) ----
    for li in range(N_LAYERS):
        # fused QKV projection: one (M, H) @ (H, 3H) matmul
        qkv = jnp.dot(x, wqkv_ref[li],
                      preferred_element_type=jnp.float32) + bqkv_ref[li]  # (M, 3H)

        # attention per (batch, head), all inside this single kernel invocation
        for b in range(B):
            rows = slice(b * S, (b + 1) * S)
            mask_b = am[b:b + 1, :]                         # (1, S)
            for h in range(NH):
                q_off = h * DH
                k_off = H + h * DH
                v_off = 2 * H + h * DH
                qh = qkv[rows, q_off:q_off + DH]            # (S, DH)
                kh = qkv[rows, k_off:k_off + DH]            # (S, DH)
                vh = qkv[rows, v_off:v_off + DH]            # (S, DH)
                s = jnp.dot(qh, kh.T,
                            preferred_element_type=jnp.float32) * scale
                s = s + mask_b                              # broadcast over rows
                s = s - jnp.max(s, axis=-1, keepdims=True)
                p = jnp.exp(s)
                p = p * pl.reciprocal(jnp.sum(p, axis=-1, keepdims=True),
                                      approx=True)
                head_out = jnp.dot(p, vh, preferred_element_type=jnp.float32)
                ctx_ref[rows, h * DH:(h + 1) * DH] = head_out

        ctx = ctx_ref[...]                                  # (M, H), merged heads

        attn_out = jnp.dot(ctx, wo_ref[li],
                           preferred_element_type=jnp.float32) + bo_ref[li]
        x = layernorm(x + attn_out, ln1g_ref[li], ln1b_ref[li])

        ff = gelu(jnp.dot(x, w1_ref[li],
                          preferred_element_type=jnp.float32) + b1_ref[li])
        ff = jnp.dot(ff, w2_ref[li],
                     preferred_element_type=jnp.float32) + b2_ref[li]
        x = layernorm(x + ff, ln2g_ref[li], ln2b_ref[li])

    # ---- classifier head ----
    logits = jnp.dot(x, clsw_ref[...],
                     preferred_element_type=jnp.float32) + clsb_ref[...]  # (M, L)
    logits_ref[...] = logits.astype(logits_ref.dtype)

    # ---- masked token-level cross-entropy ----
    # onehot_ref holds one_hot(label) * loss_mask, so its row-sum is the mask.
    m_row = jnp.max(logits, axis=-1, keepdims=True)
    lse = jnp.log(jnp.sum(jnp.exp(logits - m_row), axis=-1, keepdims=True)) + m_row
    onehot_m = onehot_ref[...]                              # (M, L)
    mask_row = jnp.sum(onehot_m, axis=-1, keepdims=True)    # (M, 1)
    nll = lse * mask_row - jnp.sum(onehot_m * logits, axis=-1, keepdims=True)
    denom = jnp.maximum(jnp.sum(mask_row), 1.0)             # guard all-masked batch
    loss_ref[0, 0] = jnp.sum(nll) / denom


def _full_spec(shape):
    n = len(shape)
    return pl.BlockSpec(shape, lambda i, n=n: (0,) * n)


def bert_fused_call(x, addmask, onehot_masked, p, B, S):
    M = B * S
    in_arrays = [
        x, addmask, onehot_masked,
        p["emb_ln_g"], p["emb_ln_b"],
        p["wqkv"], p["bqkv"], p["wo"], p["bo"],
        p["ln1_g"], p["ln1_b"],
        p["w1"], p["b1"], p["w2"], p["b2"],
        p["ln2_g"], p["ln2_b"],
        p["cls_w"], p["cls_b"],
    ]
    in_specs = [_full_spec(a.shape) for a in in_arrays]

    logits, loss = pl.pallas_call(
        functools.partial(_bert_kernel, B=B, S=S),
        out_shape=(
            jax.ShapeDtypeStruct((M, NUM_LABELS), jnp.float32),
            jax.ShapeDtypeStruct((1, 1), jnp.float32),
        ),
        grid=(1,),
        in_specs=in_specs,
        out_specs=(
            pl.BlockSpec((M, NUM_LABELS), lambda i: (0, 0)),
            pl.BlockSpec((1, 1), lambda i: (0, 0), memory_space=pltpu.SMEM),
        ),
        scratch_shapes=[pltpu.VMEM((M, HIDDEN), jnp.float32)],
        compiler_params=pltpu.CompilerParams(
            dimension_semantics=("arbitrary",)),
    )(*in_arrays)
    return logits, loss[0, 0]


# ---------------- model glue (embedding gather stays in JAX) ----------------
def bert_forward(params, input_ids, attention_mask, labels):
    B, S = input_ids.shape
    M = B * S

    we = jnp.take(params["word_emb"], input_ids, axis=0)      # (B, S, H)
    pe = params["pos_emb"][:S][None, :, :]                    # (1, S, H)
    te = params["type_emb"][0][None, None, :]                 # (1, 1, H), token_type_ids=0
    x = (we + pe + te).reshape(M, HIDDEN).astype(jnp.float32)

    addmask = (1.0 - attention_mask.astype(jnp.float32)) * -10000.0   # (B, S)

    # TODO(synk): HF uses ignore_index=-100 for padded labels; here padding is
    # handled by masking the loss with attention_mask instead.
    loss_mask = attention_mask.reshape(M).astype(jnp.float32)
    onehot = jax.nn.one_hot(labels.reshape(M), NUM_LABELS, dtype=jnp.float32)
    onehot_masked = onehot * loss_mask[:, None]               # (M, NUM_LABELS)

    logits, loss = bert_fused_call(x, addmask, onehot_masked, params, B, S)
    return loss, logits.reshape(B, S, NUM_LABELS)


# ---------------- deterministic parameter init ----------------
def init_params(key):
    std = 0.02
    H, I, L = HIDDEN, INTERMEDIATE, N_LAYERS

    def nrm(k, shape):
        return (jax.random.normal(k, shape, jnp.float32) * std).astype(jnp.float32)

    keys = jax.random.split(key, 4 + L)
    wqkv, wo, w1, w2 = [], [], [], []
    for li in range(L):
        lk = jax.random.split(keys[4 + li], 6)
        wq, wk, wv = nrm(lk[0], (H, H)), nrm(lk[1], (H, H)), nrm(lk[2], (H, H))
        wqkv.append(jnp.concatenate([wq, wk, wv], axis=1))     # (H, 3H) fused QKV
        wo.append(nrm(lk[3], (H, H)))
        w1.append(nrm(lk[4], (H, I)))
        w2.append(nrm(lk[5], (I, H)))

    params = {
        "word_emb": nrm(keys[0], (VOCAB, H)),
        "pos_emb": nrm(keys[1], (MAX_POS, H)),
        "type_emb": nrm(keys[2], (2, H)),
        "emb_ln_g": jnp.ones((1, H), jnp.float32),
        "emb_ln_b": jnp.zeros((1, H), jnp.float32),
        "wqkv": jnp.stack(wqkv),                   # (L, H, 3H)
        "bqkv": jnp.zeros((L, 1, 3 * H), jnp.float32),
        "wo": jnp.stack(wo),                       # (L, H, H)
        "bo": jnp.zeros((L, 1, H), jnp.float32),
        "ln1_g": jnp.ones((L, 1, H), jnp.float32),
        "ln1_b": jnp.zeros((L, 1, H), jnp.float32),
        "w1": jnp.stack(w1),                       # (L, H, I)
        "b1": jnp.zeros((L, 1, I), jnp.float32),
        "w2": jnp.stack(w2),                       # (L, I, H)
        "b2": jnp.zeros((L, 1, H), jnp.float32),
        "ln2_g": jnp.ones((L, 1, H), jnp.float32),
        "ln2_b": jnp.zeros((L, 1, H), jnp.float32),
        "cls_w": nrm(keys[3], (H, NUM_LABELS)),
        "cls_b": jnp.zeros((1, NUM_LABELS), jnp.float32),
    }
    return params


if __name__ == "__main__":
    key = jax.random.PRNGKey(0)
    pkey, ikey, lkey = jax.random.split(key, 3)

    B, S = 2, 8
    params = init_params(pkey)

    input_ids = jax.random.randint(ikey, (B, S), 0, VOCAB, dtype=jnp.int32)
    # second sequence has 2 padding positions
    attention_mask = jnp.array(
        [[1, 1, 1, 1, 1, 1, 1, 1],
         [1, 1, 1, 1, 1, 1, 0, 0]], dtype=jnp.int32)
    labels = jax.random.randint(lkey, (B, S), 0, NUM_LABELS, dtype=jnp.int32)

    fwd = jax.jit(functools.partial(bert_forward, params))
    loss, logits = fwd(input_ids, attention_mask, labels)
    jax.block_until_ready((loss, logits))

    assert logits.shape == (B, S, NUM_LABELS)
    assert loss.shape == ()
    assert bool(jnp.isfinite(loss))
    print("KERNEL_OK")
</pallas_src>

<mosaic_0001>
module attributes {stable_mosaic.version = 11 : i64} {
  func.func @_bert_kernel(%arg0: i32, %arg1: memref<16x32xf32, #tpu.memory_space<vmem>>, %arg2: memref<2x8xf32, #tpu.memory_space<vmem>>, %arg3: memref<16x5xf32, #tpu.memory_space<vmem>>, %arg4: memref<1x32xf32, #tpu.memory_space<vmem>>, %arg5: memref<1x32xf32, #tpu.memory_space<vmem>>, %arg6: memref<2x32x96xf32, #tpu.memory_space<vmem>>, %arg7: memref<2x1x96xf32, #tpu.memory_space<vmem>>, %arg8: memref<2x32x32xf32, #tpu.memory_space<vmem>>, %arg9: memref<2x1x32xf32, #tpu.memory_space<vmem>>, %arg10: memref<2x1x32xf32, #tpu.memory_space<vmem>>, %arg11: memref<2x1x32xf32, #tpu.memory_space<vmem>>, %arg12: memref<2x32x64xf32, #tpu.memory_space<vmem>>, %arg13: memref<2x1x64xf32, #tpu.memory_space<vmem>>, %arg14: memref<2x64x32xf32, #tpu.memory_space<vmem>>, %arg15: memref<2x1x32xf32, #tpu.memory_space<vmem>>, %arg16: memref<2x1x32xf32, #tpu.memory_space<vmem>>, %arg17: memref<2x1x32xf32, #tpu.memory_space<vmem>>, %arg18: memref<32x5xf32, #tpu.memory_space<vmem>>, %arg19: memref<1x5xf32, #tpu.memory_space<vmem>>, %arg20: memref<16x5xf32, #tpu.memory_space<vmem>>, %arg21: memref<1x1xf32, #tpu.memory_space<smem>>, %arg22: memref<16x32xf32, #tpu.memory_space<vmem>>) attributes {dimension_semantics = [#tpu.dimension_semantics<arbitrary>], iteration_bounds = array<i64: 1>, scalar_prefetch = 0 : i64, scratch_operands = 1 : i64, tpu.core_type = #tpu.core_type<tc>, window_params = [{pipeline_mode = #tpu.pipeline_mode<synchronous>, transform_indices = @transform_0, window_bounds = array<i64: 16, 32>}, {pipeline_mode = #tpu.pipeline_mode<synchronous>, transform_indices = @transform_1, window_bounds = array<i64: 2, 8>}, {pipeline_mode = #tpu.pipeline_mode<synchronous>, transform_indices = @transform_2, window_bounds = array<i64: 16, 5>}, {pipeline_mode = #tpu.pipeline_mode<synchronous>, transform_indices = @transform_3, window_bounds = array<i64: 1, 32>}, {pipeline_mode = #tpu.pipeline_mode<synchronous>, transform_indices = @transform_4, window_bounds = array<i64: 1, 32>}, {pipeline_mode = #tpu.pipeline_mode<synchronous>, transform_indices = @transform_5, window_bounds = array<i64: 2, 32, 96>}, {pipeline_mode = #tpu.pipeline_mode<synchronous>, transform_indices = @transform_6, window_bounds = array<i64: 2, 1, 96>}, {pipeline_mode = #tpu.pipeline_mode<synchronous>, transform_indices = @transform_7, window_bounds = array<i64: 2, 32, 32>}, {pipeline_mode = #tpu.pipeline_mode<synchronous>, transform_indices = @transform_8, window_bounds = array<i64: 2, 1, 32>}, {pipeline_mode = #tpu.pipeline_mode<synchronous>, transform_indices = @transform_9, window_bounds = array<i64: 2, 1, 32>}, {pipeline_mode = #tpu.pipeline_mode<synchronous>, transform_indices = @transform_10, window_bounds = array<i64: 2, 1, 32>}, {pipeline_mode = #tpu.pipeline_mode<synchronous>, transform_indices = @transform_11, window_bounds = array<i64: 2, 32, 64>}, {pipeline_mode = #tpu.pipeline_mode<synchronous>, transform_indices = @transform_12, window_bounds = array<i64: 2, 1, 64>}, {pipeline_mode = #tpu.pipeline_mode<synchronous>, transform_indices = @transform_13, window_bounds = array<i64: 2, 64, 32>}, {pipeline_mode = #tpu.pipeline_mode<synchronous>, transform_indices = @transform_14, window_bounds = array<i64: 2, 1, 32>}, {pipeline_mode = #tpu.pipeline_mode<synchronous>, transform_indices = @transform_15, window_bounds = array<i64: 2, 1, 32>}, {pipeline_mode = #tpu.pipeline_mode<synchronous>, transform_indices = @transform_16, window_bounds = array<i64: 2, 1, 32>}, {pipeline_mode = #tpu.pipeline_mode<synchronous>, transform_indices = @transform_17, window_bounds = array<i64: 32, 5>}, {pipeline_mode = #tpu.pipeline_mode<synchronous>, transform_indices = @transform_18, window_bounds = array<i64: 1, 5>}, {pipeline_mode = #tpu.pipeline_mode<synchronous>, transform_indices = @transform_19, window_bounds = array<i64: 16, 5>}, {transform_indices = @transform_20, window_bounds = array<i64: 1, 1>}]} {
    %c0 = arith.constant 0 : index
    %c0_0 = arith.constant 0 : index
    %0 = vector.load %arg1[%c0, %c0_0] : memref<16x32xf32, #tpu.memory_space<vmem>>, vector<16x32xf32>
    %c0_1 = arith.constant 0 : index
    %c0_2 = arith.constant 0 : index
    %1 = vector.load %arg4[%c0_1, %c0_2] : memref<1x32xf32, #tpu.memory_space<vmem>>, vector<1x32xf32>
    %c0_3 = arith.constant 0 : index
    %c0_4 = arith.constant 0 : index
    %2 = vector.load %arg5[%c0_3, %c0_4] : memref<1x32xf32, #tpu.memory_space<vmem>>, vector<1x32xf32>
    %cst = arith.constant dense<0.000000e+00> : vector<16xf32>
    %3 = vector.multi_reduction <add>, %0, %cst [1] : vector<16x32xf32> to vector<16xf32>
    %4 = vector.shape_cast %3 : vector<16xf32> to vector<16x1xf32>
    %cst_5 = arith.constant 3.200000e+01 : f32
    %5 = vector.broadcast %cst_5 : f32 to vector<16x1xf32>
    %6 = arith.divf %4, %5 : vector<16x1xf32>
    %7 = vector.broadcast %6 : vector<16x1xf32> to vector<16x32xf32>
    %8 = arith.subf %0, %7 : vector<16x32xf32>
    %9 = vector.broadcast %6 : vector<16x1xf32> to vector<16x32xf32>
    %10 = arith.subf %0, %9 : vector<16x32xf32>
    %11 = arith.mulf %8, %10 : vector<16x32xf32>
    %cst_6 = arith.constant dense<0.000000e+00> : vector<16xf32>
    %12 = vector.multi_reduction <add>, %11, %cst_6 [1] : vector<16x32xf32> to vector<16xf32>
    %13 = vector.shape_cast %12 : vector<16xf32> to vector<16x1xf32>
    %cst_7 = arith.constant 3.200000e+01 : f32
    %14 = vector.broadcast %cst_7 : f32 to vector<16x1xf32>
    %15 = arith.divf %13, %14 : vector<16x1xf32>
    %16 = vector.broadcast %6 : vector<16x1xf32> to vector<16x32xf32>
    %17 = arith.subf %0, %16 : vector<16x32xf32>
    %cst_8 = arith.constant 9.99999996E-13 : f32
    %18 = vector.broadcast %cst_8 : f32 to vector<16x1xf32>
    %19 = arith.addf %15, %18 : vector<16x1xf32>
    %20 = math.rsqrt %19 : vector<16x1xf32>
    %21 = vector.broadcast %20 : vector<16x1xf32> to vector<16x32xf32>
    %22 = arith.mulf %17, %21 : vector<16x32xf32>
    %23 = vector.broadcast %1 : vector<1x32xf32> to vector<16x32xf32>
    %24 = arith.mulf %22, %23 : vector<16x32xf32>
    %25 = vector.broadcast %2 : vector<1x32xf32> to vector<16x32xf32>
    %26 = arith.addf %24, %25 : vector<16x32xf32>
    %c0_9 = arith.constant 0 : index
    %c0_10 = arith.constant 0 : index
    %27 = vector.load %arg2[%c0_9, %c0_10] : memref<2x8xf32, #tpu.memory_space<vmem>>, vector<2x8xf32>
    %c0_11 = arith.constant 0 : index
    %c0_12 = arith.constant 0 : index
    %c0_13 = arith.constant 0 : index
    %28 = vector.load %arg6[%c0_11, %c0_12, %c0_13] : memref<2x32x96xf32, #tpu.memory_space<vmem>>, vector<1x32x96xf32>
    %29 = vector.shape_cast %28 : vector<1x32x96xf32> to vector<32x96xf32>
    %cst_14 = arith.constant dense<0.000000e+00> : vector<16x96xf32>
    %30 = tpu.matmul %26, %29, %cst_14 {dimension_numbers = #tpu.dot_dimension_numbers<[1], [0], [0], [1], [0, 0, 1, 1], [], []>} : vector<16x32xf32>, vector<32x96xf32>, vector<16x96xf32> -> vector<16x96xf32>
    %c0_15 = arith.constant 0 : index
    %c0_16 = arith.constant 0 : index
    %c0_17 = arith.constant 0 : index
    %31 = vector.load %arg7[%c0_15, %c0_16, %c0_17] : memref<2x1x96xf32, #tpu.memory_space<vmem>>, vector<1x1x96xf32>
    %32 = vector.shape_cast %31 : vector<1x1x96xf32> to vector<1x96xf32>
    %33 = vector.broadcast %32 : vector<1x96xf32> to vector<16x96xf32>
    %34 = arith.addf %30, %33 : vector<16x96xf32>
    %35 = vector.extract_strided_slice %27 {offsets = [0, 0], sizes = [1, 8], strides = [1, 1]} : vector<2x8xf32> to vector<1x8xf32>
    %36 = vector.extract_strided_slice %34 {offsets = [0, 0], sizes = [8, 8], strides = [1, 1]} : vector<16x96xf32> to vector<8x8xf32>
    %37 = vector.extract_strided_slice %34 {offsets = [0, 32], sizes = [8, 8], strides = [1, 1]} : vector<16x96xf32> to vector<8x8xf32>
    %38 = vector.extract_strided_slice %34 {offsets = [0, 64], sizes = [8, 8], strides = [1, 1]} : vector<16x96xf32> to vector<8x8xf32>
    %39 = tpu.transpose %37, [1, 0] : vector<8x8xf32> -> vector<8x8xf32>
    %cst_18 = arith.constant dense<0.000000e+00> : vector<8x8xf32>
    %40 = tpu.matmul %36, %39, %cst_18 {dimension_numbers = #tpu.dot_dimension_numbers<[1], [0], [0], [1], [0, 0, 1, 1], [], []>} : vector<8x8xf32>, vector<8x8xf32>, vector<8x8xf32> -> vector<8x8xf32>
    %cst_19 = arith.constant 0.353553385 : f32
    %41 = vector.broadcast %cst_19 : f32 to vector<8x8xf32>
    %42 = arith.mulf %40, %41 : vector<8x8xf32>
    %43 = vector.broadcast %35 : vector<1x8xf32> to vector<8x8xf32>
    %44 = arith.addf %42, %43 : vector<8x8xf32>
    %cst_20 = arith.constant dense<0xFF800000> : vector<8xf32>
    %45 = vector.multi_reduction <maximumf>, %44, %cst_20 [1] : vector<8x8xf32> to vector<8xf32>
    %46 = vector.shape_cast %45 : vector<8xf32> to vector<8x1xf32>
    %47 = vector.broadcast %46 : vector<8x1xf32> to vector<8x8xf32>
    %48 = arith.subf %44, %47 : vector<8x8xf32>
    %49 = math.exp %48 : vector<8x8xf32>
    %cst_21 = arith.constant dense<0.000000e+00> : vector<8xf32>
    %50 = vector.multi_reduction <add>, %49, %cst_21 [1] : vector<8x8xf32> to vector<8xf32>
    %51 = vector.shape_cast %50 : vector<8xf32> to vector<8x1xf32>
    %52 = tpu.reciprocal %51 {approx = true} : vector<8x1xf32> -> vector<8x1xf32>
    %53 = vector.broadcast %52 : vector<8x1xf32> to vector<8x8xf32>
    %54 = arith.mulf %49, %53 : vector<8x8xf32>
    %cst_22 = arith.constant dense<0.000000e+00> : vector<8x8xf32>
    %55 = tpu.matmul %54, %38, %cst_22 {dimension_numbers = #tpu.dot_dimension_numbers<[1], [0], [0], [1], [0, 0, 1, 1], [], []>} : vector<8x8xf32>, vector<8x8xf32>, vector<8x8xf32> -> vector<8x8xf32>
    %c0_23 = arith.constant 0 : index
    %c0_24 = arith.constant 0 : index
    %56 = vector.load %arg22[%c0_23, %c0_24] : memref<16x32xf32, #tpu.memory_space<vmem>>, vector<8x8xf32>
    tpu.vector_store %arg22[%c0_23, %c0_24], %55 {strides = array<i32>} : memref<16x32xf32, #tpu.memory_space<vmem>>, vector<8x8xf32>,
    %57 = vector.extract_strided_slice %34 {offsets = [0, 8], sizes = [8, 8], strides = [1, 1]} : vector<16x96xf32> to vector<8x8xf32>
    %58 = vector.extract_strided_slice %34 {offsets = [0, 40], sizes = [8, 8], strides = [1, 1]} : vector<16x96xf32> to vector<8x8xf32>
    %59 = vector.extract_strided_slice %34 {offsets = [0, 72], sizes = [8, 8], strides = [1, 1]} : vector<16x96xf32> to vector<8x8xf32>
    %60 = tpu.transpose %58, [1, 0] : vector<8x8xf32> -> vector<8x8xf32>
    %cst_25 = arith.constant dense<0.000000e+00> : vector<8x8xf32>
    %61 = tpu.matmul %57, %60, %cst_25 {dimension_numbers = #tpu.dot_dimension_numbers<[1], [0], [0], [1], [0, 0, 1, 1], [], []>} : vector<8x8xf32>, vector<8x8xf32>, vector<8x8xf32> -> vector<8x8xf32>
    %cst_26 = arith.constant 0.353553385 : f32
    %62 = vector.broadcast %cst_26 : f32 to vector<8x8xf32>
    %63 = arith.mulf %61, %62 : vector<8x8xf32>
    %64 = vector.broadcast %35 : vector<1x8xf32> to vector<8x8xf32>
    %65 = arith.addf %63, %64 : vector<8x8xf32>
    %cst_27 = arith.constant dense<0xFF800000> : vector<8xf32>
    %66 = vector.multi_reduction <maximumf>, %65, %cst_27 [1] : vector<8x8xf32> to vector<8xf32>
    %67 = vector.shape_cast %66 : vector<8xf32> to vector<8x1xf32>
    %68 = vector.broadcast %67 : vector<8x1xf32> to vector<8x8xf32>
    %69 = arith.subf %65, %68 : vector<8x8xf32>
    %70 = math.exp %69 : vector<8x8xf32>
    %cst_28 = arith.constant dense<0.000000e+00> : vector<8xf32>
    %71 = vector.multi_reduction <add>, %70, %cst_28 [1] : vector<8x8xf32> to vector<8xf32>
    %72 = vector.shape_cast %71 : vector<8xf32> to vector<8x1xf32>
    %73 = tpu.reciprocal %72 {approx = true} : vector<8x1xf32> -> vector<8x1xf32>
    %74 = vector.broadcast %73 : vector<8x1xf32> to vector<8x8xf32>
    %75 = arith.mulf %70, %74 : vector<8x8xf32>
    %cst_29 = arith.constant dense<0.000000e+00> : vector<8x8xf32>
    %76 = tpu.matmul %75, %59, %cst_29 {dimension_numbers = #tpu.dot_dimension_numbers<[1], [0], [0], [1], [0, 0, 1, 1], [], []>} : vector<8x8xf32>, vector<8x8xf32>, vector<8x8xf32> -> vector<8x8xf32>
    %c0_30 = arith.constant 0 : index
    %c8 = arith.constant 8 : index
    %77 = vector.load %arg22[%c0_30, %c8] : memref<16x32xf32, #tpu.memory_space<vmem>>, vector<8x8xf32>
    tpu.vector_store %arg22[%c0_30, %c8], %76 {strides = array<i32>} : memref<16x32xf32, #tpu.memory_space<vmem>>, vector<8x8xf32>,
    %78 = vector.extract_strided_slice %34 {offsets = [0, 16], sizes = [8, 8], strides = [1, 1]} : vector<16x96xf32> to vector<8x8xf32>
    %79 = vector.extract_strided_slice %34 {offsets = [0, 48], sizes = [8, 8], strides = [1, 1]} : vector<16x96xf32> to vector<8x8xf32>
    %80 = vector.extract_strided_slice %34 {offsets = [0, 80], sizes = [8, 8], strides = [1, 1]} : vector<16x96xf32> to vector<8x8xf32>
    %81 = tpu.transpose %79, [1, 0] : vector<8x8xf32> -> vector<8x8xf32>
    %cst_31 = arith.constant dense<0.000000e+00> : vector<8x8xf32>
    %82 = tpu.matmul %78, %81, %cst_31 {dimension_numbers = #tpu.dot_dimension_numbers<[1], [0], [0], [1], [0, 0, 1, 1], [], []>} : vector<8x8xf32>, vector<8x8xf32>, vector<8x8xf32> -> vector<8x8xf32>
    %cst_32 = arith.constant 0.353553385 : f32
    %83 = vector.broadcast %cst_32 : f32 to vector<8x8xf32>
    %84 = arith.mulf %82, %83 : vector<8x8xf32>
    %85 = vector.broadcast %35 : vector<1x8xf32> to vector<8x8xf32>
    %86 = arith.addf %84, %85 : vector<8x8xf32>
    %cst_33 = arith.constant dense<0xFF800000> : vector<8xf32>
    %87 = vector.multi_reduction <maximumf>, %86, %cst_33 [1] : vector<8x8xf32> to vector<8xf32>
    %88 = vector.shape_cast %87 : vector<8xf32> to vector<8x1xf32>
    %89 = vector.broadcast %88 : vector<8x1xf32> to vector<8x8xf32>
    %90 = arith.subf %86, %89 : vector<8x8xf32>
    %91 = math.exp %90 : vector<8x8xf32>
    %cst_34 = arith.constant dense<0.000000e+00> : vector<8xf32>
    %92 = vector.multi_reduction <add>, %91, %cst_34 [1] : vector<8x8xf32> to vector<8xf32>
    %93 = vector.shape_cast %92 : vector<8xf32> to vector<8x1xf32>
    %94 = tpu.reciprocal %93 {approx = true} : vector<8x1xf32> -> vector<8x1xf32>
    %95 = vector.broadcast %94 : vector<8x1xf32> to vector<8x8xf32>
    %96 = arith.mulf %91, %95 : vector<8x8xf32>
    %cst_35 = arith.constant dense<0.000000e+00> : vector<8x8xf32>
    %97 = tpu.matmul %96, %80, %cst_35 {dimension_numbers = #tpu.dot_dimension_numbers<[1], [0], [0], [1], [0, 0, 1, 1], [], []>} : vector<8x8xf32>, vector<8x8xf32>, vector<8x8xf32> -> vector<8x8xf32>
    %c0_36 = arith.constant 0 : index
    %c16 = arith.constant 16 : index
    %98 = vector.load %arg22[%c0_36, %c16] : memref<16x32xf32, #tpu.memory_space<vmem>>, vector<8x8xf32>
    tpu.vector_store %arg22[%c0_36, %c16], %97 {strides = array<i32>} : memref<16x32xf32, #tpu.memory_space<vmem>>, vector<8x8xf32>,
    %99 = vector.extract_strided_slice %34 {offsets = [0, 24], sizes = [8, 8], strides = [1, 1]} : vector<16x96xf32> to vector<8x8xf32>
    %100 = vector.extract_strided_slice %34 {offsets = [0, 56], sizes = [8, 8], strides = [1, 1]} : vector<16x96xf32> to vector<8x8xf32>
    %101 = vector.extract_strided_slice %34 {offsets = [0, 88], sizes = [8, 8], strides = [1, 1]} : vector<16x96xf32> to vector<8x8xf32>
    %102 = tpu.transpose %100, [1, 0] : vector<8x8xf32> -> vector<8x8xf32>
    %cst_37 = arith.constant dense<0.000000e+00> : vector<8x8xf32>
    %103 = tpu.matmul %99, %102, %cst_37 {dimension_numbers = #tpu.dot_dimension_numbers<[1], [0], [0], [1], [0, 0, 1, 1], [], []>} : vector<8x8xf32>, vector<8x8xf32>, vector<8x8xf32> -> vector<8x8xf32>
    %cst_38 = arith.constant 0.353553385 : f32
    %104 = vector.broadcast %cst_38 : f32 to vector<8x8xf32>
    %105 = arith.mulf %103, %104 : vector<8x8xf32>
    %106 = vector.broadcast %35 : vector<1x8xf32> to vector<8x8xf32>
    %107 = arith.addf %105, %106 : vector<8x8xf32>
    %cst_39 = arith.constant dense<0xFF800000> : vector<8xf32>
    %108 = vector.multi_reduction <maximumf>, %107, %cst_39 [1] : vector<8x8xf32> to vector<8xf32>
    %109 = vector.shape_cast %108 : vector<8xf32> to vector<8x1xf32>
    %110 = vector.broadcast %109 : vector<8x1xf32> to vector<8x8xf32>
    %111 = arith.subf %107, %110 : vector<8x8xf32>
    %112 = math.exp %111 : vector<8x8xf32>
    %cst_40 = arith.constant dense<0.000000e+00> : vector<8xf32>
    %113 = vector.multi_reduction <add>, %112, %cst_40 [1] : vector<8x8xf32> to vector<8xf32>
    %114 = vector.shape_cast %113 : vector<8xf32> to vector<8x1xf32>
    %115 = tpu.reciprocal %114 {approx = true} : vector<8x1xf32> -> vector<8x1xf32>
    %116 = vector.broadcast %115 : vector<8x1xf32> to vector<8x8xf32>
    %117 = arith.mulf %112, %116 : vector<8x8xf32>
    %cst_41 = arith.constant dense<0.000000e+00> : vector<8x8xf32>
    %118 = tpu.matmul %117, %101, %cst_41 {dimension_numbers = #tpu.dot_dimension_numbers<[1], [0], [0], [1], [0, 0, 1, 1], [], []>} : vector<8x8xf32>, vector<8x8xf32>, vector<8x8xf32> -> vector<8x8xf32>
    %c0_42 = arith.constant 0 : index
    %c24 = arith.constant 24 : index
    %119 = vector.load %arg22[%c0_42, %c24] : memref<16x32xf32, #tpu.memory_space<vmem>>, vector<8x8xf32>
    tpu.vector_store %arg22[%c0_42, %c24], %118 {strides = array<i32>} : memref<16x32xf32, #tpu.memory_space<vmem>>, vector<8x8xf32>,
    %120 = vector.extract_strided_slice %27 {offsets = [1, 0], sizes = [1, 8], strides = [1, 1]} : vector<2x8xf32> to vector<1x8xf32>
    %121 = vector.extract_strided_slice %34 {offsets = [8, 0], sizes = [8, 8], strides = [1, 1]} : vector<16x96xf32> to vector<8x8xf32>
    %122 = vector.extract_strided_slice %34 {offsets = [8, 32], sizes = [8, 8], strides = [1, 1]} : vector<16x96xf32> to vector<8x8xf32>
    %123 = vector.extract_strided_slice %34 {offsets = [8, 64], sizes = [8, 8], strides = [1, 1]} : vector<16x96xf32> to vector<8x8xf32>
    %124 = tpu.transpose %122, [1, 0] : vector<8x8xf32> -> vector<8x8xf32>
    %cst_43 = arith.constant dense<0.000000e+00> : vector<8x8xf32>
    %125 = tpu.matmul %121, %124, %cst_43 {dimension_numbers = #tpu.dot_dimension_numbers<[1], [0], [0], [1], [0, 0, 1, 1], [], []>} : vector<8x8xf32>, vector<8x8xf32>, vector<8x8xf32> -> vector<8x8xf32>
    %cst_44 = arith.constant 0.353553385 : f32
    %126 = vector.broadcast %cst_44 : f32 to vector<8x8xf32>
    %127 = arith.mulf %125, %126 : vector<8x8xf32>
    %128 = vector.broadcast %120 : vector<1x8xf32> to vector<8x8xf32>
    %129 = arith.addf %127, %128 : vector<8x8xf32>
    %cst_45 = arith.constant dense<0xFF800000> : vector<8xf32>
    %130 = vector.multi_reduction <maximumf>, %129, %cst_45 [1] : vector<8x8xf32> to vector<8xf32>
    %131 = vector.shape_cast %130 : vector<8xf32> to vector<8x1xf32>
    %132 = vector.broadcast %131 : vector<8x1xf32> to vector<8x8xf32>
    %133 = arith.subf %129, %132 : vector<8x8xf32>
    %134 = math.exp %133 : vector<8x8xf32>
    %cst_46 = arith.constant dense<0.000000e+00> : vector<8xf32>
    %135 = vector.multi_reduction <add>, %134, %cst_46 [1] : vector<8x8xf32> to vector<8xf32>
    %136 = vector.shape_cast %135 : vector<8xf32> to vector<8x1xf32>
    %137 = tpu.reciprocal %136 {approx = true} : vector<8x1xf32> -> vector<8x1xf32>
    %138 = vector.broadcast %137 : vector<8x1xf32> to vector<8x8xf32>
    %139 = arith.mulf %134, %138 : vector<8x8xf32>
    %cst_47 = arith.constant dense<0.000000e+00> : vector<8x8xf32>
    %140 = tpu.matmul %139, %123, %cst_47 {dimension_numbers = #tpu.dot_dimension_numbers<[1], [0], [0], [1], [0, 0, 1, 1], [], []>} : vector<8x8xf32>, vector<8x8xf32>, vector<8x8xf32> -> vector<8x8xf32>
    %c8_48 = arith.constant 8 : index
    %c0_49 = arith.constant 0 : index
    %141 = vector.load %arg22[%c8_48, %c0_49] : memref<16x32xf32, #tpu.memory_space<vmem>>, vector<8x8xf32>
    tpu.vector_store %arg22[%c8_48, %c0_49], %140 {strides = array<i32>} : memref<16x32xf32, #tpu.memory_space<vmem>>, vector<8x8xf32>,
    %142 = vector.extract_strided_slice %34 {offsets = [8, 8], sizes = [8, 8], strides = [1, 1]} : vector<16x96xf32> to vector<8x8xf32>
    %143 = vector.extract_strided_slice %34 {offsets = [8, 40], sizes = [8, 8], strides = [1, 1]} : vector<16x96xf32> to vector<8x8xf32>
    %144 = vector.extract_strided_slice %34 {offsets = [8, 72], sizes = [8, 8], strides = [1, 1]} : vector<16x96xf32> to vector<8x8xf32>
    %145 = tpu.transpose %143, [1, 0] : vector<8x8xf32> -> vector<8x8xf32>
    %cst_50 = arith.constant dense<0.000000e+00> : vector<8x8xf32>
    %146 = tpu.matmul %142, %145, %cst_50 {dimension_numbers = #tpu.dot_dimension_numbers<[1], [0], [0], [1], [0, 0, 1, 1], [], []>} : vector<8x8xf32>, vector<8x8xf32>, vector<8x8xf32> -> vector<8x8xf32>
    %cst_51 = arith.constant 0.353553385 : f32
    %147 = vector.broadcast %cst_51 : f32 to vector<8x8xf32>
    %148 = arith.mulf %146, %147 : vector<8x8xf32>
    %149 = vector.broadcast %120 : vector<1x8xf32> to vector<8x8xf32>
    %150 = arith.addf %148, %149 : vector<8x8xf32>
    %cst_52 = arith.constant dense<0xFF800000> : vector<8xf32>
    %151 = vector.multi_reduction <maximumf>, %150, %cst_52 [1] : vector<8x8xf32> to vector<8xf32>
    %152 = vector.shape_cast %151 : vector<8xf32> to vector<8x1xf32>
    %153 = vector.broadcast %152 : vector<8x1xf32> to vector<8x8xf32>
    %154 = arith.subf %150, %153 : vector<8x8xf32>
    %155 = math.exp %154 : vector<8x8xf32>
    %cst_53 = arith.constant dense<0.000000e+00> : vector<8xf32>
    %156 = vector.multi_reduction <add>, %155, %cst_53 [1] : vector<8x8xf32> to vector<8xf32>
    %157 = vector.shape_cast %156 : vector<8xf32> to vector<8x1xf32>
    %158 = tpu.reciprocal %157 {approx = true} : vector<8x1xf32> -> vector<8x1xf32>
    %159 = vector.broadcast %158 : vector<8x1xf32> to vector<8x8xf32>
    %160 = arith.mulf %155, %159 : vector<8x8xf32>
    %cst_54 = arith.constant dense<0.000000e+00> : vector<8x8xf32>
    %161 = tpu.matmul %160, %144, %cst_54 {dimension_numbers = #tpu.dot_dimension_numbers<[1], [0], [0], [1], [0, 0, 1, 1], [], []>} : vector<8x8xf32>, vector<8x8xf32>, vector<8x8xf32> -> vector<8x8xf32>
    %c8_55 = arith.constant 8 : index
    %c8_56 = arith.constant 8 : index
    %162 = vector.load %arg22[%c8_55, %c8_56] : memref<16x32xf32, #tpu.memory_space<vmem>>, vector<8x8xf32>
    tpu.vector_store %arg22[%c8_55, %c8_56], %161 {strides = array<i32>} : memref<16x32xf32, #tpu.memory_space<vmem>>, vector<8x8xf32>,
    %163 = vector.extract_strided_slice %34 {offsets = [8, 16], sizes = [8, 8], strides = [1, 1]} : vector<16x96xf32> to vector<8x8xf32>
    %164 = vector.extract_strided_slice %34 {offsets = [8, 48], sizes = [8, 8], strides = [1, 1]} : vector<16x96xf32> to vector<8x8xf32>
    %165 = vector.extract_strided_slice %34 {offsets = [8, 80], sizes = [8, 8], strides = [1, 1]} : vector<16x96xf32> to vector<8x8xf32>
    %166 = tpu.transpose %164, [1, 0] : vector<8x8xf32> -> vector<8x8xf32>
    %cst_57 = arith.constant dense<0.000000e+00> : vector<8x8xf32>
    %167 = tpu.matmul %163, %166, %cst_57 {dimension_numbers = #tpu.dot_dimension_numbers<[1], [0], [0], [1], [0, 0, 1, 1], [], []>} : vector<8x8xf32>, vector<8x8xf32>, vector<8x8xf32> -> vector<8x8xf32>
    %cst_58 = arith.constant 0.353553385 : f32
    %168 = vector.broadcast %cst_58 : f32 to vector<8x8xf32>
    %169 = arith.mulf %167, %168 : vector<8x8xf32>
    %170 = vector.broadcast %120 : vector<1x8xf32> to vector<8x8xf32>
    %171 = arith.addf %169, %170 : vector<8x8xf32>
    %cst_59 = arith.constant dense<0xFF800000> : vector<8xf32>
    %172 = vector.multi_reduction <maximumf>, %171, %cst_59 [1] : vector<8x8xf32> to vector<8xf32>
    %173 = vector.shape_cast %172 : vector<8xf32> to vector<8x1xf32>
    %174 = vector.broadcast %173 : vector<8x1xf32> to vector<8x8xf32>
    %175 = arith.subf %171, %174 : vector<8x8xf32>
    %176 = math.exp %175 : vector<8x8xf32>
    %cst_60 = arith.constant dense<0.000000e+00> : vector<8xf32>
    %177 = vector.multi_reduction <add>, %176, %cst_60 [1] : vector<8x8xf32> to vector<8xf32>
    %178 = vector.shape_cast %177 : vector<8xf32> to vector<8x1xf32>
    %179 = tpu.reciprocal %178 {approx = true} : vector<8x1xf32> -> vector<8x1xf32>
    %180 = vector.broadcast %179 : vector<8x1xf32> to vector<8x8xf32>
    %181 = arith.mulf %176, %180 : vector<8x8xf32>
    %cst_61 = arith.constant dense<0.000000e+00> : vector<8x8xf32>
    %182 = tpu.matmul %181, %165, %cst_61 {dimension_numbers = #tpu.dot_dimension_numbers<[1], [0], [0], [1], [0, 0, 1, 1], [], []>} : vector<8x8xf32>, vector<8x8xf32>, vector<8x8xf32> -> vector<8x8xf32>
    %c8_62 = arith.constant 8 : index
    %c16_63 = arith.constant 16 : index
    %183 = vector.load %arg22[%c8_62, %c16_63] : memref<16x32xf32, #tpu.memory_space<vmem>>, vector<8x8xf32>
    tpu.vector_store %arg22[%c8_62, %c16_63], %182 {strides = array<i32>} : memref<16x32xf32, #tpu.memory_space<vmem>>, vector<8x8xf32>,
    %184 = vector.extract_strided_slice %34 {offsets = [8, 24], sizes = [8, 8], strides = [1, 1]} : vector<16x96xf32> to vector<8x8xf32>
    %185 = vector.extract_strided_slice %34 {offsets = [8, 56], sizes = [8, 8], strides = [1, 1]} : vector<16x96xf32> to vector<8x8xf32>
    %186 = vector.extract_strided_slice %34 {offsets = [8, 88], sizes = [8, 8], strides = [1, 1]} : vector<16x96xf32> to vector<8x8xf32>
    %187 = tpu.transpose %185, [1, 0] : vector<8x8xf32> -> vector<8x8xf32>
    %cst_64 = arith.constant dense<0.000000e+00> : vector<8x8xf32>
    %188 = tpu.matmul %184, %187, %cst_64 {dimension_numbers = #tpu.dot_dimension_numbers<[1], [0], [0], [1], [0, 0, 1, 1], [], []>} : vector<8x8xf32>, vector<8x8xf32>, vector<8x8xf32> -> vector<8x8xf32>
    %cst_65 = arith.constant 0.353553385 : f32
    %189 = vector.broadcast %cst_65 : f32 to vector<8x8xf32>
    %190 = arith.mulf %188, %189 : vector<8x8xf32>
    %191 = vector.broadcast %120 : vector<1x8xf32> to vector<8x8xf32>
    %192 = arith.addf %190, %191 : vector<8x8xf32>
    %cst_66 = arith.constant dense<0xFF800000> : vector<8xf32>
    %193 = vector.multi_reduction <maximumf>, %192, %cst_66 [1] : vector<8x8xf32> to vector<8xf32>
    %194 = vector.shape_cast %193 : vector<8xf32> to vector<8x1xf32>
    %195 = vector.broadcast %194 : vector<8x1xf32> to vector<8x8xf32>
    %196 = arith.subf %192, %195 : vector<8x8xf32>
    %197 = math.exp %196 : vector<8x8xf32>
    %cst_67 = arith.constant dense<0.000000e+00> : vector<8xf32>
    %198 = vector.multi_reduction <add>, %197, %cst_67 [1] : vector<8x8xf32> to vector<8xf32>
    %199 = vector.shape_cast %198 : vector<8xf32> to vector<8x1xf32>
    %200 = tpu.reciprocal %199 {approx = true} : vector<8x1xf32> -> vector<8x1xf32>
    %201 = vector.broadcast %200 : vector<8x1xf32> to vector<8x8xf32>
    %202 = arith.mulf %197, %201 : vector<8x8xf32>
    %cst_68 = arith.constant dense<0.000000e+00> : vector<8x8xf32>
    %203 = tpu.matmul %202, %186, %cst_68 {dimension_numbers = #tpu.dot_dimension_numbers<[1], [0], [0], [1], [0, 0, 1, 1], [], []>} : vector<8x8xf32>, vector<8x8xf32>, vector<8x8xf32> -> vector<8x8xf32>
    %c8_69 = arith.constant 8 : index
    %c24_70 = arith.constant 24 : index
    %204 = vector.load %arg22[%c8_69, %c24_70] : memref<16x32xf32, #tpu.memory_space<vmem>>, vector<8x8xf32>
    tpu.vector_store %arg22[%c8_69, %c24_70], %203 {strides = array<i32>} : memref<16x32xf32, #tpu.memory_space<vmem>>, vector<8x8xf32>,
    %c0_71 = arith.constant 0 : index
    %c0_72 = arith.constant 0 : index
    %205 = vector.load %arg22[%c0_71, %c0_72] : memref<16x32xf32, #tpu.memory_space<vmem>>, vector<16x32xf32>
    %c0_73 = arith.constant 0 : index
    %c0_74 = arith.constant 0 : index
    %c0_75 = arith.constant 0 : index
    %206 = vector.load %arg8[%c0_73, %c0_74, %c0_75] : memref<2x32x32xf32, #tpu.memory_space<vmem>>, vector<1x32x32xf32>
    %207 = vector.shape_cast %206 : vector<1x32x32xf32> to vector<32x32xf32>
    %cst_76 = arith.constant dense<0.000000e+00> : vector<16x32xf32>
    %208 = tpu.matmul %205, %207, %cst_76 {dimension_numbers = #tpu.dot_dimension_numbers<[1], [0], [0], [1], [0, 0, 1, 1], [], []>} : vector<16x32xf32>, vector<32x32xf32>, vector<16x32xf32> -> vector<16x32xf32>
    %c0_77 = arith.constant 0 : index
    %c0_78 = arith.constant 0 : index
    %c0_79 = arith.constant 0 : index
    %209 = vector.load %arg9[%c0_77, %c0_78, %c0_79] : memref<2x1x32xf32, #tpu.memory_space<vmem>>, vector<1x1x32xf32>
    %210 = vector.shape_cast %209 : vector<1x1x32xf32> to vector<1x32xf32>
    %211 = vector.broadcast %210 : vector<1x32xf32> to vector<16x32xf32>
    %212 = arith.addf %208, %211 : vector<16x32xf32>
    %213 = arith.addf %26, %212 : vector<16x32xf32>
    %c0_80 = arith.constant 0 : index
    %c0_81 = arith.constant 0 : index
    %c0_82 = arith.constant 0 : index
    %214 = vector.load %arg10[%c0_80, %c0_81, %c0_82] : memref<2x1x32xf32, #tpu.memory_space<vmem>>, vector<1x1x32xf32>
    %215 = vector.shape_cast %214 : vector<1x1x32xf32> to vector<1x32xf32>
    %c0_83 = arith.constant 0 : index
    %c0_84 = arith.constant 0 : index
    %c0_85 = arith.constant 0 : index
    %216 = vector.load %arg11[%c0_83, %c0_84, %c0_85] : memref<2x1x32xf32, #tpu.memory_space<vmem>>, vector<1x1x32xf32>
    %217 = vector.shape_cast %216 : vector<1x1x32xf32> to vector<1x32xf32>
    %cst_86 = arith.constant dense<0.000000e+00> : vector<16xf32>
    %218 = vector.multi_reduction <add>, %213, %cst_86 [1] : vector<16x32xf32> to vector<16xf32>
    %219 = vector.shape_cast %218 : vector<16xf32> to vector<16x1xf32>
    %cst_87 = arith.constant 3.200000e+01 : f32
    %220 = vector.broadcast %cst_87 : f32 to vector<16x1xf32>
    %221 = arith.divf %219, %220 : vector<16x1xf32>
    %222 = vector.broadcast %221 : vector<16x1xf32> to vector<16x32xf32>
    %223 = arith.subf %213, %222 : vector<16x32xf32>
    %224 = vector.broadcast %221 : vector<16x1xf32> to vector<16x32xf32>
    %225 = arith.subf %213, %224 : vector<16x32xf32>
    %226 = arith.mulf %223, %225 : vector<16x32xf32>
    %cst_88 = arith.constant dense<0.000000e+00> : vector<16xf32>
    %227 = vector.multi_reduction <add>, %226, %cst_88 [1] : vector<16x32xf32> to vector<16xf32>
    %228 = vector.shape_cast %227 : vector<16xf32> to vector<16x1xf32>
    %cst_89 = arith.constant 3.200000e+01 : f32
    %229 = vector.broadcast %cst_89 : f32 to vector<16x1xf32>
    %230 = arith.divf %228, %229 : vector<16x1xf32>
    %231 = vector.broadcast %221 : vector<16x1xf32> to vector<16x32xf32>
    %232 = arith.subf %213, %231 : vector<16x32xf32>
    %cst_90 = arith.constant 9.99999996E-13 : f32
    %233 = vector.broadcast %cst_90 : f32 to vector<16x1xf32>
    %234 = arith.addf %230, %233 : vector<16x1xf32>
    %235 = math.rsqrt %234 : vector<16x1xf32>
    %236 = vector.broadcast %235 : vector<16x1xf32> to vector<16x32xf32>
    %237 = arith.mulf %232, %236 : vector<16x32xf32>
    %238 = vector.broadcast %215 : vector<1x32xf32> to vector<16x32xf32>
    %239 = arith.mulf %237, %238 : vector<16x32xf32>
    %240 = vector.broadcast %217 : vector<1x32xf32> to vector<16x32xf32>
    %241 = arith.addf %239, %240 : vector<16x32xf32>
    %c0_91 = arith.constant 0 : index
    %c0_92 = arith.constant 0 : index
    %c0_93 = arith.constant 0 : index
    %242 = vector.load %arg12[%c0_91, %c0_92, %c0_93] : memref<2x32x64xf32, #tpu.memory_space<vmem>>, vector<1x32x64xf32>
    %243 = vector.shape_cast %242 : vector<1x32x64xf32> to vector<32x64xf32>
    %cst_94 = arith.constant dense<0.000000e+00> : vector<16x64xf32>
    %244 = tpu.matmul %241, %243, %cst_94 {dimension_numbers = #tpu.dot_dimension_numbers<[1], [0], [0], [1], [0, 0, 1, 1], [], []>} : vector<16x32xf32>, vector<32x64xf32>, vector<16x64xf32> -> vector<16x64xf32>
    %c0_95 = arith.constant 0 : index
    %c0_96 = arith.constant 0 : index
    %c0_97 = arith.constant 0 : index
    %245 = vector.load %arg13[%c0_95, %c0_96, %c0_97] : memref<2x1x64xf32, #tpu.memory_space<vmem>>, vector<1x1x64xf32>
    %246 = vector.shape_cast %245 : vector<1x1x64xf32> to vector<1x64xf32>
    %247 = vector.broadcast %246 : vector<1x64xf32> to vector<16x64xf32>
    %248 = arith.addf %244, %247 : vector<16x64xf32>
    %cst_98 = arith.constant 5.000000e-01 : f32
    %249 = vector.broadcast %cst_98 : f32 to vector<16x64xf32>
    %250 = arith.mulf %249, %248 : vector<16x64xf32>
    %cst_99 = arith.constant 4.471500e-02 : f32
    %251 = vector.broadcast %cst_99 : f32 to vector<16x64xf32>
    %252 = arith.mulf %251, %248 : vector<16x64xf32>
    %253 = arith.mulf %252, %248 : vector<16x64xf32>
    %254 = arith.mulf %253, %248 : vector<16x64xf32>
    %255 = arith.addf %248, %254 : vector<16x64xf32>
    %cst_100 = arith.constant 0.797884583 : f32
    %256 = vector.broadcast %cst_100 : f32 to vector<16x64xf32>
    %257 = arith.mulf %256, %255 : vector<16x64xf32>
    %258 = math.tanh %257 : vector<16x64xf32>
    %cst_101 = arith.constant 1.000000e+00 : f32
    %259 = vector.broadcast %cst_101 : f32 to vector<16x64xf32>
    %260 = arith.addf %259, %258 : vector<16x64xf32>
    %261 = arith.mulf %250, %260 : vector<16x64xf32>
    %c0_102 = arith.constant 0 : index
    %c0_103 = arith.constant 0 : index
    %c0_104 = arith.constant 0 : index
    %262 = vector.load %arg14[%c0_102, %c0_103, %c0_104] : memref<2x64x32xf32, #tpu.memory_space<vmem>>, vector<1x64x32xf32>
    %263 = vector.shape_cast %262 : vector<1x64x32xf32> to vector<64x32xf32>
    %cst_105 = arith.constant dense<0.000000e+00> : vector<16x32xf32>
    %264 = tpu.matmul %261, %263, %cst_105 {dimension_numbers = #tpu.dot_dimension_numbers<[1], [0], [0], [1], [0, 0, 1, 1], [], []>} : vector<16x64xf32>, vector<64x32xf32>, vector<16x32xf32> -> vector<16x32xf32>
    %c0_106 = arith.constant 0 : index
    %c0_107 = arith.constant 0 : index
    %c0_108 = arith.constant 0 : index
    %265 = vector.load %arg15[%c0_106, %c0_107, %c0_108] : memref<2x1x32xf32, #tpu.memory_space<vmem>>, vector<1x1x32xf32>
    %266 = vector.shape_cast %265 : vector<1x1x32xf32> to vector<1x32xf32>
    %267 = vector.broadcast %266 : vector<1x32xf32> to vector<16x32xf32>
    %268 = arith.addf %264, %267 : vector<16x32xf32>
    %269 = arith.addf %241, %268 : vector<16x32xf32>
    %c0_109 = arith.constant 0 : index
    %c0_110 = arith.constant 0 : index
    %c0_111 = arith.constant 0 : index
    %270 = vector.load %arg16[%c0_109, %c0_110, %c0_111] : memref<2x1x32xf32, #tpu.memory_space<vmem>>, vector<1x1x32xf32>
    %271 = vector.shape_cast %270 : vector<1x1x32xf32> to vector<1x32xf32>
    %c0_112 = arith.constant 0 : index
    %c0_113 = arith.constant 0 : index
    %c0_114 = arith.constant 0 : index
    %272 = vector.load %arg17[%c0_112, %c0_113, %c0_114] : memref<2x1x32xf32, #tpu.memory_space<vmem>>, vector<1x1x32xf32>
    %273 = vector.shape_cast %272 : vector<1x1x32xf32> to vector<1x32xf32>
    %cst_115 = arith.constant dense<0.000000e+00> : vector<16xf32>
    %274 = vector.multi_reduction <add>, %269, %cst_115 [1] : vector<16x32xf32> to vector<16xf32>
    %275 = vector.shape_cast %274 : vector<16xf32> to vector<16x1xf32>
    %cst_116 = arith.constant 3.200000e+01 : f32
    %276 = vector.broadcast %cst_116 : f32 to vector<16x1xf32>
    %277 = arith.divf %275, %276 : vector<16x1xf32>
    %278 = vector.broadcast %277 : vector<16x1xf32> to vector<16x32xf32>
    %279 = arith.subf %269, %278 : vector<16x32xf32>
    %280 = vector.broadcast %277 : vector<16x1xf32> to vector<16x32xf32>
    %281 = arith.subf %269, %280 : vector<16x32xf32>
    %282 = arith.mulf %279, %281 : vector<16x32xf32>
    %cst_117 = arith.constant dense<0.000000e+00> : vector<16xf32>
    %283 = vector.multi_reduction <add>, %282, %cst_117 [1] : vector<16x32xf32> to vector<16xf32>
    %284 = vector.shape_cast %283 : vector<16xf32> to vector<16x1xf32>
    %cst_118 = arith.constant 3.200000e+01 : f32
    %285 = vector.broadcast %cst_118 : f32 to vector<16x1xf32>
    %286 = arith.divf %284, %285 : vector<16x1xf32>
    %287 = vector.broadcast %277 : vector<16x1xf32> to vector<16x32xf32>
    %288 = arith.subf %269, %287 : vector<16x32xf32>
    %cst_119 = arith.constant 9.99999996E-13 : f32
    %289 = vector.broadcast %cst_119 : f32 to vector<16x1xf32>
    %290 = arith.addf %286, %289 : vector<16x1xf32>
    %291 = math.rsqrt %290 : vector<16x1xf32>
    %292 = vector.broadcast %291 : vector<16x1xf32> to vector<16x32xf32>
    %293 = arith.mulf %288, %292 : vector<16x32xf32>
    %294 = vector.broadcast %271 : vector<1x32xf32> to vector<16x32xf32>
    %295 = arith.mulf %293, %294 : vector<16x32xf32>
    %296 = vector.broadcast %273 : vector<1x32xf32> to vector<16x32xf32>
    %297 = arith.addf %295, %296 : vector<16x32xf32>
    %c1 = arith.constant 1 : index
    %c0_120 = arith.constant 0 : index
    %c0_121 = arith.constant 0 : index
    %298 = vector.load %arg6[%c1, %c0_120, %c0_121] : memref<2x32x96xf32, #tpu.memory_space<vmem>>, vector<1x32x96xf32>
    %299 = vector.shape_cast %298 : vector<1x32x96xf32> to vector<32x96xf32>
    %cst_122 = arith.constant dense<0.000000e+00> : vector<16x96xf32>
    %300 = tpu.matmul %297, %299, %cst_122 {dimension_numbers = #tpu.dot_dimension_numbers<[1], [0], [0], [1], [0, 0, 1, 1], [], []>} : vector<16x32xf32>, vector<32x96xf32>, vector<16x96xf32> -> vector<16x96xf32>
    %c1_123 = arith.constant 1 : index
    %c0_124 = arith.constant 0 : index
    %c0_125 = arith.constant 0 : index
    %301 = vector.load %arg7[%c1_123, %c0_124, %c0_125] : memref<2x1x96xf32, #tpu.memory_space<vmem>>, vector<1x1x96xf32>
    %302 = vector.shape_cast %301 : vector<1x1x96xf32> to vector<1x96xf32>
    %303 = vector.broadcast %302 : vector<1x96xf32> to vector<16x96xf32>
    %304 = arith.addf %300, %303 : vector<16x96xf32>
    %305 = vector.extract_strided_slice %27 {offsets = [0, 0], sizes = [1, 8], strides = [1, 1]} : vector<2x8xf32> to vector<1x8xf32>
    %306 = vector.extract_strided_slice %304 {offsets = [0, 0], sizes = [8, 8], strides = [1, 1]} : vector<16x96xf32> to vector<8x8xf32>
    %307 = vector.extract_strided_slice %304 {offsets = [0, 32], sizes = [8, 8], strides = [1, 1]} : vector<16x96xf32> to vector<8x8xf32>
    %308 = vector.extract_strided_slice %304 {offsets = [0, 64], sizes = [8, 8], strides = [1, 1]} : vector<16x96xf32> to vector<8x8xf32>
    %309 = tpu.transpose %307, [1, 0] : vector<8x8xf32> -> vector<8x8xf32>
    %cst_126 = arith.constant dense<0.000000e+00> : vector<8x8xf32>
    %310 = tpu.matmul %306, %309, %cst_126 {dimension_numbers = #tpu.dot_dimension_numbers<[1], [0], [0], [1], [0, 0, 1, 1], [], []>} : vector<8x8xf32>, vector<8x8xf32>, vector<8x8xf32> -> vector<8x8xf32>
    %cst_127 = arith.constant 0.353553385 : f32
    %311 = vector.broadcast %cst_127 : f32 to vector<8x8xf32>
    %312 = arith.mulf %310, %311 : vector<8x8xf32>
    %313 = vector.broadcast %305 : vector<1x8xf32> to vector<8x8xf32>
    %314 = arith.addf %312, %313 : vector<8x8xf32>
    %cst_128 = arith.constant dense<0xFF800000> : vector<8xf32>
    %315 = vector.multi_reduction <maximumf>, %314, %cst_128 [1] : vector<8x8xf32> to vector<8xf32>
    %316 = vector.shape_cast %315 : vector<8xf32> to vector<8x1xf32>
    %317 = vector.broadcast %316 : vector<8x1xf32> to vector<8x8xf32>
    %318 = arith.subf %314, %317 : vector<8x8xf32>
    %319 = math.exp %318 : vector<8x8xf32>
    %cst_129 = arith.constant dense<0.000000e+00> : vector<8xf32>
    %320 = vector.multi_reduction <add>, %319, %cst_129 [1] : vector<8x8xf32> to vector<8xf32>
    %321 = vector.shape_cast %320 : vector<8xf32> to vector<8x1xf32>
    %322 = tpu.reciprocal %321 {approx = true} : vector<8x1xf32> -> vector<8x1xf32>
    %323 = vector.broadcast %322 : vector<8x1xf32> to vector<8x8xf32>
    %324 = arith.mulf %319, %323 : vector<8x8xf32>
    %cst_130 = arith.constant dense<0.000000e+00> : vector<8x8xf32>
    %325 = tpu.matmul %324, %308, %cst_130 {dimension_numbers = #tpu.dot_dimension_numbers<[1], [0], [0], [1], [0, 0, 1, 1], [], []>} : vector<8x8xf32>, vector<8x8xf32>, vector<8x8xf32> -> vector<8x8xf32>
    %c0_131 = arith.constant 0 : index
    %c0_132 = arith.constant 0 : index
    %326 = vector.load %arg22[%c0_131, %c0_132] : memref<16x32xf32, #tpu.memory_space<vmem>>, vector<8x8xf32>
    tpu.vector_store %arg22[%c0_131, %c0_132], %325 {strides = array<i32>} : memref<16x32xf32, #tpu.memory_space<vmem>>, vector<8x8xf32>,
    %327 = vector.extract_strided_slice %304 {offsets = [0, 8], sizes = [8, 8], strides = [1, 1]} : vector<16x96xf32> to vector<8x8xf32>
    %328 = vector.extract_strided_slice %304 {offsets = [0, 40], sizes = [8, 8], strides = [1, 1]} : vector<16x96xf32> to vector<8x8xf32>
    %329 = vector.extract_strided_slice %304 {offsets = [0, 72], sizes = [8, 8], strides = [1, 1]} : vector<16x96xf32> to vector<8x8xf32>
    %330 = tpu.transpose %328, [1, 0] : vector<8x8xf32> -> vector<8x8xf32>
    %cst_133 = arith.constant dense<0.000000e+00> : vector<8x8xf32>
    %331 = tpu.matmul %327, %330, %cst_133 {dimension_numbers = #tpu.dot_dimension_numbers<[1], [0], [0], [1], [0, 0, 1, 1], [], []>} : vector<8x8xf32>, vector<8x8xf32>, vector<8x8xf32> -> vector<8x8xf32>
    %cst_134 = arith.constant 0.353553385 : f32
    %332 = vector.broadcast %cst_134 : f32 to vector<8x8xf32>
    %333 = arith.mulf %331, %332 : vector<8x8xf32>
    %334 = vector.broadcast %305 : vector<1x8xf32> to vector<8x8xf32>
    %335 = arith.addf %333, %334 : vector<8x8xf32>
    %cst_135 = arith.constant dense<0xFF800000> : vector<8xf32>
    %336 = vector.multi_reduction <maximumf>, %335, %cst_135 [1] : vector<8x8xf32> to vector<8xf32>
    %337 = vector.shape_cast %336 : vector<8xf32> to vector<8x1xf32>
    %338 = vector.broadcast %337 : vector<8x1xf32> to vector<8x8xf32>
    %339 = arith.subf %335, %338 : vector<8x8xf32>
    %340 = math.exp %339 : vector<8x8xf32>
    %cst_136 = arith.constant dense<0.000000e+00> : vector<8xf32>
    %341 = vector.multi_reduction <add>, %340, %cst_136 [1] : vector<8x8xf32> to vector<8xf32>
    %342 = vector.shape_cast %341 : vector<8xf32> to vector<8x1xf32>
    %343 = tpu.reciprocal %342 {approx = true} : vector<8x1xf32> -> vector<8x1xf32>
    %344 = vector.broadcast %343 : vector<8x1xf32> to vector<8x8xf32>
    %345 = arith.mulf %340, %344 : vector<8x8xf32>
    %cst_137 = arith.constant dense<0.000000e+00> : vector<8x8xf32>
    %346 = tpu.matmul %345, %329, %cst_137 {dimension_numbers = #tpu.dot_dimension_numbers<[1], [0], [0], [1], [0, 0, 1, 1], [], []>} : vector<8x8xf32>, vector<8x8xf32>, vector<8x8xf32> -> vector<8x8xf32>
    %c0_138 = arith.constant 0 : index
    %c8_139 = arith.constant 8 : index
    %347 = vector.load %arg22[%c0_138, %c8_139] : memref<16x32xf32, #tpu.memory_space<vmem>>, vector<8x8xf32>
    tpu.vector_store %arg22[%c0_138, %c8_139], %346 {strides = array<i32>} : memref<16x32xf32, #tpu.memory_space<vmem>>, vector<8x8xf32>,
    %348 = vector.extract_strided_slice %304 {offsets = [0, 16], sizes = [8, 8], strides = [1, 1]} : vector<16x96xf32> to vector<8x8xf32>
    %349 = vector.extract_strided_slice %304 {offsets = [0, 48], sizes = [8, 8], strides = [1, 1]} : vector<16x96xf32> to vector<8x8xf32>
    %350 = vector.extract_strided_slice %304 {offsets = [0, 80], sizes = [8, 8], strides = [1, 1]} : vector<16x96xf32> to vector<8x8xf32>
    %351 = tpu.transpose %349, [1, 0] : vector<8x8xf32> -> vector<8x8xf32>
    %cst_140 = arith.constant dense<0.000000e+00> : vector<8x8xf32>
    %352 = tpu.matmul %348, %351, %cst_140 {dimension_numbers = #tpu.dot_dimension_numbers<[1], [0], [0], [1], [0, 0, 1, 1], [], []>} : vector<8x8xf32>, vector<8x8xf32>, vector<8x8xf32> -> vector<8x8xf32>
    %cst_141 = arith.constant 0.353553385 : f32
    %353 = vector.broadcast %cst_141 : f32 to vector<8x8xf32>
    %354 = arith.mulf %352, %353 : vector<8x8xf32>
    %355 = vector.broadcast %305 : vector<1x8xf32> to vector<8x8xf32>
    %356 = arith.addf %354, %355 : vector<8x8xf32>
    %cst_142 = arith.constant dense<0xFF800000> : vector<8xf32>
    %357 = vector.multi_reduction <maximumf>, %356, %cst_142 [1] : vector<8x8xf32> to vector<8xf32>
    %358 = vector.shape_cast %357 : vector<8xf32> to vector<8x1xf32>
    %359 = vector.broadcast %358 : vector<8x1xf32> to vector<8x8xf32>
    %360 = arith.subf %356, %359 : vector<8x8xf32>
    %361 = math.exp %360 : vector<8x8xf32>
    %cst_143 = arith.constant dense<0.000000e+00> : vector<8xf32>
    %362 = vector.multi_reduction <add>, %361, %cst_143 [1] : vector<8x8xf32> to vector<8xf32>
    %363 = vector.shape_cast %362 : vector<8xf32> to vector<8x1xf32>
    %364 = tpu.reciprocal %363 {approx = true} : vector<8x1xf32> -> vector<8x1xf32>
    %365 = vector.broadcast %364 : vector<8x1xf32> to vector<8x8xf32>
    %366 = arith.mulf %361, %365 : vector<8x8xf32>
    %cst_144 = arith.constant dense<0.000000e+00> : vector<8x8xf32>
    %367 = tpu.matmul %366, %350, %cst_144 {dimension_numbers = #tpu.dot_dimension_numbers<[1], [0], [0], [1], [0, 0, 1, 1], [], []>} : vector<8x8xf32>, vector<8x8xf32>, vector<8x8xf32> -> vector<8x8xf32>
    %c0_145 = arith.constant 0 : index
    %c16_146 = arith.constant 16 : index
    %368 = vector.load %arg22[%c0_145, %c16_146] : memref<16x32xf32, #tpu.memory_space<vmem>>, vector<8x8xf32>
    tpu.vector_store %arg22[%c0_145, %c16_146], %367 {strides = array<i32>} : memref<16x32xf32, #tpu.memory_space<vmem>>, vector<8x8xf32>,
    %369 = vector.extract_strided_slice %304 {offsets = [0, 24], sizes = [8, 8], strides = [1, 1]} : vector<16x96xf32> to vector<8x8xf32>
    %370 = vector.extract_strided_slice %304 {offsets = [0, 56], sizes = [8, 8], strides = [1, 1]} : vector<16x96xf32> to vector<8x8xf32>
    %371 = vector.extract_strided_slice %304 {offsets = [0, 88], sizes = [8, 8], strides = [1, 1]} : vector<16x96xf32> to vector<8x8xf32>
    %372 = tpu.transpose %370, [1, 0] : vector<8x8xf32> -> vector<8x8xf32>
    %cst_147 = arith.constant dense<0.000000e+00> : vector<8x8xf32>
    %373 = tpu.matmul %369, %372, %cst_147 {dimension_numbers = #tpu.dot_dimension_numbers<[1], [0], [0], [1], [0, 0, 1, 1], [], []>} : vector<8x8xf32>, vector<8x8xf32>, vector<8x8xf32> -> vector<8x8xf32>
    %cst_148 = arith.constant 0.353553385 : f32
    %374 = vector.broadcast %cst_148 : f32 to vector<8x8xf32>
    %375 = arith.mulf %373, %374 : vector<8x8xf32>
    %376 = vector.broadcast %305 : vector<1x8xf32> to vector<8x8xf32>
    %377 = arith.addf %375, %376 : vector<8x8xf32>
    %cst_149 = arith.constant dense<0xFF800000> : vector<8xf32>
    %378 = vector.multi_reduction <maximumf>, %377, %cst_149 [1] : vector<8x8xf32> to vector<8xf32>
    %379 = vector.shape_cast %378 : vector<8xf32> to vector<8x1xf32>
    %380 = vector.broadcast %379 : vector<8x1xf32> to vector<8x8xf32>
    %381 = arith.subf %377, %380 : vector<8x8xf32>
    %382 = math.exp %381 : vector<8x8xf32>
    %cst_150 = arith.constant dense<0.000000e+00> : vector<8xf32>
    %383 = vector.multi_reduction <add>, %382, %cst_150 [1] : vector<8x8xf32> to vector<8xf32>
    %384 = vector.shape_cast %383 : vector<8xf32> to vector<8x1xf32>
    %385 = tpu.reciprocal %384 {approx = true} : vector<8x1xf32> -> vector<8x1xf32>
    %386 = vector.broadcast %385 : vector<8x1xf32> to vector<8x8xf32>
    %387 = arith.mulf %382, %386 : vector<8x8xf32>
    %cst_151 = arith.constant dense<0.000000e+00> : vector<8x8xf32>
    %388 = tpu.matmul %387, %371, %cst_151 {dimension_numbers = #tpu.dot_dimension_numbers<[1], [0], [0], [1], [0, 0, 1, 1], [], []>} : vector<8x8xf32>, vector<8x8xf32>, vector<8x8xf32> -> vector<8x8xf32>
    %c0_152 = arith.constant 0 : index
    %c24_153 = arith.constant 24 : index
    %389 = vector.load %arg22[%c0_152, %c24_153] : memref<16x32xf32, #tpu.memory_space<vmem>>, vector<8x8xf32>
    tpu.vector_store %arg22[%c0_152, %c24_153], %388 {strides = array<i32>} : memref<16x32xf32, #tpu.memory_space<vmem>>, vector<8x8xf32>,
    %390 = vector.extract_strided_slice %27 {offsets = [1, 0], sizes = [1, 8], strides = [1, 1]} : vector<2x8xf32> to vector<1x8xf32>
    %391 = vector.extract_strided_slice %304 {offsets = [8, 0], sizes = [8, 8], strides = [1, 1]} : vector<16x96xf32> to vector<8x8xf32>
    %392 = vector.extract_strided_slice %304 {offsets = [8, 32], sizes = [8, 8], strides = [1, 1]} : vector<16x96xf32> to vector<8x8xf32>
    %393 = vector.extract_strided_slice %304 {offsets = [8, 64], sizes = [8, 8], strides = [1, 1]} : vector<16x96xf32> to vector<8x8xf32>
    %394 = tpu.transpose %392, [1, 0] : vector<8x8xf32> -> vector<8x8xf32>
    %cst_154 = arith.constant dense<0.000000e+00> : vector<8x8xf32>
    %395 = tpu.matmul %391, %394, %cst_154 {dimension_numbers = #tpu.dot_dimension_numbers<[1], [0], [0], [1], [0, 0, 1, 1], [], []>} : vector<8x8xf32>, vector<8x8xf32>, vector<8x8xf32> -> vector<8x8xf32>
    %cst_155 = arith.constant 0.353553385 : f32
    %396 = vector.broadcast %cst_155 : f32 to vector<8x8xf32>
    %397 = arith.mulf %395, %396 : vector<8x8xf32>
    %398 = vector.broadcast %390 : vector<1x8xf32> to vector<8x8xf32>
    %399 = arith.addf %397, %398 : vector<8x8xf32>
    %cst_156 = arith.constant dense<0xFF800000> : vector<8xf32>
    %400 = vector.multi_reduction <maximumf>, %399, %cst_156 [1] : vector<8x8xf32> to vector<8xf32>
    %401 = vector.shape_cast %400 : vector<8xf32> to vector<8x1xf32>
    %402 = vector.broadcast %401 : vector<8x1xf32> to vector<8x8xf32>
    %403 = arith.subf %399, %402 : vector<8x8xf32>
    %404 = math.exp %403 : vector<8x8xf32>
    %cst_157 = arith.constant dense<0.000000e+00> : vector<8xf32>
    %405 = vector.multi_reduction <add>, %404, %cst_157 [1] : vector<8x8xf32> to vector<8xf32>
    %406 = vector.shape_cast %405 : vector<8xf32> to vector<8x1xf32>
    %407 = tpu.reciprocal %406 {approx = true} : vector<8x1xf32> -> vector<8x1xf32>
    %408 = vector.broadcast %407 : vector<8x1xf32> to vector<8x8xf32>
    %409 = arith.mulf %404, %408 : vector<8x8xf32>
    %cst_158 = arith.constant dense<0.000000e+00> : vector<8x8xf32>
    %410 = tpu.matmul %409, %393, %cst_158 {dimension_numbers = #tpu.dot_dimension_numbers<[1], [0], [0], [1], [0, 0, 1, 1], [], []>} : vector<8x8xf32>, vector<8x8xf32>, vector<8x8xf32> -> vector<8x8xf32>
    %c8_159 = arith.constant 8 : index
    %c0_160 = arith.constant 0 : index
    %411 = vector.load %arg22[%c8_159, %c0_160] : memref<16x32xf32, #tpu.memory_space<vmem>>, vector<8x8xf32>
    tpu.vector_store %arg22[%c8_159, %c0_160], %410 {strides = array<i32>} : memref<16x32xf32, #tpu.memory_space<vmem>>, vector<8x8xf32>,
    %412 = vector.extract_strided_slice %304 {offsets = [8, 8], sizes = [8, 8], strides = [1, 1]} : vector<16x96xf32> to vector<8x8xf32>
    %413 = vector.extract_strided_slice %304 {offsets = [8, 40], sizes = [8, 8], strides = [1, 1]} : vector<16x96xf32> to vector<8x8xf32>
    %414 = vector.extract_strided_slice %304 {offsets = [8, 72], sizes = [8, 8], strides = [1, 1]} : vector<16x96xf32> to vector<8x8xf32>
    %415 = tpu.transpose %413, [1, 0] : vector<8x8xf32> -> vector<8x8xf32>
    %cst_161 = arith.constant dense<0.000000e+00> : vector<8x8xf32>
    %416 = tpu.matmul %412, %415, %cst_161 {dimension_numbers = #tpu.dot_dimension_numbers<[1], [0], [0], [1], [0, 0, 1, 1], [], []>} : vector<8x8xf32>, vector<8x8xf32>, vector<8x8xf32> -> vector<8x8xf32>
    %cst_162 = arith.constant 0.353553385 : f32
    %417 = vector.broadcast %cst_162 : f32 to vector<8x8xf32>
    %418 = arith.mulf %416, %417 : vector<8x8xf32>
    %419 = vector.broadcast %390 : vector<1x8xf32> to vector<8x8xf32>
    %420 = arith.addf %418, %419 : vector<8x8xf32>
    %cst_163 = arith.constant dense<0xFF800000> : vector<8xf32>
    %421 = vector.multi_reduction <maximumf>, %420, %cst_163 [1] : vector<8x8xf32> to vector<8xf32>
    %422 = vector.shape_cast %421 : vector<8xf32> to vector<8x1xf32>
    %423 = vector.broadcast %422 : vector<8x1xf32> to vector<8x8xf32>
    %424 = arith.subf %420, %423 : vector<8x8xf32>
    %425 = math.exp %424 : vector<8x8xf32>
    %cst_164 = arith.constant dense<0.000000e+00> : vector<8xf32>
    %426 = vector.multi_reduction <add>, %425, %cst_164 [1] : vector<8x8xf32> to vector<8xf32>
    %427 = vector.shape_cast %426 : vector<8xf32> to vector<8x1xf32>
    %428 = tpu.reciprocal %427 {approx = true} : vector<8x1xf32> -> vector<8x1xf32>
    %429 = vector.broadcast %428 : vector<8x1xf32> to vector<8x8xf32>
    %430 = arith.mulf %425, %429 : vector<8x8xf32>
    %cst_165 = arith.constant dense<0.000000e+00> : vector<8x8xf32>
    %431 = tpu.matmul %430, %414, %cst_165 {dimension_numbers = #tpu.dot_dimension_numbers<[1], [0], [0], [1], [0, 0, 1, 1], [], []>} : vector<8x8xf32>, vector<8x8xf32>, vector<8x8xf32> -> vector<8x8xf32>
    %c8_166 = arith.constant 8 : index
    %c8_167 = arith.constant 8 : index
    %432 = vector.load %arg22[%c8_166, %c8_167] : memref<16x32xf32, #tpu.memory_space<vmem>>, vector<8x8xf32>
    tpu.vector_store %arg22[%c8_166, %c8_167], %431 {strides = array<i32>} : memref<16x32xf32, #tpu.memory_space<vmem>>, vector<8x8xf32>,
    %433 = vector.extract_strided_slice %304 {offsets = [8, 16], sizes = [8, 8], strides = [1, 1]} : vector<16x96xf32> to vector<8x8xf32>
    %434 = vector.extract_strided_slice %304 {offsets = [8, 48], sizes = [8, 8], strides = [1, 1]} : vector<16x96xf32> to vector<8x8xf32>
    %435 = vector.extract_strided_slice %304 {offsets = [8, 80], sizes = [8, 8], strides = [1, 1]} : vector<16x96xf32> to vector<8x8xf32>
    %436 = tpu.transpose %434, [1, 0] : vector<8x8xf32> -> vector<8x8xf32>
    %cst_168 = arith.constant dense<0.000000e+00> : vector<8x8xf32>
    %437 = tpu.matmul %433, %436, %cst_168 {dimension_numbers = #tpu.dot_dimension_numbers<[1], [0], [0], [1], [0, 0, 1, 1], [], []>} : vector<8x8xf32>, vector<8x8xf32>, vector<8x8xf32> -> vector<8x8xf32>
    %cst_169 = arith.constant 0.353553385 : f32
    %438 = vector.broadcast %cst_169 : f32 to vector<8x8xf32>
    %439 = arith.mulf %437, %438 : vector<8x8xf32>
    %440 = vector.broadcast %390 : vector<1x8xf32> to vector<8x8xf32>
    %441 = arith.addf %439, %440 : vector<8x8xf32>
    %cst_170 = arith.constant dense<0xFF800000> : vector<8xf32>
    %442 = vector.multi_reduction <maximumf>, %441, %cst_170 [1] : vector<8x8xf32> to vector<8xf32>
    %443 = vector.shape_cast %442 : vector<8xf32> to vector<8x1xf32>
    %444 = vector.broadcast %443 : vector<8x1xf32> to vector<8x8xf32>
    %445 = arith.subf %441, %444 : vector<8x8xf32>
    %446 = math.exp %445 : vector<8x8xf32>
    %cst_171 = arith.constant dense<0.000000e+00> : vector<8xf32>
    %447 = vector.multi_reduction <add>, %446, %cst_171 [1] : vector<8x8xf32> to vector<8xf32>
    %448 = vector.shape_cast %447 : vector<8xf32> to vector<8x1xf32>
    %449 = tpu.reciprocal %448 {approx = true} : vector<8x1xf32> -> vector<8x1xf32>
    %450 = vector.broadcast %449 : vector<8x1xf32> to vector<8x8xf32>
    %451 = arith.mulf %446, %450 : vector<8x8xf32>
    %cst_172 = arith.constant dense<0.000000e+00> : vector<8x8xf32>
    %452 = tpu.matmul %451, %435, %cst_172 {dimension_numbers = #tpu.dot_dimension_numbers<[1], [0], [0], [1], [0, 0, 1, 1], [], []>} : vector<8x8xf32>, vector<8x8xf32>, vector<8x8xf32> -> vector<8x8xf32>
    %c8_173 = arith.constant 8 : index
    %c16_174 = arith.constant 16 : index
    %453 = vector.load %arg22[%c8_173, %c16_174] : memref<16x32xf32, #tpu.memory_space<vmem>>, vector<8x8xf32>
    tpu.vector_store %arg22[%c8_173, %c16_174], %452 {strides = array<i32>} : memref<16x32xf32, #tpu.memory_space<vmem>>, vector<8x8xf32>,
    %454 = vector.extract_strided_slice %304 {offsets = [8, 24], sizes = [8, 8], strides = [1, 1]} : vector<16x96xf32> to vector<8x8xf32>
    %455 = vector.extract_strided_slice %304 {offsets = [8, 56], sizes = [8, 8], strides = [1, 1]} : vector<16x96xf32> to vector<8x8xf32>
    %456 = vector.extract_strided_slice %304 {offsets = [8, 88], sizes = [8, 8], strides = [1, 1]} : vector<16x96xf32> to vector<8x8xf32>
    %457 = tpu.transpose %455, [1, 0] : vector<8x8xf32> -> vector<8x8xf32>
    %cst_175 = arith.constant dense<0.000000e+00> : vector<8x8xf32>
    %458 = tpu.matmul %454, %457, %cst_175 {dimension_numbers = #tpu.dot_dimension_numbers<[1], [0], [0], [1], [0, 0, 1, 1], [], []>} : vector<8x8xf32>, vector<8x8xf32>, vector<8x8xf32> -> vector<8x8xf32>
    %cst_176 = arith.constant 0.353553385 : f32
    %459 = vector.broadcast %cst_176 : f32 to vector<8x8xf32>
    %460 = arith.mulf %458, %459 : vector<8x8xf32>
    %461 = vector.broadcast %390 : vector<1x8xf32> to vector<8x8xf32>
    %462 = arith.addf %460, %461 : vector<8x8xf32>
    %cst_177 = arith.constant dense<0xFF800000> : vector<8xf32>
    %463 = vector.multi_reduction <maximumf>, %462, %cst_177 [1] : vector<8x8xf32> to vector<8xf32>
    %464 = vector.shape_cast %463 : vector<8xf32> to vector<8x1xf32>
    %465 = vector.broadcast %464 : vector<8x1xf32> to vector<8x8xf32>
    %466 = arith.subf %462, %465 : vector<8x8xf32>
    %467 = math.exp %466 : vector<8x8xf32>
    %cst_178 = arith.constant dense<0.000000e+00> : vector<8xf32>
    %468 = vector.multi_reduction <add>, %467, %cst_178 [1] : vector<8x8xf32> to vector<8xf32>
    %469 = vector.shape_cast %468 : vector<8xf32> to vector<8x1xf32>
    %470 = tpu.reciprocal %469 {approx = true} : vector<8x1xf32> -> vector<8x1xf32>
    %471 = vector.broadcast %470 : vector<8x1xf32> to vector<8x8xf32>
    %472 = arith.mulf %467, %471 : vector<8x8xf32>
    %cst_179 = arith.constant dense<0.000000e+00> : vector<8x8xf32>
    %473 = tpu.matmul %472, %456, %cst_179 {dimension_numbers = #tpu.dot_dimension_numbers<[1], [0], [0], [1], [0, 0, 1, 1], [], []>} : vector<8x8xf32>, vector<8x8xf32>, vector<8x8xf32> -> vector<8x8xf32>
    %c8_180 = arith.constant 8 : index
    %c24_181 = arith.constant 24 : index
    %474 = vector.load %arg22[%c8_180, %c24_181] : memref<16x32xf32, #tpu.memory_space<vmem>>, vector<8x8xf32>
    tpu.vector_store %arg22[%c8_180, %c24_181], %473 {strides = array<i32>} : memref<16x32xf32, #tpu.memory_space<vmem>>, vector<8x8xf32>,
    %c0_182 = arith.constant 0 : index
    %c0_183 = arith.constant 0 : index
    %475 = vector.load %arg22[%c0_182, %c0_183] : memref<16x32xf32, #tpu.memory_space<vmem>>, vector<16x32xf32>
    %c1_184 = arith.constant 1 : index
    %c0_185 = arith.constant 0 : index
    %c0_186 = arith.constant 0 : index
    %476 = vector.load %arg8[%c1_184, %c0_185, %c0_186] : memref<2x32x32xf32, #tpu.memory_space<vmem>>, vector<1x32x32xf32>
    %477 = vector.shape_cast %476 : vector<1x32x32xf32> to vector<32x32xf32>
    %cst_187 = arith.constant dense<0.000000e+00> : vector<16x32xf32>
    %478 = tpu.matmul %475, %477, %cst_187 {dimension_numbers = #tpu.dot_dimension_numbers<[1], [0], [0], [1], [0, 0, 1, 1], [], []>} : vector<16x32xf32>, vector<32x32xf32>, vector<16x32xf32> -> vector<16x32xf32>
    %c1_188 = arith.constant 1 : index
    %c0_189 = arith.constant 0 : index
    %c0_190 = arith.constant 0 : index
    %479 = vector.load %arg9[%c1_188, %c0_189, %c0_190] : memref<2x1x32xf32, #tpu.memory_space<vmem>>, vector<1x1x32xf32>
    %480 = vector.shape_cast %479 : vector<1x1x32xf32> to vector<1x32xf32>
    %481 = vector.broadcast %480 : vector<1x32xf32> to vector<16x32xf32>
    %482 = arith.addf %478, %481 : vector<16x32xf32>
    %483 = arith.addf %297, %482 : vector<16x32xf32>
    %c1_191 = arith.constant 1 : index
    %c0_192 = arith.constant 0 : index
    %c0_193 = arith.constant 0 : index
    %484 = vector.load %arg10[%c1_191, %c0_192, %c0_193] : memref<2x1x32xf32, #tpu.memory_space<vmem>>, vector<1x1x32xf32>
    %485 = vector.shape_cast %484 : vector<1x1x32xf32> to vector<1x32xf32>
    %c1_194 = arith.constant 1 : index
    %c0_195 = arith.constant 0 : index
    %c0_196 = arith.constant 0 : index
    %486 = vector.load %arg11[%c1_194, %c0_195, %c0_196] : memref<2x1x32xf32, #tpu.memory_space<vmem>>, vector<1x1x32xf32>
    %487 = vector.shape_cast %486 : vector<1x1x32xf32> to vector<1x32xf32>
    %cst_197 = arith.constant dense<0.000000e+00> : vector<16xf32>
    %488 = vector.multi_reduction <add>, %483, %cst_197 [1] : vector<16x32xf32> to vector<16xf32>
    %489 = vector.shape_cast %488 : vector<16xf32> to vector<16x1xf32>
    %cst_198 = arith.constant 3.200000e+01 : f32
    %490 = vector.broadcast %cst_198 : f32 to vector<16x1xf32>
    %491 = arith.divf %489, %490 : vector<16x1xf32>
    %492 = vector.broadcast %491 : vector<16x1xf32> to vector<16x32xf32>
    %493 = arith.subf %483, %492 : vector<16x32xf32>
    %494 = vector.broadcast %491 : vector<16x1xf32> to vector<16x32xf32>
    %495 = arith.subf %483, %494 : vector<16x32xf32>
    %496 = arith.mulf %493, %495 : vector<16x32xf32>
    %cst_199 = arith.constant dense<0.000000e+00> : vector<16xf32>
    %497 = vector.multi_reduction <add>, %496, %cst_199 [1] : vector<16x32xf32> to vector<16xf32>
    %498 = vector.shape_cast %497 : vector<16xf32> to vector<16x1xf32>
    %cst_200 = arith.constant 3.200000e+01 : f32
    %499 = vector.broadcast %cst_200 : f32 to vector<16x1xf32>
    %500 = arith.divf %498, %499 : vector<16x1xf32>
    %501 = vector.broadcast %491 : vector<16x1xf32> to vector<16x32xf32>
    %502 = arith.subf %483, %501 : vector<16x32xf32>
    %cst_201 = arith.constant 9.99999996E-13 : f32
    %503 = vector.broadcast %cst_201 : f32 to vector<16x1xf32>
    %504 = arith.addf %500, %503 : vector<16x1xf32>
    %505 = math.rsqrt %504 : vector<16x1xf32>
    %506 = vector.broadcast %505 : vector<16x1xf32> to vector<16x32xf32>
    %507 = arith.mulf %502, %506 : vector<16x32xf32>
    %508 = vector.broadcast %485 : vector<1x32xf32> to vector<16x32xf32>
    %509 = arith.mulf %507, %508 : vector<16x32xf32>
    %510 = vector.broadcast %487 : vector<1x32xf32> to vector<16x32xf32>
    %511 = arith.addf %509, %510 : vector<16x32xf32>
    %c1_202 = arith.constant 1 : index
    %c0_203 = arith.constant 0 : index
    %c0_204 = arith.constant 0 : index
    %512 = vector.load %arg12[%c1_202, %c0_203, %c0_204] : memref<2x32x64xf32, #tpu.memory_space<vmem>>, vector<1x32x64xf32>
    %513 = vector.shape_cast %512 : vector<1x32x64xf32> to vector<32x64xf32>
    %cst_205 = arith.constant dense<0.000000e+00> : vector<16x64xf32>
    %514 = tpu.matmul %511, %513, %cst_205 {dimension_numbers = #tpu.dot_dimension_numbers<[1], [0], [0], [1], [0, 0, 1, 1], [], []>} : vector<16x32xf32>, vector<32x64xf32>, vector<16x64xf32> -> vector<16x64xf32>
    %c1_206 = arith.constant 1 : index
    %c0_207 = arith.constant 0 : index
    %c0_208 = arith.constant 0 : index
    %515 = vector.load %arg13[%c1_206, %c0_207, %c0_208] : memref<2x1x64xf32, #tpu.memory_space<vmem>>, vector<1x1x64xf32>
    %516 = vector.shape_cast %515 : vector<1x1x64xf32> to vector<1x64xf32>
    %517 = vector.broadcast %516 : vector<1x64xf32> to vector<16x64xf32>
    %518 = arith.addf %514, %517 : vector<16x64xf32>
    %cst_209 = arith.constant 5.000000e-01 : f32
    %519 = vector.broadcast %cst_209 : f32 to vector<16x64xf32>
    %520 = arith.mulf %519, %518 : vector<16x64xf32>
    %cst_210 = arith.constant 4.471500e-02 : f32
    %521 = vector.broadcast %cst_210 : f32 to vector<16x64xf32>
    %522 = arith.mulf %521, %518 : vector<16x64xf32>
    %523 = arith.mulf %522, %518 : vector<16x64xf32>
    %524 = arith.mulf %523, %518 : vector<16x64xf32>
    %525 = arith.addf %518, %524 : vector<16x64xf32>
    %cst_211 = arith.constant 0.797884583 : f32
    %526 = vector.broadcast %cst_211 : f32 to vector<16x64xf32>
    %527 = arith.mulf %526, %525 : vector<16x64xf32>
    %528 = math.tanh %527 : vector<16x64xf32>
    %cst_212 = arith.constant 1.000000e+00 : f32
    %529 = vector.broadcast %cst_212 : f32 to vector<16x64xf32>
    %530 = arith.addf %529, %528 : vector<16x64xf32>
    %531 = arith.mulf %520, %530 : vector<16x64xf32>
    %c1_213 = arith.constant 1 : index
    %c0_214 = arith.constant 0 : index
    %c0_215 = arith.constant 0 : index
    %532 = vector.load %arg14[%c1_213, %c0_214, %c0_215] : memref<2x64x32xf32, #tpu.memory_space<vmem>>, vector<1x64x32xf32>
    %533 = vector.shape_cast %532 : vector<1x64x32xf32> to vector<64x32xf32>
    %cst_216 = arith.constant dense<0.000000e+00> : vector<16x32xf32>
    %534 = tpu.matmul %531, %533, %cst_216 {dimension_numbers = #tpu.dot_dimension_numbers<[1], [0], [0], [1], [0, 0, 1, 1], [], []>} : vector<16x64xf32>, vector<64x32xf32>, vector<16x32xf32> -> vector<16x32xf32>
    %c1_217 = arith.constant 1 : index
    %c0_218 = arith.constant 0 : index
    %c0_219 = arith.constant 0 : index
    %535 = vector.load %arg15[%c1_217, %c0_218, %c0_219] : memref<2x1x32xf32, #tpu.memory_space<vmem>>, vector<1x1x32xf32>
    %536 = vector.shape_cast %535 : vector<1x1x32xf32> to vector<1x32xf32>
    %537 = vector.broadcast %536 : vector<1x32xf32> to vector<16x32xf32>
    %538 = arith.addf %534, %537 : vector<16x32xf32>
    %539 = arith.addf %511, %538 : vector<16x32xf32>
    %c1_220 = arith.constant 1 : index
    %c0_221 = arith.constant 0 : index
    %c0_222 = arith.constant 0 : index
    %540 = vector.load %arg16[%c1_220, %c0_221, %c0_222] : memref<2x1x32xf32, #tpu.memory_space<vmem>>, vector<1x1x32xf32>
    %541 = vector.shape_cast %540 : vector<1x1x32xf32> to vector<1x32xf32>
    %c1_223 = arith.constant 1 : index
    %c0_224 = arith.constant 0 : index
    %c0_225 = arith.constant 0 : index
    %542 = vector.load %arg17[%c1_223, %c0_224, %c0_225] : memref<2x1x32xf32, #tpu.memory_space<vmem>>, vector<1x1x32xf32>
    %543 = vector.shape_cast %542 : vector<1x1x32xf32> to vector<1x32xf32>
    %cst_226 = arith.constant dense<0.000000e+00> : vector<16xf32>
    %544 = vector.multi_reduction <add>, %539, %cst_226 [1] : vector<16x32xf32> to vector<16xf32>
    %545 = vector.shape_cast %544 : vector<16xf32> to vector<16x1xf32>
    %cst_227 = arith.constant 3.200000e+01 : f32
    %546 = vector.broadcast %cst_227 : f32 to vector<16x1xf32>
    %547 = arith.divf %545, %546 : vector<16x1xf32>
    %548 = vector.broadcast %547 : vector<16x1xf32> to vector<16x32xf32>
    %549 = arith.subf %539, %548 : vector<16x32xf32>
    %550 = vector.broadcast %547 : vector<16x1xf32> to vector<16x32xf32>
    %551 = arith.subf %539, %550 : vector<16x32xf32>
    %552 = arith.mulf %549, %551 : vector<16x32xf32>
    %cst_228 = arith.constant dense<0.000000e+00> : vector<16xf32>
    %553 = vector.multi_reduction <add>, %552, %cst_228 [1] : vector<16x32xf32> to vector<16xf32>
    %554 = vector.shape_cast %553 : vector<16xf32> to vector<16x1xf32>
    %cst_229 = arith.constant 3.200000e+01 : f32
    %555 = vector.broadcast %cst_229 : f32 to vector<16x1xf32>
    %556 = arith.divf %554, %555 : vector<16x1xf32>
    %557 = vector.broadcast %547 : vector<16x1xf32> to vector<16x32xf32>
    %558 = arith.subf %539, %557 : vector<16x32xf32>
    %cst_230 = arith.constant 9.99999996E-13 : f32
    %559 = vector.broadcast %cst_230 : f32 to vector<16x1xf32>
    %560 = arith.addf %556, %559 : vector<16x1xf32>
    %561 = math.rsqrt %560 : vector<16x1xf32>
    %562 = vector.broadcast %561 : vector<16x1xf32> to vector<16x32xf32>
    %563 = arith.mulf %558, %562 : vector<16x32xf32>
    %564 = vector.broadcast %541 : vector<1x32xf32> to vector<16x32xf32>
    %565 = arith.mulf %563, %564 : vector<16x32xf32>
    %566 = vector.broadcast %543 : vector<1x32xf32> to vector<16x32xf32>
    %567 = arith.addf %565, %566 : vector<16x32xf32>
    %c0_231 = arith.constant 0 : index
    %c0_232 = arith.constant 0 : index
    %568 = vector.load %arg18[%c0_231, %c0_232] : memref<32x5xf32, #tpu.memory_space<vmem>>, vector<32x5xf32>
    %cst_233 = arith.constant dense<0.000000e+00> : vector<16x5xf32>
    %569 = tpu.matmul %567, %568, %cst_233 {dimension_numbers = #tpu.dot_dimension_numbers<[1], [0], [0], [1], [0, 0, 1, 1], [], []>} : vector<16x32xf32>, vector<32x5xf32>, vector<16x5xf32> -> vector<16x5xf32>
    %c0_234 = arith.constant 0 : index
    %c0_235 = arith.constant 0 : index
    %570 = vector.load %arg19[%c0_234, %c0_235] : memref<1x5xf32, #tpu.memory_space<vmem>>, vector<1x5xf32>
    %571 = vector.broadcast %570 : vector<1x5xf32> to vector<16x5xf32>
    %572 = arith.addf %569, %571 : vector<16x5xf32>
    %c0_236 = arith.constant 0 : index
    %c0_237 = arith.constant 0 : index
    %573 = vector.load %arg20[%c0_236, %c0_237] : memref<16x5xf32, #tpu.memory_space<vmem>>, vector<16x5xf32>
    tpu.vector_store %arg20[%c0_236, %c0_237], %572 {strides = array<i32>} : memref<16x5xf32, #tpu.memory_space<vmem>>, vector<16x5xf32>,
    %cst_238 = arith.constant dense<0xFF800000> : vector<16xf32>
    %574 = vector.multi_reduction <maximumf>, %572, %cst_238 [1] : vector<16x5xf32> to vector<16xf32>
    %575 = vector.shape_cast %574 : vector<16xf32> to vector<16x1xf32>
    %576 = vector.broadcast %575 : vector<16x1xf32> to vector<16x5xf32>
    %577 = arith.subf %572, %576 : vector<16x5xf32>
    %578 = math.exp %577 : vector<16x5xf32>
    %cst_239 = arith.constant dense<0.000000e+00> : vector<16xf32>
    %579 = vector.multi_reduction <add>, %578, %cst_239 [1] : vector<16x5xf32> to vector<16xf32>
    %580 = vector.shape_cast %579 : vector<16xf32> to vector<16x1xf32>
    %581 = math.log %580 : vector<16x1xf32>
    %582 = arith.addf %581, %575 : vector<16x1xf32>
    %c0_240 = arith.constant 0 : index
    %c0_241 = arith.constant 0 : index
    %583 = vector.load %arg3[%c0_240, %c0_241] : memref<16x5xf32, #tpu.memory_space<vmem>>, vector<16x5xf32>
    %cst_242 = arith.constant dense<0.000000e+00> : vector<16xf32>
    %584 = vector.multi_reduction <add>, %583, %cst_242 [1] : vector<16x5xf32> to vector<16xf32>
    %585 = vector.shape_cast %584 : vector<16xf32> to vector<16x1xf32>
    %586 = arith.mulf %582, %585 : vector<16x1xf32>
    %587 = arith.mulf %583, %572 : vector<16x5xf32>
    %cst_243 = arith.constant dense<0.000000e+00> : vector<16xf32>
    %588 = vector.multi_reduction <add>, %587, %cst_243 [1] : vector<16x5xf32> to vector<16xf32>
    %589 = vector.shape_cast %588 : vector<16xf32> to vector<16x1xf32>
    %590 = arith.subf %586, %589 : vector<16x1xf32>
    %591 = vector.shape_cast %585 : vector<16x1xf32> to vector<1x16x1xf32>
    %cst_244 = arith.constant dense<0.000000e+00> : vector<1xf32>
    %592 = vector.multi_reduction <add>, %591, %cst_244 [1, 2] : vector<1x16x1xf32> to vector<1xf32>
    %593 = vector.shape_cast %592 : vector<1xf32> to vector<1x1x1xf32>
    %594 = vector.extract %593[0, 0, 0] : f32 from vector<1x1x1xf32>
    %cst_245 = arith.constant 1.000000e+00 : f32
    %595 = arith.maximumf %594, %cst_245 : f32
    %596 = vector.shape_cast %590 : vector<16x1xf32> to vector<1x16x1xf32>
    %cst_246 = arith.constant dense<0.000000e+00> : vector<1xf32>
    %597 = vector.multi_reduction <add>, %596, %cst_246 [1, 2] : vector<1x16x1xf32> to vector<1xf32>
    %598 = vector.shape_cast %597 : vector<1xf32> to vector<1x1x1xf32>
    %599 = vector.extract %598[0, 0, 0] : f32 from vector<1x1x1xf32>
    %600 = arith.divf %599, %595 : f32
    %c0_247 = arith.constant 0 : index
    %c0_248 = arith.constant 0 : index
    %601 = memref.load %arg21[%c0_247, %c0_248] : memref<1x1xf32, #tpu.memory_space<smem>>
    memref.store %600, %arg21[%c0_247, %c0_248] : memref<1x1xf32, #tpu.memory_space<smem>>
    return
  }
  func.func @transform_0(%arg0: i32) -> (i32, i32) {
    %c0_i32 = arith.constant 0 : i32
    %c0_i32_0 = arith.constant 0 : i32
    %c0_i32_1 = arith.constant 0 : i32
    return %c0_i32, %c0_i32_0 : i32, i32
  }
  func.func @transform_1(%arg0: i32) -> (i32, i32) {
    %c0_i32 = arith.constant 0 : i32
    %c0_i32_0 = arith.constant 0 : i32
    %c0_i32_1 = arith.constant 0 : i32
    return %c0_i32, %c0_i32_0 : i32, i32
  }
  func.func @transform_2(%arg0: i32) -> (i32, i32) {
    %c0_i32 = arith.constant 0 : i32
    %c0_i32_0 = arith.constant 0 : i32
    %c0_i32_1 = arith.constant 0 : i32
    return %c0_i32, %c0_i32_0 : i32, i32
  }
  func.func @transform_3(%arg0: i32) -> (i32, i32) {
    %c0_i32 = arith.constant 0 : i32
    %c0_i32_0 = arith.constant 0 : i32
    %c0_i32_1 = arith.constant 0 : i32
    return %c0_i32, %c0_i32_0 : i32, i32
  }
  func.func @transform_4(%arg0: i32) -> (i32, i32) {
    %c0_i32 = arith.constant 0 : i32
    %c0_i32_0 = arith.constant 0 : i32
    %c0_i32_1 = arith.constant 0 : i32
    return %c0_i32, %c0_i32_0 : i32, i32
  }
  func.func @transform_5(%arg0: i32) -> (i32, i32, i32) {
    %c0_i32 = arith.constant 0 : i32
    %c0_i32_0 = arith.constant 0 : i32
    %c0_i32_1 = arith.constant 0 : i32
    %c0_i32_2 = arith.constant 0 : i32
    return %c0_i32, %c0_i32_0, %c0_i32_1 : i32, i32, i32
  }
  func.func @transform_6(%arg0: i32) -> (i32, i32, i32) {
    %c0_i32 = arith.constant 0 : i32
    %c0_i32_0 = arith.constant 0 : i32
    %c0_i32_1 = arith.constant 0 : i32
    %c0_i32_2 = arith.constant 0 : i32
    return %c0_i32, %c0_i32_0, %c0_i32_1 : i32, i32, i32
  }
  func.func @transform_7(%arg0: i32) -> (i32, i32, i32) {
    %c0_i32 = arith.constant 0 : i32
    %c0_i32_0 = arith.constant 0 : i32
    %c0_i32_1 = arith.constant 0 : i32
    %c0_i32_2 = arith.constant 0 : i32
    return %c0_i32, %c0_i32_0, %c0_i32_1 : i32, i32, i32
  }
  func.func @transform_8(%arg0: i32) -> (i32, i32, i32) {
    %c0_i32 = arith.constant 0 : i32
    %c0_i32_0 = arith.constant 0 : i32
    %c0_i32_1 = arith.constant 0 : i32
    %c0_i32_2 = arith.constant 0 : i32
    return %c0_i32, %c0_i32_0, %c0_i32_1 : i32, i32, i32
  }
  func.func @transform_9(%arg0: i32) -> (i32, i32, i32) {
    %c0_i32 = arith.constant 0 : i32
    %c0_i32_0 = arith.constant 0 : i32
    %c0_i32_1 = arith.constant 0 : i32
    %c0_i32_2 = arith.constant 0 : i32
    return %c0_i32, %c0_i32_0, %c0_i32_1 : i32, i32, i32
  }
  func.func @transform_10(%arg0: i32) -> (i32, i32, i32) {
    %c0_i32 = arith.constant 0 : i32
    %c0_i32_0 = arith.constant 0 : i32
    %c0_i32_1 = arith.constant 0 : i32
    %c0_i32_2 = arith.constant 0 : i32
    return %c0_i32, %c0_i32_0, %c0_i32_1 : i32, i32, i32
  }
  func.func @transform_11(%arg0: i32) -> (i32, i32, i32) {
    %c0_i32 = arith.constant 0 : i32
    %c0_i32_0 = arith.constant 0 : i32
    %c0_i32_1 = arith.constant 0 : i32
    %c0_i32_2 = arith.constant 0 : i32
    return %c0_i32, %c0_i32_0, %c0_i32_1 : i32, i32, i32
  }
  func.func @transform_12(%arg0: i32) -> (i32, i32, i32) {
    %c0_i32 = arith.constant 0 : i32
    %c0_i32_0 = arith.constant 0 : i32
    %c0_i32_1 = arith.constant 0 : i32
    %c0_i32_2 = arith.constant 0 : i32
    return %c0_i32, %c0_i32_0, %c0_i32_1 : i32, i32, i32
  }
  func.func @transform_13(%arg0: i32) -> (i32, i32, i32) {
    %c0_i32 = arith.constant 0 : i32
    %c0_i32_0 = arith.constant 0 : i32
    %c0_i32_1 = arith.constant 0 : i32
    %c0_i32_2 = arith.constant 0 : i32
    return %c0_i32, %c0_i32_0, %c0_i32_1 : i32, i32, i32
  }
  func.func @transform_14(%arg0: i32) -> (i32, i32, i32) {
    %c0_i32 = arith.constant 0 : i32
    %c0_i32_0 = arith.constant 0 : i32
    %c0_i32_1 = arith.constant 0 : i32
    %c0_i32_2 = arith.constant 0 : i32
    return %c0_i32, %c0_i32_0, %c0_i32_1 : i32, i32, i32
  }
  func.func @transform_15(%arg0: i32) -> (i32, i32, i32) {
    %c0_i32 = arith.constant 0 : i32
    %c0_i32_0 = arith.constant 0 : i32
    %c0_i32_1 = arith.constant 0 : i32
    %c0_i32_2 = arith.constant 0 : i32
    return %c0_i32, %c0_i32_0, %c0_i32_1 : i32, i32, i32
  }
  func.func @transform_16(%arg0: i32) -> (i32, i32, i32) {
    %c0_i32 = arith.constant 0 : i32
    %c0_i32_0 = arith.constant 0 : i32
    %c0_i32_1 = arith.constant 0 : i32
    %c0_i32_2 = arith.constant 0 : i32
    return %c0_i32, %c0_i32_0, %c0_i32_1 : i32, i32, i32
  }
  func.func @transform_17(%arg0: i32) -> (i32, i32) {
    %c0_i32 = arith.constant 0 : i32
    %c0_i32_0 = arith.constant 0 : i32
    %c0_i32_1 = arith.constant 0 : i32
    return %c0_i32, %c0_i32_0 : i32, i32
  }
  func.func @transform_18(%arg0: i32) -> (i32, i32) {
    %c0_i32 = arith.constant 0 : i32
    %c0_i32_0 = arith.constant 0 : i32
    %c0_i32_1 = arith.constant 0 : i32
    return %c0_i32, %c0_i32_0 : i32, i32
  }
  func.func @transform_19(%arg0: i32) -> (i32, i32) {
    %c0_i32 = arith.constant 0 : i32
    %c0_i32_0 = arith.constant 0 : i32
    %c0_i32_1 = arith.constant 0 : i32
    return %c0_i32, %c0_i32_0 : i32, i32
  }
  func.func @transform_20(%arg0: i32) -> (i32, i32) {
    %c0_i32 = arith.constant 0 : i32
    %c0_i32_0 = arith.constant 0 : i32
    %c0_i32_1 = arith.constant 0 : i32
    return %c0_i32, %c0_i32_0 : i32, i32
  }
}

</mosaic_0001>

<bundles_post_ra>
// kernel: eq.1
= control target key start
LH: loop header
LB: loop body
LE: loop exit
PB: predicated region body
PF: predicated region fallthrough
CT: control target
= control target key end

     0   :  { %2 = vsyncpa [#allocation1], 0  ;;  %s58_s6 = smov [#allocation0]   ;;  %s85_s0 = inlined_call_operand.hbm [shape: s32[2,8], index: 0, kind: input, shape index: {}]   ;;  %s86_s1 = inlined_call_operand.vmem [shape: s32[16], index: 1, kind: output, shape index: {}]  }
   0x1   :  { %s7_s7 = sshll.u32 %s58_s6, 4  ;;  %s34_s10 = scalar_lea.hbm %s85_s0, 32  ;;  %s8_s7 = int_to_ptr.vmem [resolvable:$true] %s7_s7 }
   0x2   :  { %p35_p0 = scmp.ne.s32.totalorder %s85_s0, %s34_s10  ;;  %p38_p1 = scmp.lt.u32.totalorder %s34_s10, %s85_s0 }
   0x4   :  { %p40_p2 = pnand %p38_p1, %p35_p0 }
   0x6   :  { %43 = shalt.err (!%p40_p2)
}
   0x7   :  { %s44_s15 = scalar_lea.vmem %s8_s7, 32  ;;  %p49_p4 = scmp.lt.s32.totalorder %s8_s7, %s8_s7 }
   0x8   :  { %p45_p3 = scmp.ne.s32.totalorder %s8_s7, %s44_s15  ;;  %p50_p5 = scmp.lt.s32.totalorder %s44_s15, %s44_s15 }
   0xa   :  { %p51_p6 = por %p50_p5, %p49_p4 }
   0xc   :  { %p52_p7 = pnand %p51_p6, %p45_p3 }
   0xe   :  { %55 = shalt.err (!%p52_p7)
}
   0xf   :  { %10 = dma.hbm_to_vmem [thread:$0]  %s85_s0, 32, %s8_s7, [#allocation1]  }
  0x10   :  { %56 = dma.done.wait [#allocation1], 32  }
  0x11   :  { %57 = vsyncadd [#allocation1], 4294967264  ;;  %v14_v0 = vld [vmem:[#allocation0] sm:$0x3]  ;;  %vm17_vm0 = vcmask 64512   ;;  %s59_s0 = smov 8  }
  0x12   :  { %15 = vst [vmem:[#allocation3] sm:$0x3] %v14_v0  ;;  %vm23_vm1 = vcmask 130112  }
  0x19   :  { %v16_v1 = vld [vmem:[#allocation3] sm:$0x1]   ;;  %v20_v2 = vld [vmem:[#allocation3 + $0x1] sm:$0x1]  }
  0x1a   :  { %21 = vrot.lane.b32.xlu0 %v20_v2, %s59_s0  ;;  %18 = vst.msk [vmem:[#allocation2] sm:$0x1] %vm17_vm0, %v16_v1  }
  0x8c   :  { %v22_v3 = vpop.permute.xlu0 %21  }
  0x8d   :  { %24 = vst.msk [vmem:[#allocation2] sm:$0x1] %vm23_vm1, %v22_v3  }
  0x94   :  { %v28_v4 = vld [vmem:[#allocation2] sm:$0x1] }
  0x95   :  { %30 = vst [vmem:[%s86_s1] sm:$0x1] %v28_v4 }
  0x96   :  { %31 = vsyncpa [#allocation1], 1 }

// kernel: bert_forward.1
= control target key start
LH: loop header
LB: loop body
LE: loop exit
PB: predicated region body
PF: predicated region fallthrough
CT: control target
= control target key end

     0   :  { %s5584_s0 = inlined_call_operand.vmem [shape: f32[16,32], index: 0, kind: input, shape index: {}]   ;;  %s5585_s1 = inlined_call_operand.vmem [shape: f32[2,8], index: 1, kind: input, shape index: {}]   ;;  %s5586_s2 = inlined_call_operand.vmem [shape: f32[16,5], index: 2, kind: input, shape index: {}]   ;;  %s5587_s3 = inlined_call_operand.vmem [shape: f32[1,32], index: 3, kind: input, shape index: {}]   ;;  %s5588_s4 = inlined_call_operand.vmem [shape: f32[1,32], index: 4, kind: input, shape index: {}]   ;;  %s5589_s5 = inlined_call_operand.hbm [shape: f32[2,32,96], index: 5, kind: input, shape index: {}]   ;;  %s5590_s6 = inlined_call_operand.vmem [shape: f32[2,1,96], index: 6, kind: input, shape index: {}]   ;;  %s5591_s7 = inlined_call_operand.vmem [shape: f32[2,32,32], index: 7, kind: input, shape index: {}]   ;;  %s5592_s8 = inlined_call_operand.vmem [shape: f32[2,1,32], index: 8, kind: input, shape index: {}, may-alias: {8,10,14,16}]   ;;  %s5593_s9 = inlined_call_operand.vmem [shape: f32[2,1,32], index: 9, kind: input, shape index: {}, may-alias: {9,15}]   ;;  %s5594_s10 = inlined_call_operand.vmem [shape: f32[2,1,32], index: 10, kind: input, shape index: {}, may-alias: {8,10,14,16}]   ;;  %s5595_s11 = inlined_call_operand.vmem [shape: f32[2,32,64], index: 11, kind: input, shape index: {}]   ;;  %s5596_s12 = inlined_call_operand.vmem [shape: f32[2,1,64], index: 12, kind: input, shape index: {}]   ;;  %s5597_s13 = inlined_call_operand.vmem [shape: f32[2,64,32], index: 13, kind: input, shape index: {}]   ;;  %s5598_s14 = inlined_call_operand.vmem [shape: f32[2,1,32], index: 14, kind: input, shape index: {}, may-alias: {8,10,14,16}]   ;;  %s5599_s15 = inlined_call_operand.vmem [shape: f32[2,1,32], index: 15, kind: input, shape index: {}, may-alias: {9,15}]   ;;  %s5600_s16 = inlined_call_operand.vmem [shape: f32[2,1,32], index: 16, kind: input, shape index: {}, may-alias: {8,10,14,16}]   ;;  %s5601_s17 = inlined_call_operand.vmem [shape: f32[32,5], index: 17, kind: input, shape index: {}]   ;;  %s5602_s18 = inlined_call_operand.vmem [shape: f32[1,5], index: 18, kind: input, shape index: {}]   ;;  %s5603_s19 = inlined_call_operand.vmem [shape: f32[16,5], index: 19, kind: output, shape index: {0}]   ;;  %s5604_s20 = inlined_call_operand.hbm [shape: f32[1,1], index: 20, kind: output, shape index: {1}]  }
   0x1   :  { %5623 = sst [smem:[#allocation9_spill]] %s5584_s0 }
   0x2   :  { %5624 = sst [smem:[#allocation10_spill]] %s5585_s1 }
   0x3   :  { %5625 = sst [smem:[#allocation11_spill]] %s5586_s2 }
   0x4   :  { %5626 = sst [smem:[#allocation12_spill]] %s5587_s3 }
   0x5   :  { %5627 = sst [smem:[#allocation13_spill]] %s5588_s4 }
   0x6   :  { %26 = vsyncpa [#allocation4], 0 }
   0x7   :  { %27 = vsyncpa [#allocation5], 0  ;;  %s4804_s1 = smov [#allocation3]   ;;  %s4768_s2 = scalar_lea.hbm %s5589_s5, 1024 }
   0x8   :  { %s43_s22 = sshll.u32 %s4804_s1, 4  ;;  %p4769_p0 = scmp.ne.s32.totalorder %s5589_s5, %s4768_s2  ;;  %s44_s22 = int_to_ptr.vmem [resolvable:$true] %s43_s22 }
   0x9   :  { %p4772_p1 = scmp.lt.u32.totalorder %s4768_s2, %s5589_s5 }
   0xb   :  { %p4774_p2 = pnand %p4772_p1, %p4769_p0 }
   0xd   :  { %4777 = shalt.err (!%p4774_p2)
}
   0xe   :  { %s4778_s28 = scalar_lea.vmem %s44_s22, 1024  ;;  %p4783_p4 = scmp.lt.s32.totalorder %s44_s22, %s44_s22 }
   0xf   :  { %p4779_p3 = scmp.ne.s32.totalorder %s44_s22, %s4778_s28  ;;  %p4784_p5 = scmp.lt.s32.totalorder %s4778_s28, %s4778_s28 }
  0x11   :  { %p4785_p6 = por %p4784_p5, %p4783_p4 }
  0x13   :  { %p4786_p7 = pnand %p4785_p6, %p4779_p3 }
  0x15   :  { %4789 = shalt.err (!%p4786_p7)
}
  0x16   :  { %s4805_s4 = smov 128   ;;  %s4806_s29 = smov 8  }
  0x17   :  { %49 = dma.hbm_to_vmem [thread:$0]  %s5589_s5, 1024, %s44_s22, [#allocation4], %s4805_s4, %s4805_s4, %s4806_s29  }
  0x18   :  { %4800 = dma.done.wait [#allocation4], 1024  }
  0x19   :  { %4801 = vsyncadd [#allocation4], 4294966272  ;;  %vm83_vm0 = vcmask 261120   ;;  %s5628_s23 = sld [smem:[#allocation9_spill]]  ;;  %v128_v14 = vld [vmem:[#allocation3] sm:$0xff]  ;;  %v129_v15 = vld [vmem:[#allocation3 + $0x8] sm:$0xff]  ;;  %v299_v45 = vlaneseq }
  0x1a   :  { %v130_v16 = vld [vmem:[#allocation3 + $0x10] sm:$0xff]  ;;  %v4552_v17 = vpack.c.bf16 %v129_v15, %v128_v14  ;;  %v131_v18 = vld [vmem:[#allocation3 + $0x18] sm:$0xff]  ;;  %s5629_s25 = sld [smem:[#allocation12_spill]]  ;;  %s5630_s27 = sld [smem:[#allocation13_spill]]  ;;  %v4807_v36 = vmov 0.0   ;;  %vm4808_vm1 = vmmov 0  }
  0x1b   :  { %v4556_v19 = vpack.c.bf16 %v131_v18, %v130_v16  ;;  %4288 = vmatprep.subr.mxu1 %v4807_v36  ;;  %4290 = vmatprep.mubr.msk.f32.mxu1 %vm4808_vm1, %v4807_v36  ;;  %v4044_v37 = vld [vmem:[%s5590_s6] ss:$0 sm:$0xff]  ;;  %s4809_s30 = smov 96   ;;  %s4810_s0 = smov 88   ;;  %vm223_vm2 = vcmask 64512   ;;  %v5003_v46 = vshrl.u32 %v299_v45, 7 }
  0x1c   :  { %4553 = vmatprep.subr.bf16.mxu0 %v4552_v17  ;;  %s4811_s21 = smov 80   ;;  %s5615_s1 = smov 72   ;;  %vm563_vm3 = vcmask 130112   ;;  %vm736_vm4 = vcmask 195712   ;;  %vm909_vm5 = vcmask 261312   ;;  %vm1863_vm6 = vcmask 523264  }
  0x1d   :  { %4555 = vmatpush3.bf16.msra.mxu0 %v4552_v17  ;;  %s4814_s24 = smov 112   ;;  %s5617_s2 = smov 104   ;;  %v301_v47 = vsub.s32 0, %v5003_v46  ;;  %v991_v15 = vsub.s32 1, %v5003_v46  ;;  %vm3945_vm7 = vcmask 39936   ;;  %vm3992_vm8 = vcmask 7168  }
  0x1e   :  { %4557 = vmatprep.subr.bf16.mxu0 %v4556_v19  ;;  %s5613_s3 = smov 64   ;;  %s5607_s26 = smov 56  }
  0x1f   :  { %v79_v0 = vld [vmem:[%s5628_s23] sm:$0xff]  ;;  %v80_v1 = vld [vmem:[%s5628_s23 + $0x8] sm:$0xff]  ;;  %s4813_s23 = smov 120   ;;  %s5611_s28 = smov 48  }
  0x20   :  { %v84_v2 = vsel %vm83_vm0, %v79_v0, 0.0  ;;  %v87_v3 = vsel %vm83_vm0, %v80_v1, 0.0  ;;  %v4042_v27 = vld [vmem:[%s5629_s25] ss:$0 sm:$0xff]  ;;  %s5631_s25 = sld [smem:[#allocation10_spill]]  ;;  %s5621_s4 = smov 16  }
  0x21   :  { %85 = vadd.xlane.f32.xlu0 %v84_v2  ;;  %4559 = vmatpush3.bf16.msra.mxu0 %v4556_v19  ;;  %v4043_v29 = vld [vmem:[%s5630_s27] ss:$0 sm:$0xff]  ;;  %s5609_s27 = smov 40   ;;  %s5619_s5 = smov 24  }
  0x22   :  { %4308 = vmatprep.subr.mxu0 %v4807_v36 }
  0x25   :  { %88 = vadd.xlane.f32.xlu0 %v87_v3 }
  0x26   :  { %v5009_v48 = vld [vmem:[%s5631_s25] sm:$0x3] }
  0x27   :  { %v5012_v49 = vrot.slane %v5009_v48, %v301_v47 }
  0xae   :  { %v86_v4 = vpop.xlane.xlu0 %85 }
  0xaf   :  { %v91_v5 = vmul.f32 0.03125, %v86_v4 }
  0xb1   :  { %v93_v6 = vsub.f32 %v79_v0, %v91_v5 }
  0xb2   :  { %v89_v7 = vpop.xlane.xlu0 %88 }
  0xb3   :  { %v92_v8 = vmul.f32 0.03125, %v89_v7  ;;  %v95_v9 = vmul.f32 %v93_v6, %v93_v6 }
  0xb5   :  { %v94_v10 = vsub.f32 %v80_v1, %v92_v8  ;;  %v97_v11 = vsel %vm83_vm0, %v95_v9, 0.0 }
  0xb6   :  { %98 = vadd.xlane.f32.xlu1 %v97_v11 }
  0xb7   :  { %v96_v12 = vmul.f32 %v94_v10, %v94_v10 }
  0xb9   :  { %v100_v13 = vsel %vm83_vm0, %v96_v12, 0.0 }
  0xba   :  { %101 = vadd.xlane.f32.xlu1 %v100_v13 }
 0x143   :  { %v99_v20 = vpop.xlane.xlu1 %98 }
 0x144   :  { %v103_v21 = vmul.f32 0.03125, %v99_v20 }
 0x146   :  { %v105_v22 = vadd.f32 1e-12, %v103_v21  ;;  %v5071_v21 = vrot.slane %v5009_v48, %v991_v15 }
 0x147   :  { %v102_v23 = vpop.xlane.xlu1 %101 }
 0x148   :  { %4666 = vrsqrt.f32 %v105_v22  ;;  %v104_v24 = vmul.f32 0.03125, %v102_v23 }
 0x14a   :  { %v106_v25 = vadd.f32 1e-12, %v104_v24 }
 0x14c   :  { %4668 = vrsqrt.f32 %v106_v25 }
 0x152   :  { %v4667_v26 = vpop.eup %4666 }
 0x153   :  { %v109_v28 = vmul.f32 %v4667_v26, %v93_v6 }
 0x155   :  { %v117_v30 = vmul.f32 %v4042_v27, %v109_v28 }
 0x156   :  { %v4669_v31 = vpop.eup %4668 }
 0x157   :  { %v110_v32 = vmul.f32 %v4669_v31, %v94_v10  ;;  %v4958_v33 = vadd.f32 %v4043_v29, %v117_v30 }
 0x159   :  { %v118_v34 = vmul.f32 %v4042_v27, %v110_v32  ;;  %4285 = vmatprep.mubr.msk.f32.mxu0 %vm83_vm0, %v4958_v33 }
 0x15b   :  { %v4962_v35 = vadd.f32 %v4043_v29, %v118_v34 }
 0x15d   :  { %4286 = vmatmul.mubr.msk.f32.vlgmr.msra.gmra.mrb[0].mxu0 %vm83_vm0, %v4962_v35 }
 0x15e   :  { %4310 = vmatprep.mubr.msk.f32.mxu0 %vm4808_vm1, %v4807_v36 }
 0x230   :  { %v4287_v38 = vpop.f32.mrb[0].mxu0 }
 0x231   :  { %v211_v39 = vpop.f32.mrb[1].mxu0  ;;  %v4985_v41 = vadd.f32 %v4287_v38, %v4044_v37 }
 0x232   :  { %v4975_v40 = vadd.f32 %v4044_v37, %v211_v39 }
 0x234   :  { %221 = vrot.lane.b32.xlu0 %v4975_v40, %s4809_s30 }
 0x238   :  { %394 = vrot.lane.b32.xlu0 %v4975_v40, %s4810_s0 }
 0x23c   :  { %567 = vrot.lane.b32.xlu0 %v4975_v40, %s4811_s21 }
 0x240   :  { %740 = vrot.lane.b32.xlu0 %v4975_v40, %s5615_s1 }
 0x244   :  { %912 = vrot.lane.b32.xlu0 %v4985_v41, %s4809_s30 }
 0x248   :  { %1082 = vrot.lane.b32.xlu0 %v4985_v41, %s4813_s23 }
 0x24c   :  { %1254 = vrot.lane.b32.xlu0 %v4985_v41, %s4814_s24 }
 0x250   :  { %1426 = vrot.lane.b32.xlu0 %v4985_v41, %s5617_s2 }
 0x2a6   :  { %v222_v42 = vpop.permute.xlu0 %221 }
 0x2a7   :  { %4289 = vmatpush3.xpose.msk.msra.mxu1 %vm223_vm2, %v222_v42 }
 0x2a8   :  { %4293 = vmatprep.subr.mxu1 %v4807_v36 }
 0x2aa   :  { %4291 = vmatmul.mubr.msk.f32.vlgmr.msra.gmra.mrb[0].mxu1 %vm223_vm2, %v4975_v40  ;;  %v395_v43 = vpop.permute.xlu0 %394 }
 0x2ab   :  { %4295 = vmatprep.mubr.msk.f32.mxu1 %vm4808_vm1, %v4807_v36 }
 0x2ae   :  { %v568_v44 = vpop.permute.xlu0 %567 }
 0x2af   :  { %4309 = vmatpush3.xpose.msk.msra.mxu0 %vm223_vm2, %v568_v44 }
 0x2b0   :  { %4318 = vmatprep.subr.mxu0 %v4807_v36 }
 0x2b2   :  { %v741_v62 = vpop.permute.xlu0 %740 }
 0x2b6   :  { %v913_v1 = vpop.permute.xlu0 %912 }
 0x2ba   :  { %v1083_v4 = vpop.permute.xlu0 %1082 }
 0x2be   :  { %v1255_v8 = vpop.permute.xlu0 %1254 }
 0x2c2   :  { %v1427_v10 = vpop.permute.xlu0 %1426 }
 0x37d   :  { %v294_v50 = vpop.f32.mrb[0].mxu1 }
 0x37e   :  { %v298_v51 = vmul.f32 0.35355338, %v294_v50  ;;  %v4292_v52 = vpop.f32.mrb[1].mxu1 }
 0x380   :  { %v303_v53 = vadd.f32 %v5012_v49, %v298_v51 }
 0x382   :  { %v304_v54 = vsel %vm223_vm2, %v303_v53, -inf }
 0x383   :  { %305 = vmax.xlane.f32.xlu1 %v304_v54 }
 0x394   :  { %315 = vrot.lane.b32.xlu1 %v4975_v40, %s5613_s3 }
 0x398   :  { %392 = vrot.lane.b32.xlu1 %v4975_v40, %s4813_s23 }
 0x410   :  { %v306_v55 = vpop.xlane.xlu1 %305 }
 0x411   :  { %v307_v56 = vsub.f32 %v303_v53, %v306_v55 }
 0x413   :  { %v308_v57 = vmul.f32 1.442695, %v307_v56 }
 0x414   :  { %v316_v58 = vpop.permute.xlu1 %315 }
 0x415   :  { %4670 = vpow2.f32 %v308_v57  ;;  %4294 = vmatpush3.msra.mxu1 %v316_v58 }
 0x416   :  { %4298 = vmatprep.subr.mxu1 %v4807_v36 }
 0x418   :  { %v393_v61 = vpop.permute.xlu1 %392 }
 0x41f   :  { %v4671_v59 = vpop.eup %4670 }
 0x420   :  { %v310_v60 = vsel %vm223_vm2, %v4671_v59, 0.0 }
 0x421   :  { %311 = vadd.xlane.f32.xlu1 %v310_v60 }
 0x432   :  { %565 = vrot.lane.b32.xlu1 %v4975_v40, %s4814_s24 }
 0x436   :  { %738 = vrot.lane.b32.xlu1 %v4975_v40, %s5617_s2 }
 0x43a   :  { %1084 = vrot.lane.b32.xlu1 %v4985_v41, %s4810_s0 }
 0x43e   :  { %1256 = vrot.lane.b32.xlu1 %v4985_v41, %s4811_s21 }
 0x442   :  { %1428 = vrot.lane.b32.xlu1 %v4985_v41, %s5615_s1 }
 0x4ae   :  { %v312_v63 = vpop.xlane.xlu1 %311 }
 0x4af   :  { %4672 = vrcp.f32 %v312_v63 }
 0x4b2   :  { %v566_v0 = vpop.permute.xlu1 %565 }
 0x4b3   :  { %4311 = vmatmul.mubr.msk.f32.vlgmr.msra.gmra.mrb[2].mxu0 %vm223_vm2, %v566_v0 }
 0x4b4   :  { %4319 = vmatpush3.xpose.msk.msra.mxu0 %vm223_vm2, %v741_v62  ;;  %4320 = vmatprep.mubr.msk.f32.mxu0 %vm4808_vm1, %v4807_v36 }
 0x4b5   :  { %4328 = vmatprep.subr.mxu0 %v4807_v36 }
 0x4b6   :  { %v739_v2 = vpop.permute.xlu1 %738 }
 0x4b7   :  { %4321 = vmatmul.mubr.msk.f32.vlgmr.msra.gmra.mrb[4].mxu0 %vm223_vm2, %v739_v2 }
 0x4b8   :  { %4329 = vmatpush3.xpose.msk.msra.mxu0 %vm223_vm2, %v913_v1  ;;  %4330 = vmatprep.mubr.msk.f32.mxu0 %vm4808_vm1, %v4807_v36 }
 0x4b9   :  { %v4673_v3 = vpop.eup %4672  ;;  %4338 = vmatprep.subr.mxu0 %v4807_v36 }
 0x4ba   :  { %v1085_v5 = vpop.permute.xlu1 %1084  ;;  %v314_v6 = vmul.f32 %v4673_v3, %v4671_v59 }
 0x4bb   :  { %4331 = vmatmul.mubr.msk.f32.vlgmr.msra.gmra.mrb[6].mxu0 %vm223_vm2, %v4985_v41 }
 0x4bc   :  { %4339 = vmatpush3.xpose.msk.msra.mxu0 %vm223_vm2, %v1085_v5  ;;  %4296 = vmatmul.mubr.msk.f32.vlgmr.msra.gmra.mrb[2].mxu1 %vm223_vm2, %v314_v6 }
 0x4bd   :  { %4299 = vmatpush3.xpose.msk.msra.mxu1 %vm223_vm2, %v395_v43  ;;  %4340 = vmatprep.mubr.msk.f32.mxu0 %vm4808_vm1, %v4807_v36 }
 0x4be   :  { %v1257_v7 = vpop.permute.xlu1 %1256  ;;  %4348 = vmatprep.subr.mxu0 %v4807_v36  ;;  %4300 = vmatprep.mubr.msk.f32.mxu1 %vm4808_vm1, %v4807_v36 }
 0x4bf   :  { %4341 = vmatmul.mubr.msk.f32.vlgmr.msra.gmra.mrb[8].mxu0 %vm223_vm2, %v1083_v4  ;;  %4303 = vmatprep.subr.mxu1 %v4807_v36 }
 0x4c0   :  { %4349 = vmatpush3.xpose.msk.msra.mxu0 %vm223_vm2, %v1257_v7  ;;  %4301 = vmatmul.mubr.msk.f32.vlgmr.msra.gmra.mrb[4].mxu1 %vm223_vm2, %v393_v61 }
 0x4c1   :  { %4350 = vmatprep.mubr.msk.f32.mxu0 %vm4808_vm1, %v4807_v36  ;;  %4358 = vmatprep.subr.mxu0 %v4807_v36 }
 0x4c2   :  { %v1429_v9 = vpop.permute.xlu1 %1428  ;;  %4305 = vmatprep.mubr.msk.f32.mxu1 %vm4808_vm1, %v4807_v36 }
 0x4c3   :  { %4351 = vmatmul.mubr.msk.f32.vlgmr.msra.gmra.mrb[10].mxu0 %vm223_vm2, %v1255_v8 }
 0x4c4   :  { %4359 = vmatpush3.xpose.msk.msra.mxu0 %vm223_vm2, %v1429_v9  ;;  %4360 = vmatprep.mubr.msk.f32.mxu0 %vm4808_vm1, %v4807_v36 }
 0x4c7   :  { %4361 = vmatmul.mubr.msk.f32.vlgmr.msra.gmra.mrb[12].mxu0 %vm223_vm2, %v1427_v10 }
 0x586   :  { %v639_v11 = vpop.f32.mrb[2].mxu0 }
 0x587   :  { %v643_v12 = vmul.f32 0.35355338, %v639_v11  ;;  %v4312_v13 = vpop.f32.mrb[3].mxu0 }
 0x589   :  { %v644_v14 = vadd.f32 %v643_v12, %v5012_v49 }
 0x58a   :  { %v812_v16 = vpop.f32.mrb[4].mxu0 }
 0x58b   :  { %v816_v17 = vmul.f32 0.35355338, %v812_v16  ;;  %v4322_v18 = vpop.f32.mrb[5].mxu0  ;;  %v645_v19 = vsel %vm223_vm2, %v644_v14, -inf }
 0x58c   :  { %646 = vmax.xlane.f32.xlu0 %v645_v19 }
 0x58d   :  { %v817_v20 = vadd.f32 %v816_v17, %v5012_v49 }
 0x58e   :  { %v984_v22 = vpop.f32.mrb[6].mxu0 }
 0x58f   :  { %v988_v23 = vmul.f32 0.35355338, %v984_v22  ;;  %v387_v24 = vpop.f32.mrb[2].mxu1  ;;  %v4332_v25 = vpop.f32.mrb[7].mxu0  ;;  %v818_v26 = vsel %vm223_vm2, %v817_v20, -inf }
 0x590   :  { %391 = vst.msk [vmem:[#allocation2] sm:$0xff] %vm223_vm2, %v387_v24  ;;  %v4297_v27 = vpop.f32.mrb[3].mxu1  ;;  %819 = vmax.xlane.f32.xlu0 %v818_v26 }
 0x591   :  { %v993_v28 = vadd.f32 %v5071_v21, %v988_v23 }
 0x592   :  { %v1156_v29 = vpop.f32.mrb[8].mxu0 }
 0x593   :  { %v466_v30 = vpop.f32.mrb[4].mxu1  ;;  %v4342_v31 = vpop.f32.mrb[9].mxu0  ;;  %v994_v32 = vsel %vm223_vm2, %v993_v28, -inf  ;;  %v1160_v34 = vmul.f32 0.35355338, %v1156_v29 }
 0x594   :  { %v470_v37 = vmul.f32 0.35355338, %v466_v30  ;;  %v4302_v38 = vpop.f32.mrb[5].mxu1  ;;  %995 = vmax.xlane.f32.xlu0 %v994_v32 }
 0x595   :  { %v1161_v46 = vadd.f32 %v1160_v34, %v5071_v21 }
 0x596   :  { %v1328_v39 = vpop.f32.mrb[10].mxu0  ;;  %v471_v42 = vadd.f32 %v470_v37, %v5012_v49 }
 0x597   :  { %v1332_v43 = vmul.f32 0.35355338, %v1328_v39  ;;  %v4352_v44 = vpop.f32.mrb[11].mxu0  ;;  %v1162_v53 = vsel %vm223_vm2, %v1161_v46, -inf }
 0x598   :  { %v472_v45 = vsel %vm223_vm2, %v471_v42, -inf }
 0x599   :  { %473 = vmax.xlane.f32.xlu1 %v472_v45  ;;  %v1333_v47 = vadd.f32 %v1332_v43, %v5071_v21 }
 0x59a   :  { %v1500_v48 = vpop.f32.mrb[12].mxu0 }
 0x59b   :  { %v1504_v50 = vmul.f32 0.35355338, %v1500_v48  ;;  %v4362_v51 = vpop.f32.mrb[13].mxu0  ;;  %v1334_v52 = vsel %vm223_vm2, %v1333_v47, -inf }
 0x59c   :  { %1335 = vmax.xlane.f32.xlu0 %v1334_v52 }
 0x59d   :  { %1163 = vmax.xlane.f32.xlu1 %v1162_v53  ;;  %v1505_v54 = vadd.f32 %v1504_v50, %v5071_v21 }
 0x59f   :  { %v1506_v55 = vsel %vm223_vm2, %v1505_v54, -inf }
 0x5a1   :  { %1507 = vmax.xlane.f32.xlu1 %v1506_v55 }
 0x619   :  { %v647_v56 = vpop.xlane.xlu0 %646 }
 0x61a   :  { %v648_v57 = vsub.f32 %v644_v14, %v647_v56 }
 0x61c   :  { %v649_v58 = vmul.f32 1.442695, %v648_v57 }
 0x61d   :  { %v820_v59 = vpop.xlane.xlu0 %819 }
 0x61e   :  { %4674 = vpow2.f32 %v649_v58  ;;  %v821_v60 = vsub.f32 %v817_v20, %v820_v59 }
 0x620   :  { %v822_v61 = vmul.f32 1.442695, %v821_v60 }
 0x621   :  { %v996_v62 = vpop.xlane.xlu0 %995 }
 0x622   :  { %4676 = vpow2.f32 %v822_v61  ;;  %v997_v63 = vsub.f32 %v993_v28, %v996_v62 }
 0x624   :  { %v998_v0 = vmul.f32 1.442695, %v997_v63 }
 0x626   :  { %4678 = vpow2.f32 %v998_v0  ;;  %v474_v1 = vpop.xlane.xlu1 %473 }
 0x627   :  { %v475_v10 = vsub.f32 %v471_v42, %v474_v1 }
 0x628   :  { %v5085_v2 = vpop.eup %4674 }
 0x629   :  { %v1336_v3 = vpop.xlane.xlu0 %1335  ;;  %v651_v4 = vsel %vm223_vm2, %v5085_v2, 0.0  ;;  %v476_v16 = vmul.f32 1.442695, %v475_v10 }
 0x62a   :  { %v1337_v5 = vsub.f32 %v1333_v47, %v1336_v3  ;;  %v1164_v6 = vpop.xlane.xlu1 %1163  ;;  %652 = vadd.xlane.f32.xlu1 %v651_v4  ;;  %v1601_v3 = vld [vmem:[%s5591_s7 + $0x8] sm:$0xff] }
 0x62b   :  { %v1165_v7 = vsub.f32 %v1161_v46, %v1164_v6  ;;  %v1602_v6 = vld [vmem:[%s5591_s7 + $0x10] sm:$0xff] }
 0x62c   :  { %v5089_v8 = vpop.eup %4676  ;;  %v1338_v9 = vmul.f32 1.442695, %v1337_v5 }
 0x62d   :  { %v1166_v11 = vmul.f32 1.442695, %v1165_v7  ;;  %v824_v12 = vsel %vm223_vm2, %v5089_v8, 0.0  ;;  %v1603_v7 = vld [vmem:[%s5591_s7 + $0x18] sm:$0xff] }
 0x62e   :  { %4680 = vpow2.f32 %v1338_v9  ;;  %v1508_v13 = vpop.xlane.xlu1 %1507  ;;  %825 = vadd.xlane.f32.xlu0 %v824_v12  ;;  %v4564_v9 = vpack.c.bf16 %v1603_v7, %v1602_v6  ;;  %v1850_v7 = vld [vmem:[%s5597_s13 + $0x10] sm:$0xff] }
 0x62f   :  { %4682 = vpow2.f32 %v1166_v11  ;;  %v1509_v14 = vsub.f32 %v1505_v54, %v1508_v13 }
 0x630   :  { %v5093_v15 = vpop.eup %4678 }
 0x631   :  { %v1510_v17 = vmul.f32 1.442695, %v1509_v14  ;;  %v1000_v18 = vsel %vm223_vm2, %v5093_v15, 0.0 }
 0x632   :  { %1001 = vadd.xlane.f32.xlu1 %v1000_v18 }
 0x633   :  { %4684 = vpow2.f32 %v1510_v17 }
 0x634   :  { %4686 = vpow2.f32 %v476_v16 }
 0x638   :  { %v5097_v19 = vpop.eup %4680 }
 0x639   :  { %v5099_v20 = vpop.eup %4682  ;;  %v1340_v22 = vsel %vm223_vm2, %v5097_v19, 0.0 }
 0x63a   :  { %1341 = vadd.xlane.f32.xlu1 %v1340_v22  ;;  %v1168_v23 = vsel %vm223_vm2, %v5099_v20, 0.0 }
 0x63b   :  { %1169 = vadd.xlane.f32.xlu0 %v1168_v23 }
 0x63d   :  { %v5105_v24 = vpop.eup %4684 }
 0x63e   :  { %v1512_v25 = vsel %vm223_vm2, %v5105_v24, 0.0  ;;  %v4687_v26 = vpop.eup %4686 }
 0x63f   :  { %1513 = vadd.xlane.f32.xlu0 %v1512_v25  ;;  %v478_v27 = vsel %vm223_vm2, %v4687_v26, 0.0  ;;  %v4071_v25 = vld [vmem:[%s5592_s8] ss:$0 sm:$0xff] }
 0x643   :  { %479 = vadd.xlane.f32.xlu0 %v478_v27 }
 0x64b   :  { %483 = vrot.lane.b32.xlu1 %v4975_v40, %s5607_s26 }
 0x64f   :  { %829 = vrot.lane.b32.xlu1 %v4975_v40, %s5609_s27 }
 0x653   :  { %1005 = vrot.lane.b32.xlu1 %v4985_v41, %s5613_s3 }
 0x657   :  { %1173 = vrot.lane.b32.xlu1 %v4985_v41, %s5607_s26 }
 0x659   :  { %656 = vrot.lane.b32.xlu0 %v4975_v40, %s5611_s28 }
 0x65b   :  { %1517 = vrot.lane.b32.xlu1 %v4985_v41, %s5609_s27 }
 0x65d   :  { %1345 = vrot.lane.b32.xlu0 %v4985_v41, %s5611_s28 }
 0x6b7   :  { %v653_v28 = vpop.xlane.xlu1 %652 }
 0x6bb   :  { %v826_v30 = vpop.xlane.xlu0 %825 }
 0x6bf   :  { %v1002_v29 = vpop.xlane.xlu1 %1001 }
 0x6c7   :  { %v1342_v31 = vpop.xlane.xlu1 %1341 }
 0x6c8   :  { %v1170_v32 = vpop.xlane.xlu0 %1169 }
 0x6cb   :  { %v484_v34 = vpop.permute.xlu1 %483 }
 0x6cc   :  { %4304 = vmatpush3.msra.mxu1 %v484_v34  ;;  %v1514_v37 = vpop.xlane.xlu0 %1513 }
 0x6cd   :  { %4313 = vmatprep.subr.mxu1 %v4807_v36 }
 0x6cf   :  { %v830_v43 = vpop.permute.xlu1 %829 }
 0x6d0   :  { %v480_v38 = vpop.xlane.xlu0 %479 }
 0x6d1   :  { %4688 = vrcp.f32 %v480_v38 }
 0x6d2   :  { %4690 = vrcp.f32 %v653_v28 }
 0x6d3   :  { %4692 = vrcp.f32 %v826_v30  ;;  %v1006_v47 = vpop.permute.xlu1 %1005 }
 0x6d4   :  { %4694 = vrcp.f32 %v1002_v29  ;;  %v657_v41 = vpop.permute.xlu0 %656 }
 0x6d5   :  { %4696 = vrcp.f32 %v1170_v32 }
 0x6d6   :  { %4698 = vrcp.f32 %v1342_v31 }
 0x6d7   :  { %4700 = vrcp.f32 %v1514_v37  ;;  %v1174_v52 = vpop.permute.xlu1 %1173 }
 0x6d8   :  { %v1346_v55 = vpop.permute.xlu0 %1345 }
 0x6db   :  { %v4689_v40 = vpop.eup %4688  ;;  %v1518_v58 = vpop.permute.xlu1 %1517 }
 0x6dc   :  { %v482_v39 = vmul.f32 %v4689_v40, %v4687_v26  ;;  %v4691_v42 = vpop.eup %4690 }
 0x6dd   :  { %v655_v44 = vmul.f32 %v4691_v42, %v5085_v2  ;;  %v4693_v45 = vpop.eup %4692  ;;  %v1600_v2 = vld [vmem:[%s5591_s7] sm:$0xff] }
 0x6de   :  { %4306 = vmatmul.mubr.msk.f32.vlgmr.msra.gmra.mrb[6].mxu1 %vm223_vm2, %v482_v39  ;;  %v828_v46 = vmul.f32 %v4693_v45, %v5089_v8  ;;  %v4695_v48 = vpop.eup %4694  ;;  %v4560_v4 = vpack.c.bf16 %v1601_v3, %v1600_v2 }
 0x6df   :  { %4314 = vmatpush3.msra.mxu1 %v657_v41  ;;  %4315 = vmatprep.mubr.msk.f32.mxu1 %vm4808_vm1, %v4807_v36  ;;  %v1004_v50 = vmul.f32 %v4695_v48, %v5093_v15  ;;  %v4697_v51 = vpop.eup %4696  ;;  %v1740_v48 = vld [vmem:[%s5595_s11 + $0x10] sm:$0xff] }
 0x6e0   :  { %4323 = vmatprep.subr.mxu1 %v4807_v36  ;;  %v1172_v53 = vmul.f32 %v4697_v51, %v5099_v20  ;;  %v4699_v54 = vpop.eup %4698  ;;  %4561 = vmatprep.subr.bf16.mxu0 %v4560_v4 }
 0x6e1   :  { %v1344_v56 = vmul.f32 %v4699_v54, %v5097_v19  ;;  %v4701_v57 = vpop.eup %4700  ;;  %4563 = vmatpush3.bf16.msra.mxu0 %v4560_v4  ;;  %v1848_v4 = vld [vmem:[%s5597_s13] sm:$0xff] }
 0x6e2   :  { %4316 = vmatmul.mubr.msk.f32.vlgmr.msra.gmra.mrb[8].mxu1 %vm223_vm2, %v655_v44  ;;  %v1516_v59 = vmul.f32 %v4701_v57, %v5105_v24  ;;  %4565 = vmatprep.subr.bf16.mxu0 %v4564_v9 }
 0x6e3   :  { %4324 = vmatpush3.msra.mxu1 %v830_v43  ;;  %4325 = vmatprep.mubr.msk.f32.mxu1 %vm4808_vm1, %v4807_v36 }
 0x6e4   :  { %4333 = vmatprep.subr.mxu1 %v4807_v36 }
 0x6e5   :  { %4567 = vmatpush3.bf16.msra.mxu0 %v4564_v9 }
 0x6e6   :  { %4326 = vmatmul.mubr.msk.f32.vlgmr.msra.gmra.mrb[10].mxu1 %vm223_vm2, %v828_v46  ;;  %v1739_v46 = vld [vmem:[%s5595_s11 + $0x8] sm:$0xff] }
 0x6e7   :  { %4334 = vmatpush3.msra.mxu1 %v1006_v47  ;;  %4335 = vmatprep.mubr.msk.f32.mxu1 %vm4808_vm1, %v4807_v36 }
 0x6e8   :  { %4343 = vmatprep.subr.mxu1 %v4807_v36 }
 0x6ea   :  { %4336 = vmatmul.mubr.msk.f32.vlgmr.msra.gmra.mrb[12].mxu1 %vm223_vm2, %v1004_v50  ;;  %v1741_v50 = vld [vmem:[%s5595_s11 + $0x18] sm:$0xff] }
 0x6eb   :  { %4344 = vmatpush3.msra.mxu1 %v1174_v52  ;;  %4345 = vmatprep.mubr.msk.f32.mxu1 %vm4808_vm1, %v4807_v36  ;;  %v4572_v51 = vpack.c.bf16 %v1741_v50, %v1740_v48 }
 0x6ec   :  { %4353 = vmatprep.subr.mxu1 %v4807_v36 }
 0x6ee   :  { %4346 = vmatmul.mubr.msk.f32.vlgmr.msra.gmra.mrb[14].mxu1 %vm223_vm2, %v1172_v53 }
 0x6ef   :  { %4354 = vmatpush3.msra.mxu1 %v1346_v55  ;;  %4355 = vmatprep.mubr.msk.f32.mxu1 %vm4808_vm1, %v4807_v36 }
 0x6f0   :  { %4363 = vmatprep.subr.mxu1 %v4807_v36 }
 0x6f2   :  { %4356 = vmatmul.mubr.msk.f32.vlgmr.msra.gmra.mrb[16].mxu1 %vm223_vm2, %v1344_v56 }
 0x6f3   :  { %4364 = vmatpush3.msra.mxu1 %v1518_v58  ;;  %4365 = vmatprep.mubr.msk.f32.mxu1 %vm4808_vm1, %v4807_v36 }
 0x6f6   :  { %4366 = vmatmul.mubr.msk.f32.vlgmr.msra.gmra.mrb[18].mxu1 %vm223_vm2, %v1516_v59  ;;  %v4074_v59 = vld [vmem:[%s5593_s9] ss:$0 sm:$0xff] }
 0x7b1   :  { %v555_v60 = vpop.f32.mrb[6].mxu1 }
 0x7b2   :  { %560 = vrot.lane.b32.xlu0 %v555_v60, %s4806_s29  ;;  %v4307_v61 = vpop.f32.mrb[7].mxu1 }
 0x7b3   :  { %v4075_v61 = vld [vmem:[%s5594_s10] ss:$0 sm:$0xff] }
 0x7b5   :  { %v728_v62 = vpop.f32.mrb[8].mxu1 }
 0x7b6   :  { %733 = vrot.lane.b32.xlu1 %v728_v62, %s5621_s4  ;;  %v4317_v63 = vpop.f32.mrb[9].mxu1 }
 0x7b9   :  { %v901_v0 = vpop.f32.mrb[10].mxu1 }
 0x7ba   :  { %906 = vrot.lane.b32.xlu1 %v901_v0, %s5619_s5  ;;  %v4327_v1 = vpop.f32.mrb[11].mxu1 }
 0x7bd   :  { %v1077_v5 = vpop.f32.mrb[12].mxu1 }
 0x7be   :  { %1081 = vst.msk [vmem:[#allocation2 + $0x8] sm:$0xff] %vm223_vm2, %v1077_v5  ;;  %v4337_v8 = vpop.f32.mrb[13].mxu1  ;;  %v1849_v5 = vld [vmem:[%s5597_s13 + $0x8] sm:$0xff] }
 0x7bf   :  { %v4576_v6 = vpack.c.bf16 %v1849_v5, %v1848_v4  ;;  %v1851_v8 = vld [vmem:[%s5597_s13 + $0x18] sm:$0xff] }
 0x7c0   :  { %v4580_v9 = vpack.c.bf16 %v1851_v8, %v1850_v7 }
 0x7c1   :  { %v1245_v10 = vpop.f32.mrb[14].mxu1  ;;  %4577 = vmatprep.subr.bf16.mxu0 %v4576_v6 }
 0x7c2   :  { %1250 = vrot.lane.b32.xlu0 %v1245_v10, %s4806_s29  ;;  %v4347_v11 = vpop.f32.mrb[15].mxu1  ;;  %v1852_v10 = vld [vmem:[%s5597_s13 + $0x20] sm:$0xff] }
 0x7c3   :  { %v1853_v11 = vld [vmem:[%s5597_s13 + $0x28] sm:$0xff] }
 0x7c5   :  { %v1417_v12 = vpop.f32.mrb[16].mxu1 }
 0x7c6   :  { %1422 = vrot.lane.b32.xlu0 %v1417_v12, %s5621_s4  ;;  %v4357_v13 = vpop.f32.mrb[17].mxu1  ;;  %v4584_v12 = vpack.c.bf16 %v1853_v11, %v1852_v10  ;;  %v4082_v10 = vld [vmem:[%s5599_s15] ss:$0 sm:$0xff]  ;;  %s5633_s4 = smov 72  }
 0x7c7   :  { %v1854_v13 = vld [vmem:[%s5597_s13 + $0x30] sm:$0xff] }
 0x7c9   :  { %v1589_v14 = vpop.f32.mrb[18].mxu1 }
 0x7ca   :  { %1594 = vrot.lane.b32.xlu1 %v1589_v14, %s5619_s5  ;;  %v4367_v15 = vpop.f32.mrb[19].mxu1  ;;  %v1855_v14 = vld [vmem:[%s5597_s13 + $0x38] sm:$0xff]  ;;  %s5639_s5 = smov 24  }
 0x7cb   :  { %v4588_v15 = vpack.c.bf16 %v1855_v14, %v1854_v13  ;;  %v4083_v14 = vld [vmem:[%s5600_s16] ss:$0 sm:$0xff] }
 0x824   :  { %v561_v16 = vpop.permute.xlu0 %560 }
 0x825   :  { %564 = vst.msk [vmem:[#allocation2] sm:$0xff] %vm563_vm3, %v561_v16  ;;  %v4076_v16 = vld [vmem:[%s5596_s12] ss:$0 sm:$0xff] }
 0x828   :  { %v734_v17 = vpop.permute.xlu1 %733 }
 0x829   :  { %737 = vst.msk [vmem:[#allocation2] sm:$0xff] %vm736_vm4, %v734_v17 }
 0x82c   :  { %v907_v18 = vpop.permute.xlu1 %906 }
 0x82d   :  { %910 = vst.msk [vmem:[#allocation2] sm:$0xff] %vm909_vm5, %v907_v18 }
 0x834   :  { %v1251_v19 = vpop.permute.xlu0 %1250  ;;  %v1598_v20 = vld [vmem:[#allocation2] sm:$0xff] }
 0x835   :  { %1253 = vst.msk [vmem:[#allocation2 + $0x8] sm:$0xff] %vm563_vm3, %v1251_v19  ;;  %4376 = vmatprep.mubr.msk.f32.mxu0 %vm83_vm0, %v1598_v20 }
 0x838   :  { %v1423_v22 = vpop.permute.xlu0 %1422 }
 0x839   :  { %1425 = vst.msk [vmem:[#allocation2 + $0x8] sm:$0xff] %vm736_vm4, %v1423_v22 }
 0x83c   :  { %v1595_v23 = vpop.permute.xlu1 %1594 }
 0x83d   :  { %1597 = vst.msk [vmem:[#allocation2 + $0x8] sm:$0xff] %vm909_vm5, %v1595_v23 }
 0x844   :  { %v1599_v24 = vld [vmem:[#allocation2 + $0x8] sm:$0xff] }
 0x845   :  { %4377 = vmatmul.mubr.msk.f32.vlgmr.msra.gmra.mrb[14].mxu0 %vm83_vm0, %v1599_v24 }
 0x846   :  { %4579 = vmatpush3.bf16.msra.mxu0 %v4576_v6 }
 0x847   :  { %4581 = vmatprep.subr.bf16.mxu0 %v4580_v9 }
 0x84a   :  { %4583 = vmatpush3.bf16.msra.mxu0 %v4580_v9 }
 0x84b   :  { %4585 = vmatprep.subr.bf16.mxu0 %v4584_v12 }
 0x84e   :  { %4587 = vmatpush3.bf16.msra.mxu0 %v4584_v12 }
 0x84f   :  { %4589 = vmatprep.subr.bf16.mxu0 %v4588_v15 }
 0x852   :  { %4591 = vmatpush3.bf16.msra.mxu0 %v4588_v15 }
 0x853   :  { %4430 = vmatprep.subr.mxu0 %v4807_v36 }
 0x918   :  { %v4378_v26 = vpop.f32.mrb[14].mxu0 }
 0x919   :  { %v1689_v27 = vadd.f32 %v4378_v26, %v4071_v25  ;;  %v1683_v28 = vpop.f32.mrb[15].mxu0 }
 0x91a   :  { %v1684_v29 = vadd.f32 %v4071_v25, %v1683_v28 }
 0x91b   :  { %v1693_v30 = vadd.f32 %v1689_v27, %v4962_v35 }
 0x91c   :  { %v1692_v31 = vadd.f32 %v1684_v29, %v4958_v33  ;;  %v1738_v33 = vld [vmem:[%s5595_s11] sm:$0xff] }
 0x91d   :  { %v1699_v32 = vsel %vm83_vm0, %v1693_v30, 0.0  ;;  %v4568_v47 = vpack.c.bf16 %v1739_v46, %v1738_v33 }
 0x91e   :  { %1700 = vadd.xlane.f32.xlu1 %v1699_v32  ;;  %v1696_v34 = vsel %vm83_vm0, %v1692_v31, 0.0 }
 0x91f   :  { %1697 = vadd.xlane.f32.xlu0 %v1696_v34  ;;  %4569 = vmatprep.subr.bf16.mxu1 %v4568_v47 }
 0x920   :  { %4571 = vmatpush3.bf16.msra.mxu1 %v4568_v47 }
 0x921   :  { %4573 = vmatprep.subr.bf16.mxu1 %v4572_v51 }
 0x924   :  { %4575 = vmatpush3.bf16.msra.mxu1 %v4572_v51 }
 0x9ab   :  { %v1701_v37 = vpop.xlane.xlu1 %1700 }
 0x9ac   :  { %v1703_v38 = vmul.f32 0.03125, %v1701_v37  ;;  %v1698_v40 = vpop.xlane.xlu0 %1697 }
 0x9ad   :  { %v1702_v39 = vmul.f32 0.03125, %v1698_v40 }
 0x9ae   :  { %v1705_v42 = vsub.f32 %v1693_v30, %v1703_v38 }
 0x9af   :  { %v1704_v43 = vsub.f32 %v1692_v31, %v1702_v39 }
 0x9b0   :  { %v1707_v45 = vmul.f32 %v1705_v42, %v1705_v42 }
 0x9b1   :  { %v1706_v41 = vmul.f32 %v1704_v43, %v1704_v43 }
 0x9b2   :  { %v1711_v35 = vsel %vm83_vm0, %v1707_v45, 0.0 }
 0x9b3   :  { %v1708_v44 = vsel %vm83_vm0, %v1706_v41, 0.0  ;;  %v4079_v41 = vld [vmem:[%s5598_s14] ss:$0 sm:$0xff] }
 0x9b4   :  { %1709 = vadd.xlane.f32.xlu0 %v1708_v44 }
 0x9b8   :  { %1712 = vadd.xlane.f32.xlu0 %v1711_v35 }
 0xa41   :  { %v1710_v52 = vpop.xlane.xlu0 %1709 }
 0xa42   :  { %v1714_v53 = vmul.f32 0.03125, %v1710_v52 }
 0xa44   :  { %v1716_v54 = vadd.f32 1e-12, %v1714_v53 }
 0xa45   :  { %v1713_v55 = vpop.xlane.xlu0 %1712 }
 0xa46   :  { %4702 = vrsqrt.f32 %v1716_v54  ;;  %v1715_v56 = vmul.f32 0.03125, %v1713_v55 }
 0xa48   :  { %v1717_v57 = vadd.f32 1e-12, %v1715_v56 }
 0xa4a   :  { %4704 = vrsqrt.f32 %v1717_v57 }
 0xa50   :  { %v4703_v58 = vpop.eup %4702 }
 0xa51   :  { %v1720_v60 = vmul.f32 %v4703_v58, %v1704_v43 }
 0xa53   :  { %v1728_v62 = vmul.f32 %v4074_v59, %v1720_v60 }
 0xa54   :  { %v4705_v63 = vpop.eup %4704 }
 0xa55   :  { %v1721_v0 = vmul.f32 %v4705_v63, %v1705_v42  ;;  %v1736_v1 = vadd.f32 %v4075_v61, %v1728_v62  ;;  %v1993_v62 = vld [vmem:[#allocation3 + $0x28] sm:$0xff] }
 0xa57   :  { %v1729_v2 = vmul.f32 %v4074_v59, %v1721_v0  ;;  %4387 = vmatprep.mubr.msk.f32.mxu1 %vm83_vm0, %v1736_v1  ;;  %v1994_v0 = vld [vmem:[#allocation3 + $0x30] sm:$0xff] }
 0xa59   :  { %v1737_v3 = vadd.f32 %v4075_v61, %v1729_v2  ;;  %v1992_v61 = vld [vmem:[#allocation3 + $0x20] sm:$0xff] }
 0xa5a   :  { %v4592_v63 = vpack.c.bf16 %v1993_v62, %v1992_v61 }
 0xa5b   :  { %4388 = vmatmul.mubr.msk.f32.vlgmr.msra.gmra.mrb[20].mxu1 %vm83_vm0, %v1737_v3 }
 0xa5c   :  { %4593 = vmatprep.subr.bf16.mxu1 %v4592_v63 }
 0xa5d   :  { %4595 = vmatpush3.bf16.msra.mxu1 %v4592_v63 }
 0xb2e   :  { %v4389_v17 = vpop.f32.mrb[20].mxu1 }
 0xb2f   :  { %v1827_v18 = vadd.f32 %v4389_v17, %v4076_v16  ;;  %v1821_v19 = vpop.f32.mrb[21].mxu1 }
 0xb30   :  { %v1822_v20 = vadd.f32 %v4076_v16, %v1821_v19  ;;  %v4085_v19 = vld [vmem:[%s5590_s6 + $0x1] ss:$0 sm:$0xff]  ;;  %s5632_s6 = smov 104  }
 0xb31   :  { %v1833_v22 = vmul.f32 0.044715, %v1827_v18  ;;  %v1831_v39 = vmul.f32 0.5, %v1827_v18 }
 0xb32   :  { %v1832_v23 = vmul.f32 0.044715, %v1822_v20  ;;  %v1830_v38 = vmul.f32 0.5, %v1822_v20 }
 0xb33   :  { %v1835_v24 = vmul.f32 %v1833_v22, %v1827_v18 }
 0xb34   :  { %v1834_v25 = vmul.f32 %v1832_v23, %v1822_v20 }
 0xb35   :  { %v1837_v26 = vmul.f32 %v1835_v24, %v1827_v18 }
 0xb36   :  { %v1836_v27 = vmul.f32 %v1834_v25, %v1822_v20 }
 0xb37   :  { %v1839_v28 = vadd.f32 %v1837_v26, %v1827_v18 }
 0xb38   :  { %v1838_v29 = vadd.f32 %v1836_v27, %v1822_v20 }
 0xb39   :  { %v1841_v30 = vmul.f32 0.7978846, %v1839_v28 }
 0xb3a   :  { %v1840_v31 = vmul.f32 0.7978846, %v1838_v29 }
 0xb3b   :  { %4706 = vtanh.f32 %v1841_v30 }
 0xb3c   :  { %4708 = vtanh.f32 %v1840_v31 }
 0xb45   :  { %v4707_v32 = vpop.eup %4706 }
 0xb46   :  { %v4709_v34 = vpop.eup %4708  ;;  %v1845_v37 = vadd.f32 1.0, %v4707_v32 }
 0xb47   :  { %v1844_v40 = vadd.f32 1.0, %v4709_v34 }
 0xb48   :  { %v1847_v43 = vmul.f32 %v1845_v37, %v1831_v39 }
 0xb49   :  { %v1846_v42 = vmul.f32 %v1844_v40, %v1830_v38 }
 0xb4b   :  { %4406 = vmatprep.mubr.msk.f32.mxu0 %vm1863_vm6, %v1846_v42 }
 0xb4c   :  { %4407 = vmatmul.mubr.msk.f32.vlgmr.msra.gmra.mrb[16].mxu0 %vm1863_vm6, %v1847_v43 }
 0xb4d   :  { %4432 = vmatprep.mubr.msk.f32.mxu0 %vm4808_vm1, %v4807_v36 }
 0xc1f   :  { %v4408_v44 = vpop.f32.mrb[16].mxu0 }
 0xc20   :  { %v1942_v45 = vadd.f32 %v4408_v44, %v4079_v41  ;;  %v1936_v35 = vpop.f32.mrb[17].mxu0 }
 0xc21   :  { %v1937_v33 = vadd.f32 %v4079_v41, %v1936_v35 }
 0xc22   :  { %v1946_v46 = vadd.f32 %v1942_v45, %v1737_v3 }
 0xc23   :  { %v1945_v47 = vadd.f32 %v1937_v33, %v1736_v1  ;;  %v1995_v1 = vld [vmem:[#allocation3 + $0x38] sm:$0xff] }
 0xc24   :  { %v1952_v48 = vsel %vm83_vm0, %v1946_v46, 0.0  ;;  %v4596_v2 = vpack.c.bf16 %v1995_v1, %v1994_v0 }
 0xc25   :  { %1953 = vadd.xlane.f32.xlu1 %v1952_v48  ;;  %v1949_v50 = vsel %vm83_vm0, %v1945_v47, 0.0 }
 0xc26   :  { %1950 = vadd.xlane.f32.xlu0 %v1949_v50  ;;  %4597 = vmatprep.subr.bf16.mxu1 %v4596_v2 }
 0xc27   :  { %4599 = vmatpush3.bf16.msra.mxu1 %v4596_v2 }
 0xc28   :  { %4420 = vmatprep.subr.mxu1 %v4807_v36 }
 0xcb2   :  { %v1954_v51 = vpop.xlane.xlu1 %1953 }
 0xcb3   :  { %v1956_v52 = vmul.f32 0.03125, %v1954_v51  ;;  %v1951_v53 = vpop.xlane.xlu0 %1950 }
 0xcb4   :  { %v1955_v54 = vmul.f32 0.03125, %v1951_v53 }
 0xcb5   :  { %v1958_v55 = vsub.f32 %v1946_v46, %v1956_v52 }
 0xcb6   :  { %v1957_v56 = vsub.f32 %v1945_v47, %v1955_v54 }
 0xcb7   :  { %v1960_v57 = vmul.f32 %v1958_v55, %v1958_v55 }
 0xcb8   :  { %v1959_v58 = vmul.f32 %v1957_v56, %v1957_v56 }
 0xcb9   :  { %v1964_v59 = vsel %vm83_vm0, %v1960_v57, 0.0 }
 0xcba   :  { %1965 = vadd.xlane.f32.xlu1 %v1964_v59  ;;  %v1961_v60 = vsel %vm83_vm0, %v1959_v58, 0.0 }
 0xcbb   :  { %1962 = vadd.xlane.f32.xlu0 %v1961_v60 }
 0xd47   :  { %v1966_v3 = vpop.xlane.xlu1 %1965 }
 0xd48   :  { %v1968_v4 = vmul.f32 0.03125, %v1966_v3  ;;  %v1963_v5 = vpop.xlane.xlu0 %1962 }
 0xd49   :  { %v1967_v6 = vmul.f32 0.03125, %v1963_v5 }
 0xd4a   :  { %v1970_v7 = vadd.f32 1e-12, %v1968_v4 }
 0xd4b   :  { %v1969_v8 = vadd.f32 1e-12, %v1967_v6 }
 0xd4c   :  { %4710 = vrsqrt.f32 %v1970_v7 }
 0xd4d   :  { %4712 = vrsqrt.f32 %v1969_v8 }
 0xd56   :  { %v4711_v9 = vpop.eup %4710 }
 0xd57   :  { %v4713_v11 = vpop.eup %4712  ;;  %v1974_v12 = vmul.f32 %v4711_v9, %v1958_v55 }
 0xd58   :  { %v1973_v13 = vmul.f32 %v4713_v11, %v1957_v56 }
 0xd59   :  { %v1982_v15 = vmul.f32 %v4082_v10, %v1974_v12 }
 0xd5a   :  { %v1981_v16 = vmul.f32 %v4082_v10, %v1973_v13 }
 0xd5b   :  { %v5259_v18 = vadd.f32 %v4083_v14, %v1982_v15 }
 0xd5c   :  { %v5257_v17 = vadd.f32 %v4083_v14, %v1981_v16 }
 0xd5e   :  { %4417 = vmatprep.mubr.msk.f32.mxu1 %vm83_vm0, %v5257_v17 }
 0xd5f   :  { %4418 = vmatmul.mubr.msk.f32.vlgmr.msra.gmra.mrb[22].mxu1 %vm83_vm0, %v5259_v18 }
 0xd60   :  { %4422 = vmatprep.mubr.msk.f32.mxu1 %vm4808_vm1, %v4807_v36 }
 0xe32   :  { %v4419_v20 = vpop.f32.mrb[22].mxu1 }
 0xe33   :  { %v2076_v22 = vpop.f32.mrb[23].mxu1  ;;  %v5284_v24 = vadd.f32 %v4419_v20, %v4085_v19 }
 0xe34   :  { %v5270_v23 = vadd.f32 %v4085_v19, %v2076_v22 }
 0xe36   :  { %2254 = vrot.lane.b32.xlu1 %v5270_v23, %s4810_s0  ;;  %2086 = vrot.lane.b32.xlu0 %v5270_v23, %s4809_s30 }
 0xe3a   :  { %2252 = vrot.lane.b32.xlu1 %v5270_v23, %s4813_s23  ;;  %2424 = vrot.lane.b32.xlu0 %v5270_v23, %s4814_s24 }
 0xe3e   :  { %2426 = vrot.lane.b32.xlu1 %v5270_v23, %s4811_s21  ;;  %2596 = vrot.lane.b32.xlu0 %v5270_v23, %s5632_s6 }
 0xe42   :  { %2598 = vrot.lane.b32.xlu1 %v5270_v23, %s5633_s4  ;;  %2937 = vrot.lane.b32.xlu0 %v5284_v24, %s4810_s0  ;;  %s5635_s0 = smov 48  }
 0xe46   :  { %2769 = vrot.lane.b32.xlu1 %v5284_v24, %s4809_s30  ;;  %3109 = vrot.lane.b32.xlu0 %v5284_v24, %s4811_s21  ;;  %s5634_s30 = smov 64   ;;  %s5636_s21 = smov 40  }
 0xe4a   :  { %2935 = vrot.lane.b32.xlu1 %v5284_v24, %s4813_s23  ;;  %3281 = vrot.lane.b32.xlu0 %v5284_v24, %s5633_s4  ;;  %s5637_s23 = smov 56  }
 0xe4e   :  { %3107 = vrot.lane.b32.xlu1 %v5284_v24, %s4814_s24  ;;  %s5638_s24 = smov 16  }
 0xe52   :  { %3279 = vrot.lane.b32.xlu1 %v5284_v24, %s5632_s6 }
 0xea8   :  { %v2255_v25 = vpop.permute.xlu1 %2254  ;;  %v2087_v26 = vpop.permute.xlu0 %2086 }
 0xea9   :  { %4421 = vmatpush3.xpose.msk.msra.mxu1 %vm223_vm2, %v2087_v26  ;;  %4431 = vmatpush3.xpose.msk.msra.mxu0 %vm223_vm2, %v2255_v25 }
 0xeaa   :  { %4440 = vmatprep.subr.mxu0 %v4807_v36  ;;  %4425 = vmatprep.subr.mxu1 %v4807_v36 }
 0xeac   :  { %v2253_v27 = vpop.permute.xlu1 %2252  ;;  %4423 = vmatmul.mubr.msk.f32.vlgmr.msra.gmra.mrb[24].mxu1 %vm223_vm2, %v5270_v23  ;;  %v2425_v28 = vpop.permute.xlu0 %2424 }
 0xead   :  { %4433 = vmatmul.mubr.msk.f32.vlgmr.msra.gmra.mrb[18].mxu0 %vm223_vm2, %v2253_v27  ;;  %4427 = vmatprep.mubr.msk.f32.mxu1 %vm4808_vm1, %v4807_v36 }
 0xeae   :  { %4442 = vmatprep.mubr.msk.f32.mxu0 %vm4808_vm1, %v4807_v36 }
 0xeb0   :  { %v2427_v29 = vpop.permute.xlu1 %2426  ;;  %v2597_v30 = vpop.permute.xlu0 %2596 }
 0xeb1   :  { %4441 = vmatpush3.xpose.msk.msra.mxu0 %vm223_vm2, %v2427_v29 }
 0xeb2   :  { %4450 = vmatprep.subr.mxu0 %v4807_v36 }
 0xeb4   :  { %v2599_v31 = vpop.permute.xlu1 %2598  ;;  %4443 = vmatmul.mubr.msk.f32.vlgmr.msra.gmra.mrb[20].mxu0 %vm223_vm2, %v2425_v28  ;;  %v2938_v32 = vpop.permute.xlu0 %2937 }
 0xeb5   :  { %4451 = vmatpush3.xpose.msk.msra.mxu0 %vm223_vm2, %v2599_v31  ;;  %4452 = vmatprep.mubr.msk.f32.mxu0 %vm4808_vm1, %v4807_v36 }
 0xeb6   :  { %4460 = vmatprep.subr.mxu0 %v4807_v36 }
 0xeb8   :  { %v2770_v34 = vpop.permute.xlu1 %2769  ;;  %4453 = vmatmul.mubr.msk.f32.vlgmr.msra.gmra.mrb[22].mxu0 %vm223_vm2, %v2597_v30  ;;  %v3110_v38 = vpop.permute.xlu0 %3109 }
 0xeb9   :  { %4461 = vmatpush3.xpose.msk.msra.mxu0 %vm223_vm2, %v2770_v34  ;;  %4462 = vmatprep.mubr.msk.f32.mxu0 %vm4808_vm1, %v4807_v36 }
 0xeba   :  { %4470 = vmatprep.subr.mxu0 %v4807_v36 }
 0xebc   :  { %v2936_v37 = vpop.permute.xlu1 %2935  ;;  %4463 = vmatmul.mubr.msk.f32.vlgmr.msra.gmra.mrb[24].mxu0 %vm223_vm2, %v5284_v24  ;;  %v3282_v39 = vpop.permute.xlu0 %3281 }
 0xebd   :  { %4471 = vmatpush3.xpose.msk.msra.mxu0 %vm223_vm2, %v2938_v32  ;;  %4472 = vmatprep.mubr.msk.f32.mxu0 %vm4808_vm1, %v4807_v36 }
 0xebe   :  { %4480 = vmatprep.subr.mxu0 %v4807_v36 }
 0xec0   :  { %4473 = vmatmul.mubr.msk.f32.vlgmr.msra.gmra.mrb[26].mxu0 %vm223_vm2, %v2936_v37  ;;  %v3108_v40 = vpop.permute.xlu1 %3107 }
 0xec1   :  { %4481 = vmatpush3.xpose.msk.msra.mxu0 %vm223_vm2, %v3110_v38  ;;  %4482 = vmatprep.mubr.msk.f32.mxu0 %vm4808_vm1, %v4807_v36 }
 0xec2   :  { %4490 = vmatprep.subr.mxu0 %v4807_v36 }
 0xec4   :  { %4483 = vmatmul.mubr.msk.f32.vlgmr.msra.gmra.mrb[28].mxu0 %vm223_vm2, %v3108_v40  ;;  %v3280_v42 = vpop.permute.xlu1 %3279 }
 0xec5   :  { %4491 = vmatpush3.xpose.msk.msra.mxu0 %vm223_vm2, %v3282_v39  ;;  %4492 = vmatprep.mubr.msk.f32.mxu0 %vm4808_vm1, %v4807_v36 }
 0xec8   :  { %4493 = vmatmul.mubr.msk.f32.vlgmr.msra.gmra.mrb[30].mxu0 %vm223_vm2, %v3280_v42 }
 0xf7f   :  { %v2158_v43 = vpop.f32.mrb[24].mxu1 }
 0xf80   :  { %v2162_v41 = vmul.f32 0.35355338, %v2158_v43  ;;  %v4424_v44 = vpop.f32.mrb[25].mxu1  ;;  %v2326_v45 = vpop.f32.mrb[18].mxu0 }
 0xf81   :  { %v2330_v35 = vmul.f32 0.35355338, %v2326_v45  ;;  %v4434_v33 = vpop.f32.mrb[19].mxu0 }
 0xf82   :  { %v2163_v46 = vadd.f32 %v2162_v41, %v5012_v49 }
 0xf83   :  { %v2331_v47 = vadd.f32 %v2330_v35, %v5012_v49 }
 0xf84   :  { %v2164_v48 = vsel %vm223_vm2, %v2163_v46, -inf }
 0xf85   :  { %2165 = vmax.xlane.f32.xlu0 %v2164_v48  ;;  %v2332_v50 = vsel %vm223_vm2, %v2331_v47, -inf }
 0xf86   :  { %2333 = vmax.xlane.f32.xlu1 %v2332_v50 }
 0xf87   :  { %v2498_v51 = vpop.f32.mrb[20].mxu0 }
 0xf88   :  { %v2502_v52 = vmul.f32 0.35355338, %v2498_v51  ;;  %v4444_v53 = vpop.f32.mrb[21].mxu0 }
 0xf8a   :  { %v5346_v54 = vadd.f32 %v2502_v52, %v5012_v49 }
 0xf8b   :  { %v2670_v55 = vpop.f32.mrb[22].mxu0 }
 0xf8c   :  { %v2674_v56 = vmul.f32 0.35355338, %v2670_v55  ;;  %v4454_v57 = vpop.f32.mrb[23].mxu0  ;;  %v2504_v58 = vsel %vm223_vm2, %v5346_v54, -inf }
 0xf8d   :  { %2505 = vmax.xlane.f32.xlu0 %v2504_v58 }
 0xf8e   :  { %v2675_v59 = vadd.f32 %v2674_v56, %v5012_v49 }
 0xf8f   :  { %v2841_v60 = vpop.f32.mrb[24].mxu0 }
 0xf90   :  { %v2845_v61 = vmul.f32 0.35355338, %v2841_v60  ;;  %v4464_v62 = vpop.f32.mrb[25].mxu0  ;;  %v2676_v63 = vsel %vm223_vm2, %v2675_v59, -inf }
 0xf91   :  { %2677 = vmax.xlane.f32.xlu0 %v2676_v63 }
 0xf92   :  { %v2846_v0 = vadd.f32 %v2845_v61, %v5071_v21 }
 0xf93   :  { %v3009_v1 = vpop.f32.mrb[26].mxu0 }
 0xf94   :  { %v3013_v2 = vmul.f32 0.35355338, %v3009_v1  ;;  %v4474_v3 = vpop.f32.mrb[27].mxu0  ;;  %v2847_v4 = vsel %vm223_vm2, %v2846_v0, -inf }
 0xf95   :  { %2848 = vmax.xlane.f32.xlu0 %v2847_v4 }
 0xf96   :  { %v3014_v5 = vadd.f32 %v3013_v2, %v5071_v21 }
 0xf97   :  { %v3181_v6 = vpop.f32.mrb[28].mxu0 }
 0xf98   :  { %v3185_v7 = vmul.f32 0.35355338, %v3181_v6  ;;  %v4484_v8 = vpop.f32.mrb[29].mxu0  ;;  %v3015_v49 = vsel %vm223_vm2, %v3014_v5, -inf }
 0xf99   :  { %3016 = vmax.xlane.f32.xlu1 %v3015_v49 }
 0xf9a   :  { %v3186_v9 = vadd.f32 %v3185_v7, %v5071_v21 }
 0xf9b   :  { %v3353_v10 = vpop.f32.mrb[30].mxu0 }
 0xf9c   :  { %v4494_v11 = vpop.f32.mrb[31].mxu0  ;;  %v3187_v12 = vsel %vm223_vm2, %v3186_v9, -inf  ;;  %v3357_v13 = vmul.f32 0.35355338, %v3353_v10 }
 0xf9d   :  { %3188 = vmax.xlane.f32.xlu0 %v3187_v12 }
 0xf9e   :  { %v3358_v14 = vadd.f32 %v3357_v13, %v5071_v21 }
 0xfa0   :  { %v3359_v15 = vsel %vm223_vm2, %v3358_v14, -inf }
 0xfaa   :  { %2175 = vrot.lane.b32.xlu1 %v5270_v23, %s5634_s30 }
 0xfce   :  { %3360 = vmax.xlane.f32.xlu1 %v3359_v15 }
 0xfdf   :  { %2515 = vrot.lane.b32.xlu1 %v5270_v23, %s5635_s0 }
 0xfe3   :  { %2687 = vrot.lane.b32.xlu1 %v5270_v23, %s5636_s21 }
 0xfe7   :  { %2858 = vrot.lane.b32.xlu1 %v5284_v24, %s5634_s30 }
0x1012   :  { %v2166_v16 = vpop.xlane.xlu0 %2165 }
0x1013   :  { %v2167_v19 = vsub.f32 %v2163_v46, %v2166_v16  ;;  %v2334_v20 = vpop.xlane.xlu1 %2333 }
0x1014   :  { %v2335_v22 = vsub.f32 %v2331_v47, %v2334_v20 }
0x1015   :  { %v2168_v25 = vmul.f32 1.442695, %v2167_v19 }
0x1016   :  { %v2336_v26 = vmul.f32 1.442695, %v2335_v22 }
0x1017   :  { %4714 = vpow2.f32 %v2168_v25 }
0x1018   :  { %4716 = vpow2.f32 %v2336_v26 }
0x101a   :  { %v2506_v21 = vpop.xlane.xlu0 %2505 }
0x101b   :  { %v2507_v42 = vsub.f32 %v5346_v54, %v2506_v21 }
0x101d   :  { %v2508_v41 = vmul.f32 1.442695, %v2507_v42  ;;  %v4112_v42 = vld [vmem:[%s5591_s7 + $0x20] sm:$0xff] }
0x101e   :  { %v2678_v27 = vpop.xlane.xlu0 %2677 }
0x101f   :  { %v2679_v28 = vsub.f32 %v2675_v59, %v2678_v27 }
0x1021   :  { %v4715_v29 = vpop.eup %4714  ;;  %v2680_v30 = vmul.f32 1.442695, %v2679_v28 }
0x1022   :  { %v5368_v31 = vpop.eup %4716  ;;  %v2170_v32 = vsel %vm223_vm2, %v4715_v29, 0.0  ;;  %v2849_v43 = vpop.xlane.xlu0 %2848 }
0x1023   :  { %4718 = vpow2.f32 %v2680_v30  ;;  %2171 = vadd.xlane.f32.xlu0 %v2170_v32  ;;  %v2338_v34 = vsel %vm223_vm2, %v5368_v31, 0.0  ;;  %v2850_v44 = vsub.f32 %v2846_v0, %v2849_v43  ;;  %v4113_v43 = vld [vmem:[%s5591_s7 + $0x28] sm:$0xff] }
0x1024   :  { %2339 = vadd.xlane.f32.xlu1 %v2338_v34  ;;  %4720 = vpow2.f32 %v2508_v41  ;;  %v4600_v41 = vpack.c.bf16 %v4113_v43, %v4112_v42  ;;  %v4133_v42 = vld [vmem:[%s5597_s13 + $0x48] sm:$0xff] }
0x1025   :  { %v2851_v35 = vmul.f32 1.442695, %v2850_v44 }
0x1026   :  { %v3017_v37 = vpop.xlane.xlu1 %3016  ;;  %4601 = vmatprep.subr.bf16.mxu0 %v4600_v41 }
0x1027   :  { %4722 = vpow2.f32 %v2851_v35  ;;  %v3018_v46 = vsub.f32 %v3014_v5, %v3017_v37  ;;  %v4115_v35 = vld [vmem:[%s5591_s7 + $0x38] sm:$0xff]  ;;  %4603 = vmatpush3.bf16.msra.mxu0 %v4600_v41  ;;  %v4134_v41 = vld [vmem:[%s5597_s13 + $0x50] sm:$0xff] }
0x1029   :  { %v3019_v48 = vmul.f32 1.442695, %v3018_v46 }
0x102a   :  { %v2176_v38 = vpop.permute.xlu1 %2175  ;;  %v3189_v45 = vpop.xlane.xlu0 %3188 }
0x102b   :  { %4426 = vmatpush3.msra.mxu1 %v2176_v38  ;;  %v3190_v33 = vsub.f32 %v3186_v9, %v3189_v45  ;;  %v4114_v45 = vld [vmem:[%s5591_s7 + $0x30] sm:$0xff] }
0x102c   :  { %4435 = vmatprep.subr.mxu1 %v4807_v36  ;;  %v4604_v46 = vpack.c.bf16 %v4115_v35, %v4114_v45  ;;  %v4136_v35 = vld [vmem:[%s5597_s13 + $0x60] sm:$0xff] }
0x102d   :  { %v5374_v40 = vpop.eup %4718  ;;  %v3191_v47 = vmul.f32 1.442695, %v3190_v33 }
0x102e   :  { %v2682_v39 = vsel %vm223_vm2, %v5374_v40, 0.0  ;;  %v4721_v50 = vpop.eup %4720  ;;  %4605 = vmatprep.subr.bf16.mxu0 %v4604_v46 }
0x102f   :  { %2683 = vadd.xlane.f32.xlu1 %v2682_v39  ;;  %4724 = vpow2.f32 %v3191_v47  ;;  %4607 = vmatpush3.bf16.msra.mxu0 %v4604_v46 }
0x1030   :  { %4726 = vpow2.f32 %v3019_v48 }
0x1031   :  { %v4723_v51 = vpop.eup %4722 }
0x1032   :  { %v2853_v53 = vsel %vm223_vm2, %v4723_v51, 0.0 }
0x1039   :  { %2343 = vrot.lane.b32.xlu0 %v5270_v23, %s5637_s23  ;;  %v2510_v23 = vsel %vm223_vm2, %v4721_v50, 0.0  ;;  %v5385_v54 = vpop.eup %4724 }
0x103a   :  { %v3193_v57 = vsel %vm223_vm2, %v5385_v54, 0.0  ;;  %v4727_v58 = vpop.eup %4726 }
0x103b   :  { %v3021_v59 = vsel %vm223_vm2, %v4727_v58, 0.0 }
0x1040   :  { %3026 = vrot.lane.b32.xlu1 %v5284_v24, %s5637_s23 }
0x1058   :  { %2511 = vadd.xlane.f32.xlu0 %v2510_v23 }
0x105b   :  { %v3361_v52 = vpop.xlane.xlu1 %3360 }
0x105c   :  { %v3362_v55 = vsub.f32 %v3358_v14, %v3361_v52  ;;  %2854 = vadd.xlane.f32.xlu0 %v2853_v53 }
0x105e   :  { %v3363_v56 = vmul.f32 1.442695, %v3362_v55 }
0x105f   :  { %v2516_v62 = vpop.permute.xlu1 %2515 }
0x1060   :  { %4728 = vpow2.f32 %v3363_v56  ;;  %3194 = vadd.xlane.f32.xlu0 %v3193_v57 }
0x1063   :  { %v2688_v63 = vpop.permute.xlu1 %2687 }
0x1064   :  { %3022 = vadd.xlane.f32.xlu1 %v3021_v59 }
0x1067   :  { %v2859_v0 = vpop.permute.xlu1 %2858 }
0x106a   :  { %v5390_v60 = vpop.eup %4728 }
0x106b   :  { %v3365_v61 = vsel %vm223_vm2, %v5390_v60, 0.0 }
0x106c   :  { %3366 = vadd.xlane.f32.xlu0 %v3365_v61  ;;  %v4117_v61 = vld [vmem:[%s5592_s8 + $0x1] ss:$0 sm:$0xff]  ;;  %s5640_s8 = sld [smem:[#allocation11_spill]] }
0x1075   :  { %3370 = vrot.lane.b32.xlu1 %v5284_v24, %s5636_s21 }
0x1082   :  { %3198 = vrot.lane.b32.xlu0 %v5284_v24, %s5635_s0  ;;  %s4822_s0 = smov 1.0  }
0x10b0   :  { %v2172_v1 = vpop.xlane.xlu0 %2171 }
0x10b1   :  { %4730 = vrcp.f32 %v2172_v1  ;;  %v2340_v2 = vpop.xlane.xlu1 %2339 }
0x10b2   :  { %4732 = vrcp.f32 %v2340_v2 }
0x10b4   :  { %v2344_v6 = vpop.permute.xlu0 %2343 }
0x10bb   :  { %v4731_v3 = vpop.eup %4730 }
0x10bc   :  { %v2174_v4 = vmul.f32 %v4731_v3, %v4715_v29  ;;  %v4733_v5 = vpop.eup %4732  ;;  %v2684_v24 = vpop.xlane.xlu1 %2683 }
0x10bd   :  { %v2342_v7 = vmul.f32 %v4733_v5, %v5368_v31 }
0x10be   :  { %4428 = vmatmul.mubr.msk.f32.vlgmr.msra.gmra.mrb[26].mxu1 %vm223_vm2, %v2174_v4 }
0x10bf   :  { %4436 = vmatpush3.msra.mxu1 %v2344_v6  ;;  %4437 = vmatprep.mubr.msk.f32.mxu1 %vm4808_vm1, %v4807_v36 }
0x10c0   :  { %4445 = vmatprep.subr.mxu1 %v4807_v36  ;;  %v3027_v9 = vpop.permute.xlu1 %3026 }
0x10c2   :  { %4438 = vmatmul.mubr.msk.f32.vlgmr.msra.gmra.mrb[28].mxu1 %vm223_vm2, %v2342_v7 }
0x10c3   :  { %4446 = vmatpush3.msra.mxu1 %v2516_v62  ;;  %4447 = vmatprep.mubr.msk.f32.mxu1 %vm4808_vm1, %v4807_v36 }
0x10c4   :  { %4455 = vmatprep.subr.mxu1 %v4807_v36 }
0x10e5   :  { %v2512_v8 = vpop.xlane.xlu0 %2511 }
0x10e6   :  { %4734 = vrcp.f32 %v2512_v8 }
0x10e7   :  { %4736 = vrcp.f32 %v2684_v24 }
0x10e9   :  { %v2855_v49 = vpop.xlane.xlu0 %2854 }
0x10ea   :  { %4738 = vrcp.f32 %v2855_v49 }
0x10ed   :  { %v3195_v12 = vpop.xlane.xlu0 %3194 }
0x10f0   :  { %v4735_v10 = vpop.eup %4734 }
0x10f1   :  { %v2514_v11 = vmul.f32 %v4735_v10, %v4721_v50  ;;  %v3023_v13 = vpop.xlane.xlu1 %3022  ;;  %v4737_v14 = vpop.eup %4736 }
0x10f2   :  { %4740 = vrcp.f32 %v3023_v13  ;;  %v2686_v15 = vmul.f32 %v4737_v14, %v5374_v40  ;;  %v4125_v13 = vld [vmem:[%s5595_s11 + $0x28] sm:$0xff] }
0x10f3   :  { %4448 = vmatmul.mubr.msk.f32.vlgmr.msra.gmra.mrb[30].mxu1 %vm223_vm2, %v2514_v11  ;;  %4742 = vrcp.f32 %v3195_v12 }
0x10f4   :  { %4456 = vmatpush3.msra.mxu1 %v2688_v63  ;;  %4457 = vmatprep.mubr.msk.f32.mxu1 %vm4808_vm1, %v4807_v36  ;;  %v4739_v16 = vpop.eup %4738 }
0x10f5   :  { %4465 = vmatprep.subr.mxu1 %v4807_v36  ;;  %v2857_v19 = vmul.f32 %v4739_v16, %v4723_v51  ;;  %v3371_v28 = vpop.permute.xlu1 %3370  ;;  %v4127_v16 = vld [vmem:[%s5595_s11 + $0x38] sm:$0xff] }
0x10f7   :  { %4458 = vmatmul.mubr.msk.f32.vlgmr.msra.gmra.mrb[32].mxu1 %vm223_vm2, %v2686_v15  ;;  %v4126_v15 = vld [vmem:[%s5595_s11 + $0x30] sm:$0xff] }
0x10f8   :  { %4466 = vmatpush3.msra.mxu1 %v2859_v0  ;;  %4467 = vmatprep.mubr.msk.f32.mxu1 %vm4808_vm1, %v4807_v36 }
0x10f9   :  { %v3367_v20 = vpop.xlane.xlu0 %3366  ;;  %4475 = vmatprep.subr.mxu1 %v4807_v36 }
0x10fa   :  { %4744 = vrcp.f32 %v3367_v20 }
0x10fb   :  { %4468 = vmatmul.mubr.msk.f32.vlgmr.msra.gmra.mrb[34].mxu1 %vm223_vm2, %v2857_v19  ;;  %v4612_v19 = vpack.c.bf16 %v4127_v16, %v4126_v15 }
0x10fc   :  { %v4741_v22 = vpop.eup %4740  ;;  %4476 = vmatpush3.msra.mxu1 %v3027_v9  ;;  %4477 = vmatprep.mubr.msk.f32.mxu1 %vm4808_vm1, %v4807_v36 }
0x10fd   :  { %v3025_v25 = vmul.f32 %v4741_v22, %v4727_v58  ;;  %v3199_v26 = vpop.permute.xlu0 %3198  ;;  %4485 = vmatprep.subr.mxu1 %v4807_v36  ;;  %v4743_v21 = vpop.eup %4742 }
0x10fe   :  { %v3197_v27 = vmul.f32 %v4743_v21, %v5385_v54 }
0x10ff   :  { %4478 = vmatmul.mubr.msk.f32.vlgmr.msra.gmra.mrb[36].mxu1 %vm223_vm2, %v3025_v25 }
0x1100   :  { %4486 = vmatpush3.msra.mxu1 %v3199_v26  ;;  %4487 = vmatprep.mubr.msk.f32.mxu1 %vm4808_vm1, %v4807_v36 }
0x1101   :  { %4495 = vmatprep.subr.mxu1 %v4807_v36 }
0x1103   :  { %4488 = vmatmul.mubr.msk.f32.vlgmr.msra.gmra.mrb[38].mxu1 %vm223_vm2, %v3197_v27 }
0x1104   :  { %v4745_v29 = vpop.eup %4744  ;;  %4496 = vmatpush3.msra.mxu1 %v3371_v28  ;;  %4497 = vmatprep.mubr.msk.f32.mxu1 %vm4808_vm1, %v4807_v36 }
0x1105   :  { %v3369_v30 = vmul.f32 %v4745_v29, %v5390_v60  ;;  %v4122_v29 = vld [vmem:[%s5593_s9 + $0x1] ss:$0 sm:$0xff] }
0x1107   :  { %4498 = vmatmul.mubr.msk.f32.vlgmr.msra.gmra.mrb[40].mxu1 %vm223_vm2, %v3369_v30 }
0x1191   :  { %v2247_v31 = vpop.f32.mrb[26].mxu1 }
0x1192   :  { %2251 = vst.msk [vmem:[#allocation2] sm:$0xff] %vm223_vm2, %v2247_v31  ;;  %v4429_v32 = vpop.f32.mrb[27].mxu1  ;;  %v4123_v31 = vld [vmem:[%s5594_s10 + $0x1] ss:$0 sm:$0xff] }
0x1195   :  { %v2415_v34 = vpop.f32.mrb[28].mxu1 }
0x1196   :  { %2420 = vrot.lane.b32.xlu0 %v2415_v34, %s4806_s29  ;;  %v4439_v37 = vpop.f32.mrb[29].mxu1 }
0x11c6   :  { %v2587_v38 = vpop.f32.mrb[30].mxu1 }
0x11c7   :  { %2592 = vrot.lane.b32.xlu1 %v2587_v38, %s5638_s24  ;;  %v4449_v40 = vpop.f32.mrb[31].mxu1 }
0x11ca   :  { %v2759_v39 = vpop.f32.mrb[32].mxu1 }
0x11cb   :  { %2764 = vrot.lane.b32.xlu1 %v2759_v39, %s5639_s5  ;;  %v4459_v36 = vpop.f32.mrb[33].mxu1 }
0x11cc   :  { %v4132_v36 = vld [vmem:[%s5597_s13 + $0x40] sm:$0xff] }
0x11cd   :  { %v4616_v43 = vpack.c.bf16 %v4133_v42, %v4132_v36 }
0x11ce   :  { %v2930_v44 = vpop.f32.mrb[34].mxu1 }
0x11cf   :  { %2934 = vst.msk [vmem:[#allocation2 + $0x8] sm:$0xff] %vm223_vm2, %v2930_v44  ;;  %v4469_v33 = vpop.f32.mrb[35].mxu1  ;;  %v4135_v44 = vld [vmem:[%s5597_s13 + $0x58] sm:$0xff]  ;;  %4617 = vmatprep.subr.bf16.mxu0 %v4616_v43 }
0x11d0   :  { %v4620_v45 = vpack.c.bf16 %v4135_v44, %v4134_v41  ;;  %v4137_v33 = vld [vmem:[%s5597_s13 + $0x68] sm:$0xff]  ;;  %v4146_v41 = vld [vmem:[%s5599_s15 + $0x1] ss:$0 sm:$0xff] }
0x11d1   :  { %v4624_v46 = vpack.c.bf16 %v4137_v33, %v4136_v35  ;;  %v4147_v33 = vld [vmem:[%s5600_s16 + $0x1] ss:$0 sm:$0xff] }
0x11d2   :  { %v3098_v47 = vpop.f32.mrb[36].mxu1 }
0x11d3   :  { %3103 = vrot.lane.b32.xlu0 %v3098_v47, %s4806_s29  ;;  %v4479_v48 = vpop.f32.mrb[37].mxu1  ;;  %v4138_v47 = vld [vmem:[%s5597_s13 + $0x70] sm:$0xff] }
0x11d4   :  { %v4139_v48 = vld [vmem:[%s5597_s13 + $0x78] sm:$0xff] }
0x11d6   :  { %v3270_v50 = vpop.f32.mrb[38].mxu1 }
0x11d7   :  { %3275 = vrot.lane.b32.xlu0 %v3270_v50, %s5638_s24  ;;  %v4489_v23 = vpop.f32.mrb[39].mxu1  ;;  %v4628_v50 = vpack.c.bf16 %v4139_v48, %v4138_v47 }
0x11d8   :  { %v4129_v23 = vld [vmem:[%s5596_s12 + $0x1] ss:$0 sm:$0xff] }
0x11da   :  { %v3442_v51 = vpop.f32.mrb[40].mxu1 }
0x11db   :  { %3447 = vrot.lane.b32.xlu1 %v3442_v51, %s5639_s5  ;;  %v4499_v52 = vpop.f32.mrb[41].mxu1  ;;  %s4790_s5 = scalar_lea.hbm %s5604_s20, 16 }
0x11dc   :  { %p4791_p8 = scmp.ne.s32.totalorder %s5604_s20, %s4790_s5  ;;  %p4794_p9 = scmp.lt.u32.totalorder %s4790_s5, %s5604_s20 }
0x11de   :  { %p4796_p10 = pnand %p4794_p9, %p4791_p8 }
0x1208   :  { %v2421_v53 = vpop.permute.xlu0 %2420 }
0x1209   :  { %2423 = vst.msk [vmem:[#allocation2] sm:$0xff] %vm563_vm3, %v2421_v53 }
0x1239   :  { %v2593_v54 = vpop.permute.xlu1 %2592 }
0x123a   :  { %2595 = vst.msk [vmem:[#allocation2] sm:$0xff] %vm736_vm4, %v2593_v54 }
0x123d   :  { %v2765_v55 = vpop.permute.xlu1 %2764 }
0x123e   :  { %2767 = vst.msk [vmem:[#allocation2] sm:$0xff] %vm909_vm5, %v2765_v55 }
0x1245   :  { %v3104_v56 = vpop.permute.xlu0 %3103  ;;  %v3451_v57 = vld [vmem:[#allocation2] sm:$0xff] }
0x1246   :  { %3106 = vst.msk [vmem:[#allocation2 + $0x8] sm:$0xff] %vm563_vm3, %v3104_v56  ;;  %4508 = vmatprep.mubr.msk.f32.mxu0 %vm83_vm0, %v3451_v57 }
0x1249   :  { %v3276_v58 = vpop.permute.xlu0 %3275 }
0x124a   :  { %3278 = vst.msk [vmem:[#allocation2 + $0x8] sm:$0xff] %vm736_vm4, %v3276_v58 }
0x124d   :  { %v3448_v59 = vpop.permute.xlu1 %3447 }
0x124e   :  { %3450 = vst.msk [vmem:[#allocation2 + $0x8] sm:$0xff] %vm909_vm5, %v3448_v59 }
0x1255   :  { %v3452_v60 = vld [vmem:[#allocation2 + $0x8] sm:$0xff] }
0x1256   :  { %4509 = vmatmul.mubr.msk.f32.vlgmr.msra.gmra.mrb[32].mxu0 %vm83_vm0, %v3452_v60 }
0x1257   :  { %4619 = vmatpush3.bf16.msra.mxu0 %v4616_v43 }
0x1258   :  { %4621 = vmatprep.subr.bf16.mxu0 %v4620_v45 }
0x125b   :  { %4623 = vmatpush3.bf16.msra.mxu0 %v4620_v45 }
0x125c   :  { %4625 = vmatprep.subr.bf16.mxu0 %v4624_v46 }
0x125f   :  { %4627 = vmatpush3.bf16.msra.mxu0 %v4624_v46 }
0x1260   :  { %4629 = vmatprep.subr.bf16.mxu0 %v4628_v50 }
0x1263   :  { %4631 = vmatpush3.bf16.msra.mxu0 %v4628_v50 }
0x1329   :  { %v4510_v62 = vpop.f32.mrb[32].mxu0 }
0x132a   :  { %v3544_v63 = vadd.f32 %v4510_v62, %v4117_v61  ;;  %v3538_v0 = vpop.f32.mrb[33].mxu0 }
0x132b   :  { %v3539_v1 = vadd.f32 %v4117_v61, %v3538_v0 }
0x132c   :  { %v3548_v2 = vadd.f32 %v3544_v63, %v5259_v18 }
0x132d   :  { %v3547_v3 = vadd.f32 %v3539_v1, %v5257_v17  ;;  %v4124_v17 = vld [vmem:[%s5595_s11 + $0x20] sm:$0xff] }
0x132e   :  { %v3556_v4 = vsel %vm83_vm0, %v3548_v2, 0.0  ;;  %v4608_v14 = vpack.c.bf16 %v4125_v13, %v4124_v17 }
0x132f   :  { %3557 = vadd.xlane.f32.xlu1 %v3556_v4  ;;  %v3553_v5 = vsel %vm83_vm0, %v3547_v3, 0.0 }
0x1330   :  { %3554 = vadd.xlane.f32.xlu0 %v3553_v5  ;;  %4609 = vmatprep.subr.bf16.mxu1 %v4608_v14 }
0x1331   :  { %4611 = vmatpush3.bf16.msra.mxu1 %v4608_v14 }
0x1332   :  { %4613 = vmatprep.subr.bf16.mxu1 %v4612_v19 }
0x1335   :  { %4615 = vmatpush3.bf16.msra.mxu1 %v4612_v19 }
0x13bc   :  { %v3558_v6 = vpop.xlane.xlu1 %3557 }
0x13bd   :  { %v3560_v7 = vmul.f32 0.03125, %v3558_v6  ;;  %v3555_v24 = vpop.xlane.xlu0 %3554 }
0x13be   :  { %v3559_v8 = vmul.f32 0.03125, %v3555_v24 }
0x13bf   :  { %v3562_v49 = vsub.f32 %v3548_v2, %v3560_v7 }
0x13c0   :  { %v3561_v9 = vsub.f32 %v3547_v3, %v3559_v8  ;;  %v4141_v8 = vld [vmem:[%s5598_s14 + $0x1] ss:$0 sm:$0xff] }
0x13c1   :  { %v3564_v12 = vmul.f32 %v3562_v49, %v3562_v49 }
0x13c2   :  { %v3563_v10 = vmul.f32 %v3561_v9, %v3561_v9 }
0x13c3   :  { %v3568_v18 = vsel %vm83_vm0, %v3564_v12, 0.0 }
0x13c4   :  { %v3565_v11 = vsel %vm83_vm0, %v3563_v10, 0.0 }
0x13c5   :  { %3566 = vadd.xlane.f32.xlu0 %v3565_v11 }
0x13c9   :  { %3569 = vadd.xlane.f32.xlu0 %v3568_v18 }
0x1452   :  { %v3567_v20 = vpop.xlane.xlu0 %3566 }
0x1453   :  { %v3571_v22 = vmul.f32 0.03125, %v3567_v20 }
0x1455   :  { %v3573_v25 = vadd.f32 1e-12, %v3571_v22 }
0x1456   :  { %v3570_v26 = vpop.xlane.xlu0 %3569 }
0x1457   :  { %4746 = vrsqrt.f32 %v3573_v25  ;;  %v3572_v21 = vmul.f32 0.03125, %v3570_v26 }
0x1459   :  { %v3574_v27 = vadd.f32 1e-12, %v3572_v21 }
0x145b   :  { %4748 = vrsqrt.f32 %v3574_v27 }
0x1461   :  { %v4747_v28 = vpop.eup %4746 }
0x1462   :  { %v3577_v30 = vmul.f32 %v4747_v28, %v3561_v9  ;;  %v3853_v28 = vld [vmem:[%s5601_s17] sm:$0xff] }
0x1464   :  { %v3585_v32 = vmul.f32 %v4122_v29, %v3577_v30 }
0x1465   :  { %v4749_v34 = vpop.eup %4748 }
0x1466   :  { %v3578_v37 = vmul.f32 %v4749_v34, %v3562_v49  ;;  %v3593_v38 = vadd.f32 %v4123_v31, %v3585_v32  ;;  %v3856_v32 = vld [vmem:[%s5601_s17 + $0x18] sm:$0xff] }
0x1468   :  { %v3586_v40 = vmul.f32 %v4122_v29, %v3578_v37  ;;  %4519 = vmatprep.mubr.msk.f32.mxu1 %vm83_vm0, %v3593_v38  ;;  %v3854_v29 = vld [vmem:[%s5601_s17 + $0x8] sm:$0xff] }
0x1469   :  { %v4632_v30 = vpack.c.bf16 %v3854_v29, %v3853_v28 }
0x146a   :  { %v3594_v39 = vadd.f32 %v4123_v31, %v3586_v40  ;;  %v3855_v31 = vld [vmem:[%s5601_s17 + $0x10] sm:$0xff] }
0x146b   :  { %4633 = vmatprep.subr.bf16.mxu1 %v4632_v30  ;;  %v4636_v34 = vpack.c.bf16 %v3856_v32, %v3855_v31 }
0x146c   :  { %4520 = vmatmul.mubr.msk.f32.vlgmr.msra.gmra.mrb[42].mxu1 %vm83_vm0, %v3594_v39 }
0x146d   :  { %4635 = vmatpush3.bf16.msra.mxu1 %v4632_v30 }
0x146e   :  { %4637 = vmatprep.subr.bf16.mxu1 %v4636_v34 }
0x1471   :  { %4639 = vmatpush3.bf16.msra.mxu1 %v4636_v34 }
0x153f   :  { %v4521_v51 = vpop.f32.mrb[42].mxu1 }
0x1540   :  { %v3686_v52 = vadd.f32 %v4521_v51, %v4129_v23  ;;  %v3680_v53 = vpop.f32.mrb[43].mxu1 }
0x1541   :  { %v3681_v54 = vadd.f32 %v4129_v23, %v3680_v53  ;;  %v4148_v23 = vld [vmem:[%s5602_s18] ss:$0 sm:$0xff] }
0x1542   :  { %v3692_v55 = vmul.f32 0.044715, %v3686_v52  ;;  %v3690_v6 = vmul.f32 0.5, %v3686_v52 }
0x1543   :  { %v3691_v56 = vmul.f32 0.044715, %v3681_v54  ;;  %v3689_v4 = vmul.f32 0.5, %v3681_v54 }
0x1544   :  { %v3694_v57 = vmul.f32 %v3692_v55, %v3686_v52 }
0x1545   :  { %v3693_v58 = vmul.f32 %v3691_v56, %v3681_v54 }
0x1546   :  { %v3696_v59 = vmul.f32 %v3694_v57, %v3686_v52 }
0x1547   :  { %v3695_v60 = vmul.f32 %v3693_v58, %v3681_v54 }
0x1548   :  { %v3698_v61 = vadd.f32 %v3696_v59, %v3686_v52 }
0x1549   :  { %v3697_v62 = vadd.f32 %v3695_v60, %v3681_v54 }
0x154a   :  { %v3700_v63 = vmul.f32 0.7978846, %v3698_v61 }
0x154b   :  { %v3699_v0 = vmul.f32 0.7978846, %v3697_v62 }
0x154c   :  { %4750 = vtanh.f32 %v3700_v63 }
0x154d   :  { %4752 = vtanh.f32 %v3699_v0 }
0x1556   :  { %v4751_v1 = vpop.eup %4750 }
0x1557   :  { %v4753_v2 = vpop.eup %4752  ;;  %v3704_v3 = vadd.f32 1.0, %v4751_v1 }
0x1558   :  { %v3703_v5 = vadd.f32 1.0, %v4753_v2 }
0x1559   :  { %v3706_v24 = vmul.f32 %v3704_v3, %v3690_v6  ;;  %v3973_v3 = vld [vmem:[%s5640_s8 + $0x8] sm:$0xff] }
0x155a   :  { %v3705_v7 = vmul.f32 %v3703_v5, %v3689_v4  ;;  %v3977_v4 = vsel %vm3945_vm7, %v3973_v3, 0.0  ;;  %v3972_v5 = vld [vmem:[%s5640_s8] sm:$0xff] }
0x155b   :  { %v3974_v6 = vsel %vm3945_vm7, %v3972_v5, 0.0 }
0x155c   :  { %4538 = vmatprep.mubr.msk.f32.mxu0 %vm1863_vm6, %v3705_v7 }
0x155d   :  { %4539 = vmatmul.mubr.msk.f32.vlgmr.msra.gmra.mrb[34].mxu0 %vm1863_vm6, %v3706_v24 }
0x1630   :  { %v4540_v49 = vpop.f32.mrb[34].mxu0 }
0x1631   :  { %v3802_v9 = vadd.f32 %v4540_v49, %v4141_v8  ;;  %v3796_v10 = vpop.f32.mrb[35].mxu0 }
0x1632   :  { %v3797_v11 = vadd.f32 %v4141_v8, %v3796_v10 }
0x1633   :  { %v3806_v12 = vadd.f32 %v3802_v9, %v3594_v39 }
0x1634   :  { %v3805_v18 = vadd.f32 %v3797_v11, %v3593_v38 }
0x1635   :  { %v3814_v17 = vsel %vm83_vm0, %v3806_v12, 0.0 }
0x1636   :  { %3815 = vadd.xlane.f32.xlu1 %v3814_v17  ;;  %v3811_v13 = vsel %vm83_vm0, %v3805_v18, 0.0 }
0x1637   :  { %3812 = vadd.xlane.f32.xlu0 %v3811_v13 }
0x16c3   :  { %v3816_v14 = vpop.xlane.xlu1 %3815 }
0x16c4   :  { %v3818_v15 = vmul.f32 0.03125, %v3816_v14  ;;  %v3813_v16 = vpop.xlane.xlu0 %3812 }
0x16c5   :  { %v3817_v19 = vmul.f32 0.03125, %v3813_v16 }
0x16c6   :  { %v3820_v20 = vsub.f32 %v3806_v12, %v3818_v15 }
0x16c7   :  { %v3819_v22 = vsub.f32 %v3805_v18, %v3817_v19 }
0x16c8   :  { %v3822_v25 = vmul.f32 %v3820_v20, %v3820_v20 }
0x16c9   :  { %v3821_v26 = vmul.f32 %v3819_v22, %v3819_v22 }
0x16ca   :  { %v3826_v21 = vsel %vm83_vm0, %v3822_v25, 0.0 }
0x16cb   :  { %3827 = vadd.xlane.f32.xlu1 %v3826_v21  ;;  %v3823_v27 = vsel %vm83_vm0, %v3821_v26, 0.0 }
0x16cc   :  { %3824 = vadd.xlane.f32.xlu0 %v3823_v27 }
0x1758   :  { %v3828_v37 = vpop.xlane.xlu1 %3827 }
0x1759   :  { %v3830_v38 = vmul.f32 0.03125, %v3828_v37  ;;  %v3825_v40 = vpop.xlane.xlu0 %3824 }
0x175a   :  { %v3829_v39 = vmul.f32 0.03125, %v3825_v40 }
0x175b   :  { %v3832_v36 = vadd.f32 1e-12, %v3830_v38 }
0x175c   :  { %v3831_v42 = vadd.f32 1e-12, %v3829_v39 }
0x175d   :  { %4754 = vrsqrt.f32 %v3832_v36 }
0x175e   :  { %4756 = vrsqrt.f32 %v3831_v42 }
0x1767   :  { %v4755_v43 = vpop.eup %4754 }
0x1768   :  { %v4757_v44 = vpop.eup %4756  ;;  %v3836_v45 = vmul.f32 %v4755_v43, %v3820_v20 }
0x1769   :  { %v3835_v35 = vmul.f32 %v4757_v44, %v3819_v22 }
0x176a   :  { %v3844_v46 = vmul.f32 %v4146_v41, %v3836_v45 }
0x176b   :  { %v3843_v47 = vmul.f32 %v4146_v41, %v3835_v35 }
0x176c   :  { %v3852_v50 = vadd.f32 %v4147_v33, %v3844_v46 }
0x176d   :  { %v3851_v48 = vadd.f32 %v4147_v33, %v3843_v47 }
0x176f   :  { %4549 = vmatprep.mubr.msk.f32.mxu1 %vm83_vm0, %v3851_v48 }
0x1770   :  { %4550 = vmatmul.mubr.msk.f32.vlgmr.msra.gmra.mrb[44].mxu1 %vm83_vm0, %v3852_v50 }
0x1843   :  { %v4551_v51 = vpop.f32.mrb[44].mxu1 }
0x1844   :  { %v3942_v52 = vadd.f32 %v4551_v51, %v4148_v23  ;;  %v3936_v53 = vpop.f32.mrb[45].mxu1 }
0x1845   :  { %v3937_v54 = vadd.f32 %v4148_v23, %v3936_v53 }
0x1846   :  { %3947 = vst.msk [vmem:[%s5603_s19 + $0x8] sm:$0xff] %vm3945_vm7, %v3942_v52  ;;  %v3951_v55 = vsel %vm3945_vm7, %v3942_v52, -inf  ;;  %v3983_v7 = vmul.f32 %v3973_v3, %v3942_v52 }
0x1847   :  { %3946 = vst.msk [vmem:[%s5603_s19] sm:$0xff] %vm3945_vm7, %v3937_v54  ;;  %3952 = vmax.xlane.f32.xlu1 %v3951_v55  ;;  %v3948_v56 = vsel %vm3945_vm7, %v3937_v54, -inf  ;;  %v3982_v24 = vmul.f32 %v3972_v5, %v3937_v54 }
0x1848   :  { %3949 = vmax.xlane.f32.xlu0 %v3948_v56  ;;  %v3987_v8 = vsel %vm3945_vm7, %v3983_v7, 0.0 }
0x1849   :  { %v3984_v49 = vsel %vm3945_vm7, %v3982_v24, 0.0 }
0x18d4   :  { %v3953_v57 = vpop.xlane.xlu1 %3952 }
0x18d5   :  { %v3955_v58 = vsub.f32 %v3942_v52, %v3953_v57  ;;  %v3950_v59 = vpop.xlane.xlu0 %3949 }
0x18d6   :  { %v3954_v60 = vsub.f32 %v3937_v54, %v3950_v59 }
0x18d7   :  { %v3958_v61 = vmul.f32 1.442695, %v3955_v58 }
0x18d8   :  { %v3956_v62 = vmul.f32 1.442695, %v3954_v60 }
0x18d9   :  { %4758 = vpow2.f32 %v3958_v61 }
0x18da   :  { %4760 = vpow2.f32 %v3956_v62 }
0x18e3   :  { %v4759_v63 = vpop.eup %4758 }
0x18e4   :  { %v4761_v0 = vpop.eup %4760  ;;  %v3963_v1 = vsel %vm3945_vm7, %v4759_v63, 0.0 }
0x18e5   :  { %3964 = vadd.xlane.f32.xlu1 %v3963_v1  ;;  %v3960_v2 = vsel %vm3945_vm7, %v4761_v0, 0.0 }
0x18e6   :  { %3961 = vadd.xlane.f32.xlu0 %v3960_v2 }
0x18e9   :  { %3978 = vadd.xlane.f32.xlu1 %v3977_v4 }
0x18ea   :  { %3975 = vadd.xlane.f32.xlu0 %v3974_v6 }
0x18ed   :  { %3988 = vadd.xlane.f32.xlu1 %v3987_v8 }
0x18ee   :  { %3985 = vadd.xlane.f32.xlu0 %v3984_v49 }
0x1972   :  { %v3965_v9 = vpop.xlane.xlu1 %3964 }
0x1973   :  { %4762 = vlog2.f32 %v3965_v9  ;;  %v3962_v10 = vpop.xlane.xlu0 %3961 }
0x1974   :  { %4764 = vlog2.f32 %v3962_v10 }
0x1976   :  { %v3979_v11 = vpop.xlane.xlu1 %3978 }
0x1977   :  { %v3994_v12 = vsel %vm3992_vm8, %v3979_v11, 0.0  ;;  %v3976_v18 = vpop.xlane.xlu0 %3975 }
0x1978   :  { %v3993_v17 = vsel %vm3992_vm8, %v3976_v18, 0.0 }
0x1979   :  { %v3995_v13 = vadd.f32 %v3994_v12, %v3993_v17 }
0x197a   :  { %v3989_v21 = vpop.xlane.xlu1 %3988 }
0x197b   :  { %3996 = vadd.xlane.f32.xlu0 %v3995_v13  ;;  %v3986_v28 = vpop.xlane.xlu0 %3985 }
0x197d   :  { %v4763_v14 = vpop.eup %4762 }
0x197e   :  { %v4765_v15 = vpop.eup %4764  ;;  %v3969_v16 = vmul.f32 0.6931472, %v4763_v14 }
0x197f   :  { %v3967_v19 = vmul.f32 0.6931472, %v4765_v15 }
0x1980   :  { %v3971_v20 = vadd.f32 %v3969_v16, %v3953_v57 }
0x1981   :  { %v3970_v22 = vadd.f32 %v3967_v19, %v3950_v59 }
0x1982   :  { %v3981_v25 = vmul.f32 %v3979_v11, %v3971_v20 }
0x1983   :  { %v3980_v26 = vmul.f32 %v3976_v18, %v3970_v22 }
0x1984   :  { %v3991_v27 = vsub.f32 %v3981_v25, %v3989_v21 }
0x1985   :  { %v3990_v29 = vsub.f32 %v3980_v26, %v3986_v28 }
0x1986   :  { %v4007_v30 = vsel %vm3992_vm8, %v3991_v27, 0.0 }
0x1987   :  { %v4006_v31 = vsel %vm3992_vm8, %v3990_v29, 0.0 }
0x1988   :  { %v4008_v32 = vadd.f32 %v4007_v30, %v4006_v31 }
0x198a   :  { %4009 = vadd.xlane.f32.xlu1 %v4008_v32 }
0x1a08   :  { %v3997_v34 = vpop.xlane.xlu0 %3996 }
0x1a09   :  { %v3998_v37 = vrot.slane %v3997_v34, 4 }
0x1a0b   :  { %v3999_v38 = vadd.f32 %v3998_v37, %v3997_v34 }
0x1a0d   :  { %v4000_v40 = vrot.slane %v3999_v38, 2 }
0x1a0f   :  { %v4001_v39 = vadd.f32 %v4000_v40, %v3999_v38 }
0x1a11   :  { %v4002_v36 = vrot.slane %v4001_v39, 1 }
0x1a13   :  { %v4003_v42 = vadd.f32 %v4002_v36, %v4001_v39 }
0x1a15   :  { %4640 = vpush %v4003_v42 }
0x1a17   :  { %v4010_v43 = vpop.xlane.xlu1 %4009 }
0x1a18   :  { %v4011_v41 = vrot.slane %v4010_v43, 4 }
0x1a1a   :  { %v4012_v44 = vadd.f32 %v4011_v41, %v4010_v43 }
0x1a1c   :  { %v4013_v45 = vrot.slane %v4012_v44, 2 }
0x1a1e   :  { %v4014_v35 = vadd.f32 %v4013_v45, %v4012_v44 }
0x1a20   :  { %v4015_v33 = vrot.slane %v4014_v35, 1 }
0x1a22   :  { %v4016_v46 = vadd.f32 %v4015_v33, %v4014_v35 }
0x1a24   :  { %4642 = vpush %v4016_v46 }
0x1a46   :  { %s4641_s30 = spop %4640 }
0x1a47   :  { %s4005_s21 = smax.f32 %s4822_s0, %s4641_s30 }
0x1a48   :  { %v4018_v47 = vstv %s4005_s21 }
0x1a49   :  { %4766 = vrcp.f32 %v4018_v47 }
0x1a53   :  { %v4767_v48 = vpop.eup %4766 }
0x1a54   :  { %4644 = vpush %v4767_v48 }
0x1a55   :  { %s4643_s23 = spop %4642 }
0x1a85   :  { %s4645_s24 = spop %4644 }
0x1a86   :  { %s4021_s12 = smul.f32 %s4645_s24, %s4643_s23 }
0x1a88   :  { %4023 = sst [smem:[#allocation6]] %s4021_s12 }
0x1a89   :  { %4799 = shalt.err (!%p4796_p10)
}
0x1a8a   :  { %s4823_s25 = smov [#allocation6]  }
0x1a8b   :  { %4033 = dma.smem_to_hbm %s4823_s25, 16, %s5604_s20, [#allocation5]  }
0x1a8c   :  { %4802 = dma.done.wait [#allocation5], 16  }
0x1a8d   :  { %4803 = vsyncadd [#allocation5], 4294967280 }
0x1a8e   :  { %4039 = sfence }
0x1a8f   :  { %4040 = vsyncpa [#allocation4], 1 }
0x1a90   :  { %4041 = vsyncpa [#allocation5], 1 }

</bundles_post_ra>
